<compile_context>
chip_gen: v6e
topology: v6e:2x2x1
jax: 0.10.0
libtpu: 0.0.40
codegen_flags: <defaults>
</compile_context>

<pallas_src>
import functools

import jax
import jax.numpy as jnp
from jax.experimental import pallas as pl
from jax.experimental.pallas import tpu as pltpu

NEG_SLOPE = 0.2
BN_EPS = 0.8                      # nn.BatchNorm2d(C, 0.8) -> eps = 0.8
MATMUL_DTYPE = jnp.bfloat16       # MXU input dtype (f32 accumulation)

# Tile caps. tn=256 suits v6e/v7x (2x256^2 MXU); on v5e 128 would match the
# 4x128^2 MXU better — tn never exceeds what keeps VMEM far below all limits.
TM_MAX = 512
TN_MAX = 256
TK_MAX = 1152
VMEM_LIMIT_BYTES = 32 * 1024 * 1024   # safe headroom on v5e/v6e/v7x


def _round_up(x, m):
    return ((x + m - 1) // m) * m


def _leaky(x, slope=NEG_SLOPE):
    return jnp.where(x >= 0.0, x, slope * x)


def _epilogue(y, activation, negative_slope):
    if activation == "leaky":
        return jnp.where(y >= 0.0, y, negative_slope * y)
    if activation == "sigmoid":
        return 1.0 / (1.0 + jnp.exp(-y))
    return y                                    # "none"


# ----------------------------- Pallas kernels ------------------------------ #

def _matmul_kernel_multi_k(p_ref, w_ref, b_ref, o_ref, acc_ref, *,
                           activation, negative_slope):
    """Tiled matmul with K-axis accumulation, fused bias + activation."""
    k = pl.program_id(2)

    @pl.when(k == 0)
    def _():
        acc_ref[...] = jnp.zeros_like(acc_ref)

    acc_ref[...] += jnp.dot(p_ref[...], w_ref[...],
                            preferred_element_type=jnp.float32)

    @pl.when(k == pl.num_programs(2) - 1)
    def _():
        y = _epilogue(acc_ref[...] + b_ref[...], activation, negative_slope)
        o_ref[...] = y.astype(o_ref.dtype)


def _matmul_kernel_single_k(p_ref, w_ref, b_ref, o_ref, *,
                            activation, negative_slope):
    """Single-K-tile matmul: no accumulator scratch, fused bias + activation."""
    y = jnp.dot(p_ref[...], w_ref[...], preferred_element_type=jnp.float32)
    y = _epilogue(y + b_ref[...], activation, negative_slope)
    o_ref[...] = y.astype(o_ref.dtype)


def fused_matmul(patches, w_mat, bias, *, activation="leaky",
                 negative_slope=NEG_SLOPE, out_dtype=jnp.float32):
    """(M,K) @ (K,N) + bias (+activation), tiled/padded for the TPU MXU."""
    M, K = patches.shape
    Kw, N = w_mat.shape
    assert K == Kw

    # M rounded to 16 so bf16 outputs also satisfy sublane packing cleanly.
    tm = min(_round_up(M, 16), TM_MAX)
    tn = min(_round_up(N, 128), TN_MAX)
    tk = min(_round_up(K, 128), TK_MAX)
    Mp, Np, Kp = _round_up(M, tm), _round_up(N, tn), _round_up(K, tk)

    p = jnp.pad(patches.astype(MATMUL_DTYPE), ((0, Mp - M), (0, Kp - K)))
    w = jnp.pad(w_mat.astype(MATMUL_DTYPE), ((0, Kp - K), (0, Np - N)))
    b = jnp.pad(bias.reshape(1, -1).astype(jnp.float32), ((0, 0), (0, Np - N)))

    n_k = Kp // tk
    itm = jnp.dtype(MATMUL_DTYPE).itemsize
    cost = pl.CostEstimate(
        flops=2 * Mp * Np * Kp,
        transcendentals=Mp * Np if activation == "sigmoid" else 0,
        bytes_accessed=(Mp * Kp * itm + Kp * Np * itm
                        + Mp * Np * jnp.dtype(out_dtype).itemsize))

    if n_k == 1:
        kern = functools.partial(_matmul_kernel_single_k,
                                 activation=activation,
                                 negative_slope=negative_slope)
        grid_spec = pltpu.PrefetchScalarGridSpec(
            num_scalar_prefetch=0,
            grid=(Mp // tm, Np // tn),
            in_specs=[pl.BlockSpec((tm, tk), lambda i, j: (i, 0)),
                      pl.BlockSpec((tk, tn), lambda i, j: (0, j)),
                      pl.BlockSpec((1, tn), lambda i, j: (0, j))],
            out_specs=pl.BlockSpec((tm, tn), lambda i, j: (i, j)))
        semantics = ("parallel", "parallel")
    else:
        kern = functools.partial(_matmul_kernel_multi_k,
                                 activation=activation,
                                 negative_slope=negative_slope)
        grid_spec = pltpu.PrefetchScalarGridSpec(
            num_scalar_prefetch=0,
            grid=(Mp // tm, Np // tn, n_k),
            in_specs=[pl.BlockSpec((tm, tk), lambda i, j, k: (i, k)),
                      pl.BlockSpec((tk, tn), lambda i, j, k: (k, j)),
                      pl.BlockSpec((1, tn), lambda i, j, k: (0, j))],
            out_specs=pl.BlockSpec((tm, tn), lambda i, j, k: (i, j)),
            scratch_shapes=[pltpu.VMEM((tm, tn), jnp.float32)])
        semantics = ("parallel", "parallel", "arbitrary")

    out = pl.pallas_call(
        kern,
        out_shape=jax.ShapeDtypeStruct((Mp, Np), out_dtype),
        grid_spec=grid_spec,
        compiler_params=pltpu.CompilerParams(
            dimension_semantics=semantics,
            vmem_limit_bytes=VMEM_LIMIT_BYTES),
        cost_estimate=cost,
    )(p, w, b)
    return out[:M, :N]


# ------------------------------- JAX glue ---------------------------------- #

def im2col(x, ksize, stride, padding):
    """x: (B,H,W,C) -> (B*Ho*Wo, k*k*C) with (kh, kw, C) ordering."""
    B, H, W, C = x.shape
    if padding:
        x = jnp.pad(x, ((0, 0), (padding, padding), (padding, padding), (0, 0)))
    Hp, Wp = H + 2 * padding, W + 2 * padding
    Ho = (Hp - ksize) // stride + 1
    Wo = (Wp - ksize) // stride + 1
    cols = []
    for i in range(ksize):
        for j in range(ksize):
            cols.append(x[:, i:i + stride * Ho:stride,
                          j:j + stride * Wo:stride, :])
    p = jnp.concatenate(cols, axis=-1)                 # (B, Ho, Wo, k*k*C)
    return p.reshape(B * Ho * Wo, ksize * ksize * C), (B, Ho, Wo)


def fold_bn(w, b, gamma, beta, mean, var, eps=BN_EPS):
    """Fold eval-mode BN into conv weight/bias; also return BN(0) (pad value)."""
    scale = gamma / jnp.sqrt(var + eps)                # (Cout,)
    w_f = w * scale                                    # (3,3,Cin,Cout)*(Cout,)
    b_f = (b - mean) * scale + beta
    shift = beta - mean * scale                        # BN applied to 0
    return w_f, b_f, shift


def conv_block(x, w, b, stride, *, prepadded=False, activation="leaky",
               out_dtype=MATMUL_DTYPE):
    """Conv2d(k=3, pad=1) + bias [+ folded BN] + activation via Pallas matmul."""
    cout = w.shape[-1]
    patches, (B, Ho, Wo) = im2col(x, 3, stride, 0 if prepadded else 1)
    out = fused_matmul(patches, w.reshape(-1, cout), b,
                       activation=activation, out_dtype=out_dtype)
    return out.reshape(B, Ho, Wo, cout)


def discriminator_forward(img_nchw, params):
    # NCHW -> NHWC, bf16 activations end-to-end (f32 accumulation per matmul).
    x = jnp.transpose(img_nchw, (0, 2, 3, 1)).astype(MATMUL_DTYPE)

    # block 1: Conv(C,64,s2) + LeakyReLU  (Dropout2d = identity in eval)
    x = conv_block(x, params["w1"], params["b1"], stride=2)

    # block 2: Conv(64,128,s2) -> ZeroPad2d((1,0,1,0)) -> BN(128,0.8) -> LReLU
    w2f, b2f, shift2 = fold_bn(params["w2"], params["b2"], params["g2"],
                               params["beta2"], params["rm2"], params["rv2"])
    x = conv_block(x, w2f, b2f, stride=2)
    # The ZeroPad2d sits before the (folded) BN+LReLU, so padded cells equal
    # leaky(BN(0)) = leaky(shift2).  Build conv3's fully padded input directly
    # (also folds conv3's own zero padding -> saves one HBM round trip).
    pad_val = _leaky(shift2).astype(x.dtype)                   # (128,)
    B, H2, W2, C2 = x.shape
    xp3 = jnp.zeros((B, H2 + 3, W2 + 3, C2), x.dtype)
    xp3 = xp3.at[:, 1:-1, 1:-1, :].set(
        jnp.broadcast_to(pad_val, (B, H2 + 1, W2 + 1, C2)))
    xp3 = xp3.at[:, 2:-1, 2:-1, :].set(x)

    # block 3: Conv(128,256,s2) -> BN -> LReLU
    w3f, b3f, _ = fold_bn(params["w3"], params["b3"], params["g3"],
                          params["beta3"], params["rm3"], params["rv3"])
    x = conv_block(xp3, w3f, b3f, stride=2, prepadded=True)

    # block 4: Conv(256,512,s1) -> BN -> LReLU
    w4f, b4f, _ = fold_bn(params["w4"], params["b4"], params["g4"],
                          params["beta4"], params["rm4"], params["rv4"])
    x = conv_block(x, w4f, b4f, stride=1)
    # TODO(synk): block-4 patches are still materialized by XLA-side im2col
    # (9x HBM amplification); an in-kernel shifted-slice conv would remove it.

    # block 5: Conv(512,1,s1) + AdaptiveAvgPool2d(1) + Sigmoid.
    # The conv is affine, so pooling commutes with it: pool the im2col patches
    # first (9 cheap reductions, M collapses to B), then one lane-padded dot
    # with sigmoid fused in the kernel epilogue.
    B, H4, W4, C4 = x.shape
    xp5 = jnp.pad(x, ((0, 0), (1, 1), (1, 1), (0, 0)))
    cols = []
    for ki in range(3):
        for kj in range(3):
            cols.append(jnp.mean(
                xp5[:, ki:ki + H4, kj:kj + W4, :].astype(jnp.float32),
                axis=(1, 2)))                                  # (B, C4)
    p_bar = jnp.concatenate(cols, axis=-1)                      # (B, 9*C4)
    v = fused_matmul(p_bar, params["w5"].reshape(-1, 1), params["b5"],
                     activation="sigmoid", out_dtype=jnp.float32)  # (B, 1)
    return v[:, 0]                                              # (B,)


# ------------------------------ param init --------------------------------- #

def init_params(key, channels):
    chans = [(channels, 64), (64, 128), (128, 256), (256, 512), (512, 1)]
    params = {}
    keys = jax.random.split(key, len(chans))
    for n, (cin, cout) in enumerate(chans, start=1):
        kw, kb, k1, k2, k3, k4 = jax.random.split(keys[n - 1], 6)
        fan_in = 3 * 3 * cin
        params[f"w{n}"] = (jax.random.normal(kw, (3, 3, cin, cout), jnp.float32)
                           / jnp.sqrt(float(fan_in)))
        params[f"b{n}"] = 0.1 * jax.random.normal(kb, (cout,), jnp.float32)
        if n in (2, 3, 4):  # layers with BatchNorm2d
            params[f"g{n}"] = 1.0 + 0.1 * jax.random.normal(k1, (cout,), jnp.float32)
            params[f"beta{n}"] = 0.1 * jax.random.normal(k2, (cout,), jnp.float32)
            params[f"rm{n}"] = 0.1 * jax.random.normal(k3, (cout,), jnp.float32)
            params[f"rv{n}"] = 0.5 + jax.random.uniform(k4, (cout,), jnp.float32)
    return params


if __name__ == "__main__":
    B, C, IMG = 2, 4, 16
    key = jax.random.PRNGKey(0)
    k_params, k_img = jax.random.split(key)
    params = init_params(k_params, C)
    img = jax.random.normal(k_img, (B, C, IMG, IMG), jnp.float32)  # NCHW input

    fwd = jax.jit(discriminator_forward)
    out = fwd(img, params)
    out = jax.block_until_ready(out)

    assert out.shape == (B,), out.shape
    assert bool(jnp.all(jnp.isfinite(out)))
    assert bool(jnp.all((out > 0.0) & (out < 1.0)))  # sigmoid output range
    print("KERNEL_OK")
</pallas_src>

<mosaic_0001>
module attributes {stable_mosaic.version = 11 : i64} {
  func.func @_matmul_kernel_single_k(%arg0: i32, %arg1: i32, %arg2: memref<128x128xbf16, #tpu.memory_space<vmem>>, %arg3: memref<128x128xbf16, #tpu.memory_space<vmem>>, %arg4: memref<1x128xf32, #tpu.memory_space<vmem>>, %arg5: memref<128x128xbf16, #tpu.memory_space<vmem>>) attributes {dimension_semantics = [#tpu.dimension_semantics<parallel>, #tpu.dimension_semantics<parallel>], iteration_bounds = array<i64: 1, 1>, scalar_prefetch = 0 : i64, scratch_operands = 0 : i64, tpu.core_type = #tpu.core_type<tc>, window_params = [{transform_indices = @transform_0, window_bounds = array<i64: 128, 128>}, {transform_indices = @transform_1, window_bounds = array<i64: 128, 128>}, {transform_indices = @transform_2, window_bounds = array<i64: 1, 128>}, {transform_indices = @transform_3, window_bounds = array<i64: 128, 128>}]} {
    %c0 = arith.constant 0 : index
    %c0_0 = arith.constant 0 : index
    %0 = vector.load %arg2[%c0, %c0_0] : memref<128x128xbf16, #tpu.memory_space<vmem>>, vector<128x128xbf16>
    %c0_1 = arith.constant 0 : index
    %c0_2 = arith.constant 0 : index
    %1 = vector.load %arg3[%c0_1, %c0_2] : memref<128x128xbf16, #tpu.memory_space<vmem>>, vector<128x128xbf16>
    %cst = arith.constant dense<0.000000e+00> : vector<128x128xf32>
    %2 = tpu.matmul %0, %1, %cst {dimension_numbers = #tpu.dot_dimension_numbers<[1], [0], [0], [1], [0, 0, 1, 1], [], []>} : vector<128x128xbf16>, vector<128x128xbf16>, vector<128x128xf32> -> vector<128x128xf32>
    %c0_3 = arith.constant 0 : index
    %c0_4 = arith.constant 0 : index
    %3 = vector.load %arg4[%c0_3, %c0_4] : memref<1x128xf32, #tpu.memory_space<vmem>>, vector<1x128xf32>
    %4 = vector.broadcast %3 : vector<1x128xf32> to vector<128x128xf32>
    %5 = arith.addf %2, %4 : vector<128x128xf32>
    %cst_5 = arith.constant 0.000000e+00 : f32
    %6 = vector.broadcast %cst_5 : f32 to vector<128x128xf32>
    %7 = arith.cmpf oge, %5, %6 : vector<128x128xf32>
    %cst_6 = arith.constant 2.000000e-01 : f32
    %8 = vector.broadcast %cst_6 : f32 to vector<128x128xf32>
    %9 = arith.mulf %8, %5 : vector<128x128xf32>
    %10 = arith.select %7, %5, %9 : vector<128x128xi1>, vector<128x128xf32>
    %11 = arith.truncf %10 : vector<128x128xf32> to vector<128x128xbf16>
    %c0_7 = arith.constant 0 : index
    %c0_8 = arith.constant 0 : index
    %12 = vector.load %arg5[%c0_7, %c0_8] : memref<128x128xbf16, #tpu.memory_space<vmem>>, vector<128x128xbf16>
    tpu.vector_store %arg5[%c0_7, %c0_8], %11 {strides = array<i32>} : memref<128x128xbf16, #tpu.memory_space<vmem>>, vector<128x128xbf16>,
    return
  }
  func.func @transform_0(%arg0: i32, %arg1: i32) -> (i32, i32) {
    %c0_i32 = arith.constant 0 : i32
    %c0_i32_0 = arith.constant 0 : i32
    return %arg0, %c0_i32 : i32, i32
  }
  func.func @transform_1(%arg0: i32, %arg1: i32) -> (i32, i32) {
    %c0_i32 = arith.constant 0 : i32
    %c0_i32_0 = arith.constant 0 : i32
    return %c0_i32, %arg1 : i32, i32
  }
  func.func @transform_2(%arg0: i32, %arg1: i32) -> (i32, i32) {
    %c0_i32 = arith.constant 0 : i32
    %c0_i32_0 = arith.constant 0 : i32
    return %c0_i32, %arg1 : i32, i32
  }
  func.func @transform_3(%arg0: i32, %arg1: i32) -> (i32, i32) {
    %c0_i32 = arith.constant 0 : i32
    return %arg0, %arg1 : i32, i32
  }
}

module attributes {stable_mosaic.version = 11 : i64} {
  func.func @_matmul_kernel_single_k(%arg0: i32, %arg1: i32, %arg2: memref<32x640xbf16, #tpu.memory_space<vmem>>, %arg3: memref<640x128xbf16, #tpu.memory_space<vmem>>, %arg4: memref<1x128xf32, #tpu.memory_space<vmem>>, %arg5: memref<32x128xbf16, #tpu.memory_space<vmem>>) attributes {dimension_semantics = [#tpu.dimension_semantics<parallel>, #tpu.dimension_semantics<parallel>], iteration_bounds = array<i64: 1, 1>, scalar_prefetch = 0 : i64, scratch_operands = 0 : i64, tpu.core_type = #tpu.core_type<tc>, window_params = [{transform_indices = @transform_0, window_bounds = array<i64: 32, 640>}, {transform_indices = @transform_1, window_bounds = array<i64: 640, 128>}, {transform_indices = @transform_2, window_bounds = array<i64: 1, 128>}, {transform_indices = @transform_3, window_bounds = array<i64: 32, 128>}]} {
    %c0 = arith.constant 0 : index
    %c0_0 = arith.constant 0 : index
    %0 = vector.load %arg2[%c0, %c0_0] : memref<32x640xbf16, #tpu.memory_space<vmem>>, vector<32x640xbf16>
    %c0_1 = arith.constant 0 : index
    %c0_2 = arith.constant 0 : index
    %1 = vector.load %arg3[%c0_1, %c0_2] : memref<640x128xbf16, #tpu.memory_space<vmem>>, vector<640x128xbf16>
    %cst = arith.constant dense<0.000000e+00> : vector<32x128xf32>
    %2 = tpu.matmul %0, %1, %cst {dimension_numbers = #tpu.dot_dimension_numbers<[1], [0], [0], [1], [0, 0, 1, 1], [], []>} : vector<32x640xbf16>, vector<640x128xbf16>, vector<32x128xf32> -> vector<32x128xf32>
    %c0_3 = arith.constant 0 : index
    %c0_4 = arith.constant 0 : index
    %3 = vector.load %arg4[%c0_3, %c0_4] : memref<1x128xf32, #tpu.memory_space<vmem>>, vector<1x128xf32>
    %4 = vector.broadcast %3 : vector<1x128xf32> to vector<32x128xf32>
    %5 = arith.addf %2, %4 : vector<32x128xf32>
    %cst_5 = arith.constant 0.000000e+00 : f32
    %6 = vector.broadcast %cst_5 : f32 to vector<32x128xf32>
    %7 = arith.cmpf oge, %5, %6 : vector<32x128xf32>
    %cst_6 = arith.constant 2.000000e-01 : f32
    %8 = vector.broadcast %cst_6 : f32 to vector<32x128xf32>
    %9 = arith.mulf %8, %5 : vector<32x128xf32>
    %10 = arith.select %7, %5, %9 : vector<32x128xi1>, vector<32x128xf32>
    %11 = arith.truncf %10 : vector<32x128xf32> to vector<32x128xbf16>
    %c0_7 = arith.constant 0 : index
    %c0_8 = arith.constant 0 : index
    %12 = vector.load %arg5[%c0_7, %c0_8] : memref<32x128xbf16, #tpu.memory_space<vmem>>, vector<32x128xbf16>
    tpu.vector_store %arg5[%c0_7, %c0_8], %11 {strides = array<i32>} : memref<32x128xbf16, #tpu.memory_space<vmem>>, vector<32x128xbf16>,
    return
  }
  func.func @transform_0(%arg0: i32, %arg1: i32) -> (i32, i32) {
    %c0_i32 = arith.constant 0 : i32
    %c0_i32_0 = arith.constant 0 : i32
    return %arg0, %c0_i32 : i32, i32
  }
  func.func @transform_1(%arg0: i32, %arg1: i32) -> (i32, i32) {
    %c0_i32 = arith.constant 0 : i32
    %c0_i32_0 = arith.constant 0 : i32
    return %c0_i32, %arg1 : i32, i32
  }
  func.func @transform_2(%arg0: i32, %arg1: i32) -> (i32, i32) {
    %c0_i32 = arith.constant 0 : i32
    %c0_i32_0 = arith.constant 0 : i32
    return %c0_i32, %arg1 : i32, i32
  }
  func.func @transform_3(%arg0: i32, %arg1: i32) -> (i32, i32) {
    %c0_i32 = arith.constant 0 : i32
    return %arg0, %arg1 : i32, i32
  }
}

module attributes {stable_mosaic.version = 11 : i64} {
  func.func @_matmul_kernel_single_k(%arg0: i32, %arg1: i32, %arg2: memref<32x1152xbf16, #tpu.memory_space<vmem>>, %arg3: memref<1152x256xbf16, #tpu.memory_space<vmem>>, %arg4: memref<1x256xf32, #tpu.memory_space<vmem>>, %arg5: memref<32x256xbf16, #tpu.memory_space<vmem>>) attributes {dimension_semantics = [#tpu.dimension_semantics<parallel>, #tpu.dimension_semantics<parallel>], iteration_bounds = array<i64: 1, 1>, scalar_prefetch = 0 : i64, scratch_operands = 0 : i64, tpu.core_type = #tpu.core_type<tc>, window_params = [{transform_indices = @transform_0, window_bounds = array<i64: 32, 1152>}, {transform_indices = @transform_1, window_bounds = array<i64: 1152, 256>}, {transform_indices = @transform_2, window_bounds = array<i64: 1, 256>}, {transform_indices = @transform_3, window_bounds = array<i64: 32, 256>}]} {
    %c0 = arith.constant 0 : index
    %c0_0 = arith.constant 0 : index
    %0 = vector.load %arg2[%c0, %c0_0] : memref<32x1152xbf16, #tpu.memory_space<vmem>>, vector<32x1152xbf16>
    %c0_1 = arith.constant 0 : index
    %c0_2 = arith.constant 0 : index
    %1 = vector.load %arg3[%c0_1, %c0_2] : memref<1152x256xbf16, #tpu.memory_space<vmem>>, vector<1152x256xbf16>
    %cst = arith.constant dense<0.000000e+00> : vector<32x256xf32>
    %2 = tpu.matmul %0, %1, %cst {dimension_numbers = #tpu.dot_dimension_numbers<[1], [0], [0], [1], [0, 0, 1, 1], [], []>} : vector<32x1152xbf16>, vector<1152x256xbf16>, vector<32x256xf32> -> vector<32x256xf32>
    %c0_3 = arith.constant 0 : index
    %c0_4 = arith.constant 0 : index
    %3 = vector.load %arg4[%c0_3, %c0_4] : memref<1x256xf32, #tpu.memory_space<vmem>>, vector<1x256xf32>
    %4 = vector.broadcast %3 : vector<1x256xf32> to vector<32x256xf32>
    %5 = arith.addf %2, %4 : vector<32x256xf32>
    %cst_5 = arith.constant 0.000000e+00 : f32
    %6 = vector.broadcast %cst_5 : f32 to vector<32x256xf32>
    %7 = arith.cmpf oge, %5, %6 : vector<32x256xf32>
    %cst_6 = arith.constant 2.000000e-01 : f32
    %8 = vector.broadcast %cst_6 : f32 to vector<32x256xf32>
    %9 = arith.mulf %8, %5 : vector<32x256xf32>
    %10 = arith.select %7, %5, %9 : vector<32x256xi1>, vector<32x256xf32>
    %11 = arith.truncf %10 : vector<32x256xf32> to vector<32x256xbf16>
    %c0_7 = arith.constant 0 : index
    %c0_8 = arith.constant 0 : index
    %12 = vector.load %arg5[%c0_7, %c0_8] : memref<32x256xbf16, #tpu.memory_space<vmem>>, vector<32x256xbf16>
    tpu.vector_store %arg5[%c0_7, %c0_8], %11 {strides = array<i32>} : memref<32x256xbf16, #tpu.memory_space<vmem>>, vector<32x256xbf16>,
    return
  }
  func.func @transform_0(%arg0: i32, %arg1: i32) -> (i32, i32) {
    %c0_i32 = arith.constant 0 : i32
    %c0_i32_0 = arith.constant 0 : i32
    return %arg0, %c0_i32 : i32, i32
  }
  func.func @transform_1(%arg0: i32, %arg1: i32) -> (i32, i32) {
    %c0_i32 = arith.constant 0 : i32
    %c0_i32_0 = arith.constant 0 : i32
    return %c0_i32, %arg1 : i32, i32
  }
  func.func @transform_2(%arg0: i32, %arg1: i32) -> (i32, i32) {
    %c0_i32 = arith.constant 0 : i32
    %c0_i32_0 = arith.constant 0 : i32
    return %c0_i32, %arg1 : i32, i32
  }
  func.func @transform_3(%arg0: i32, %arg1: i32) -> (i32, i32) {
    %c0_i32 = arith.constant 0 : i32
    return %arg0, %arg1 : i32, i32
  }
}

module attributes {stable_mosaic.version = 11 : i64} {
  func.func @_matmul_kernel_multi_k(%arg0: i32, %arg1: i32, %arg2: i32, %arg3: memref<32x1152xbf16, #tpu.memory_space<vmem>>, %arg4: memref<1152x256xbf16, #tpu.memory_space<vmem>>, %arg5: memref<1x256xf32, #tpu.memory_space<vmem>>, %arg6: memref<32x256xbf16, #tpu.memory_space<vmem>>, %arg7: memref<32x256xf32, #tpu.memory_space<vmem>>) attributes {dimension_semantics = [#tpu.dimension_semantics<parallel>, #tpu.dimension_semantics<parallel>, #tpu.dimension_semantics<arbitrary>], iteration_bounds = array<i64: 1, 2, 2>, scalar_prefetch = 0 : i64, scratch_operands = 1 : i64, tpu.core_type = #tpu.core_type<tc>, window_params = [{transform_indices = @transform_0, window_bounds = array<i64: 32, 1152>}, {transform_indices = @transform_1, window_bounds = array<i64: 1152, 256>}, {transform_indices = @transform_2, window_bounds = array<i64: 1, 256>}, {transform_indices = @transform_3, window_bounds = array<i64: 32, 256>}]} {
    %c0_i32 = arith.constant 0 : i32
    %0 = arith.cmpi eq, %arg2, %c0_i32 : i32
    %1 = arith.extui %0 : i1 to i32
    %c0_i32_0 = arith.constant 0 : i32
    %2 = arith.cmpi ne, %1, %c0_i32_0 : i32
    scf.if %2 {
      %cst_9 = arith.constant 0.000000e+00 : f32
      %12 = vector.broadcast %cst_9 : f32 to vector<32x256xf32>
      %c0_10 = arith.constant 0 : index
      %c0_11 = arith.constant 0 : index
      %13 = vector.load %arg7[%c0_10, %c0_11] : memref<32x256xf32, #tpu.memory_space<vmem>>, vector<32x256xf32>
      tpu.vector_store %arg7[%c0_10, %c0_11], %12 {strides = array<i32>} : memref<32x256xf32, #tpu.memory_space<vmem>>, vector<32x256xf32>,
    } else {
    }
    %c0 = arith.constant 0 : index
    %c0_1 = arith.constant 0 : index
    %3 = vector.load %arg7[%c0, %c0_1] : memref<32x256xf32, #tpu.memory_space<vmem>>, vector<32x256xf32>
    %c0_2 = arith.constant 0 : index
    %c0_3 = arith.constant 0 : index
    %4 = vector.load %arg3[%c0_2, %c0_3] : memref<32x1152xbf16, #tpu.memory_space<vmem>>, vector<32x1152xbf16>
    %c0_4 = arith.constant 0 : index
    %c0_5 = arith.constant 0 : index
    %5 = vector.load %arg4[%c0_4, %c0_5] : memref<1152x256xbf16, #tpu.memory_space<vmem>>, vector<1152x256xbf16>
    %cst = arith.constant dense<0.000000e+00> : vector<32x256xf32>
    %6 = tpu.matmul %4, %5, %cst {dimension_numbers = #tpu.dot_dimension_numbers<[1], [0], [0], [1], [0, 0, 1, 1], [], []>} : vector<32x1152xbf16>, vector<1152x256xbf16>, vector<32x256xf32> -> vector<32x256xf32>
    %7 = arith.addf %3, %6 : vector<32x256xf32>
    %c0_6 = arith.constant 0 : index
    %c0_7 = arith.constant 0 : index
    %8 = vector.load %arg7[%c0_6, %c0_7] : memref<32x256xf32, #tpu.memory_space<vmem>>, vector<32x256xf32>
    tpu.vector_store %arg7[%c0_6, %c0_7], %7 {strides = array<i32>} : memref<32x256xf32, #tpu.memory_space<vmem>>, vector<32x256xf32>,
    %c1_i32 = arith.constant 1 : i32
    %9 = arith.cmpi eq, %arg2, %c1_i32 : i32
    %10 = arith.extui %9 : i1 to i32
    %c0_i32_8 = arith.constant 0 : i32
    %11 = arith.cmpi ne, %10, %c0_i32_8 : i32
    scf.if %11 {
      %c0_9 = arith.constant 0 : index
      %c0_10 = arith.constant 0 : index
      %12 = vector.load %arg7[%c0_9, %c0_10] : memref<32x256xf32, #tpu.memory_space<vmem>>, vector<32x256xf32>
      %c0_11 = arith.constant 0 : index
      %c0_12 = arith.constant 0 : index
      %13 = vector.load %arg5[%c0_11, %c0_12] : memref<1x256xf32, #tpu.memory_space<vmem>>, vector<1x256xf32>
      %14 = vector.broadcast %13 : vector<1x256xf32> to vector<32x256xf32>
      %15 = arith.addf %12, %14 : vector<32x256xf32>
      %cst_13 = arith.constant 0.000000e+00 : f32
      %16 = vector.broadcast %cst_13 : f32 to vector<32x256xf32>
      %17 = arith.cmpf oge, %15, %16 : vector<32x256xf32>
      %cst_14 = arith.constant 2.000000e-01 : f32
      %18 = vector.broadcast %cst_14 : f32 to vector<32x256xf32>
      %19 = arith.mulf %18, %15 : vector<32x256xf32>
      %20 = arith.select %17, %15, %19 : vector<32x256xi1>, vector<32x256xf32>
      %21 = arith.truncf %20 : vector<32x256xf32> to vector<32x256xbf16>
      %c0_15 = arith.constant 0 : index
      %c0_16 = arith.constant 0 : index
      %22 = vector.load %arg6[%c0_15, %c0_16] : memref<32x256xbf16, #tpu.memory_space<vmem>>, vector<32x256xbf16>
      tpu.vector_store %arg6[%c0_15, %c0_16], %21 {strides = array<i32>} : memref<32x256xbf16, #tpu.memory_space<vmem>>, vector<32x256xbf16>,
    } else {
    }
    return
  }
  func.func @transform_0(%arg0: i32, %arg1: i32, %arg2: i32) -> (i32, i32) {
    %c0_i32 = arith.constant 0 : i32
    return %arg0, %arg2 : i32, i32
  }
  func.func @transform_1(%arg0: i32, %arg1: i32, %arg2: i32) -> (i32, i32) {
    %c0_i32 = arith.constant 0 : i32
    return %arg2, %arg1 : i32, i32
  }
  func.func @transform_2(%arg0: i32, %arg1: i32, %arg2: i32) -> (i32, i32) {
    %c0_i32 = arith.constant 0 : i32
    %c0_i32_0 = arith.constant 0 : i32
    return %c0_i32, %arg1 : i32, i32
  }
  func.func @transform_3(%arg0: i32, %arg1: i32, %arg2: i32) -> (i32, i32) {
    %c0_i32 = arith.constant 0 : i32
    return %arg0, %arg1 : i32, i32
  }
}

module attributes {stable_mosaic.version = 11 : i64} {
  func.func @_matmul_kernel_multi_k(%arg0: i32, %arg1: i32, %arg2: i32, %arg3: memref<16x1152xbf16, #tpu.memory_space<vmem>>, %arg4: memref<1152x128xbf16, #tpu.memory_space<vmem>>, %arg5: memref<1x128xf32, #tpu.memory_space<vmem>>, %arg6: memref<16x128xf32, #tpu.memory_space<vmem>>, %arg7: memref<16x128xf32, #tpu.memory_space<vmem>>) attributes {dimension_semantics = [#tpu.dimension_semantics<parallel>, #tpu.dimension_semantics<parallel>, #tpu.dimension_semantics<arbitrary>], iteration_bounds = array<i64: 1, 1, 4>, scalar_prefetch = 0 : i64, scratch_operands = 1 : i64, tpu.core_type = #tpu.core_type<tc>, window_params = [{transform_indices = @transform_0, window_bounds = array<i64: 16, 1152>}, {transform_indices = @transform_1, window_bounds = array<i64: 1152, 128>}, {transform_indices = @transform_2, window_bounds = array<i64: 1, 128>}, {transform_indices = @transform_3, window_bounds = array<i64: 16, 128>}]} {
    %c0_i32 = arith.constant 0 : i32
    %0 = arith.cmpi eq, %arg2, %c0_i32 : i32
    %1 = arith.extui %0 : i1 to i32
    %c0_i32_0 = arith.constant 0 : i32
    %2 = arith.cmpi ne, %1, %c0_i32_0 : i32
    scf.if %2 {
      %cst_9 = arith.constant 0.000000e+00 : f32
      %12 = vector.broadcast %cst_9 : f32 to vector<16x128xf32>
      %c0_10 = arith.constant 0 : index
      %c0_11 = arith.constant 0 : index
      %13 = vector.load %arg7[%c0_10, %c0_11] : memref<16x128xf32, #tpu.memory_space<vmem>>, vector<16x128xf32>
      tpu.vector_store %arg7[%c0_10, %c0_11], %12 {strides = array<i32>} : memref<16x128xf32, #tpu.memory_space<vmem>>, vector<16x128xf32>,
    } else {
    }
    %c0 = arith.constant 0 : index
    %c0_1 = arith.constant 0 : index
    %3 = vector.load %arg7[%c0, %c0_1] : memref<16x128xf32, #tpu.memory_space<vmem>>, vector<16x128xf32>
    %c0_2 = arith.constant 0 : index
    %c0_3 = arith.constant 0 : index
    %4 = vector.load %arg3[%c0_2, %c0_3] : memref<16x1152xbf16, #tpu.memory_space<vmem>>, vector<16x1152xbf16>
    %c0_4 = arith.constant 0 : index
    %c0_5 = arith.constant 0 : index
    %5 = vector.load %arg4[%c0_4, %c0_5] : memref<1152x128xbf16, #tpu.memory_space<vmem>>, vector<1152x128xbf16>
    %cst = arith.constant dense<0.000000e+00> : vector<16x128xf32>
    %6 = tpu.matmul %4, %5, %cst {dimension_numbers = #tpu.dot_dimension_numbers<[1], [0], [0], [1], [0, 0, 1, 1], [], []>} : vector<16x1152xbf16>, vector<1152x128xbf16>, vector<16x128xf32> -> vector<16x128xf32>
    %7 = arith.addf %3, %6 : vector<16x128xf32>
    %c0_6 = arith.constant 0 : index
    %c0_7 = arith.constant 0 : index
    %8 = vector.load %arg7[%c0_6, %c0_7] : memref<16x128xf32, #tpu.memory_space<vmem>>, vector<16x128xf32>
    tpu.vector_store %arg7[%c0_6, %c0_7], %7 {strides = array<i32>} : memref<16x128xf32, #tpu.memory_space<vmem>>, vector<16x128xf32>,
    %c3_i32 = arith.constant 3 : i32
    %9 = arith.cmpi eq, %arg2, %c3_i32 : i32
    %10 = arith.extui %9 : i1 to i32
    %c0_i32_8 = arith.constant 0 : i32
    %11 = arith.cmpi ne, %10, %c0_i32_8 : i32
    scf.if %11 {
      %c0_9 = arith.constant 0 : index
      %c0_10 = arith.constant 0 : index
      %12 = vector.load %arg7[%c0_9, %c0_10] : memref<16x128xf32, #tpu.memory_space<vmem>>, vector<16x128xf32>
      %c0_11 = arith.constant 0 : index
      %c0_12 = arith.constant 0 : index
      %13 = vector.load %arg5[%c0_11, %c0_12] : memref<1x128xf32, #tpu.memory_space<vmem>>, vector<1x128xf32>
      %14 = vector.broadcast %13 : vector<1x128xf32> to vector<16x128xf32>
      %15 = arith.addf %12, %14 : vector<16x128xf32>
      %cst_13 = arith.constant 0.000000e+00 : f32
      %16 = vector.broadcast %cst_13 : f32 to vector<16x128xf32>
      %17 = arith.subf %16, %15 : vector<16x128xf32>
      %18 = math.exp %17 : vector<16x128xf32>
      %cst_14 = arith.constant 1.000000e+00 : f32
      %19 = vector.broadcast %cst_14 : f32 to vector<16x128xf32>
      %20 = arith.addf %19, %18 : vector<16x128xf32>
      %cst_15 = arith.constant 1.000000e+00 : f32
      %21 = vector.broadcast %cst_15 : f32 to vector<16x128xf32>
      %22 = arith.divf %21, %20 : vector<16x128xf32>
      %c0_16 = arith.constant 0 : index
      %c0_17 = arith.constant 0 : index
      %23 = vector.load %arg6[%c0_16, %c0_17] : memref<16x128xf32, #tpu.memory_space<vmem>>, vector<16x128xf32>
      tpu.vector_store %arg6[%c0_16, %c0_17], %22 {strides = array<i32>} : memref<16x128xf32, #tpu.memory_space<vmem>>, vector<16x128xf32>,
    } else {
    }
    return
  }
  func.func @transform_0(%arg0: i32, %arg1: i32, %arg2: i32) -> (i32, i32) {
    %c0_i32 = arith.constant 0 : i32
    return %arg0, %arg2 : i32, i32
  }
  func.func @transform_1(%arg0: i32, %arg1: i32, %arg2: i32) -> (i32, i32) {
    %c0_i32 = arith.constant 0 : i32
    return %arg2, %arg1 : i32, i32
  }
  func.func @transform_2(%arg0: i32, %arg1: i32, %arg2: i32) -> (i32, i32) {
    %c0_i32 = arith.constant 0 : i32
    %c0_i32_0 = arith.constant 0 : i32
    return %c0_i32, %arg1 : i32, i32
  }
  func.func @transform_3(%arg0: i32, %arg1: i32, %arg2: i32) -> (i32, i32) {
    %c0_i32 = arith.constant 0 : i32
    return %arg0, %arg1 : i32, i32
  }
}

</mosaic_0001>

<bundles_post_ra>
// kernel: discriminator_forward.5
= control target key start
LH: loop header
LB: loop body
LE: loop exit
PB: predicated region body
PF: predicated region fallthrough
CT: control target
= control target key end

     0   :  { %s674_s1 = inlined_call_operand.vmem [shape: bf16[128,128], index: 1, kind: input, shape index: {}]   ;;  %s675_s0 = inlined_call_operand.vmem [shape: bf16[128,128], index: 0, kind: input, shape index: {}]   ;;  %s676_s2 = inlined_call_operand.vmem [shape: f32[1,128], index: 2, kind: input, shape index: {}]   ;;  %s677_s3 = inlined_call_operand.vmem [shape: bf16[128,128], index: 3, kind: output, shape index: {}]  }
   0x1   :  { %v539_v0 = vld [vmem:[%s674_s1 + $0x38] sm:$0xff]   ;;  %v540_v1 = vld [vmem:[%s674_s1 + $0x30] sm:$0xff]   ;;  %v541_v2 = vld [vmem:[%s674_s1 + $0x28] sm:$0xff]  }
   0x2   :  { %491 = vmatprep.subr.bf16.mxu0 %v539_v0  ;;  %523 = vmatprep.subr.bf16.mxu1 %v539_v0  ;;  %v542_v3 = vld [vmem:[%s674_s1 + $0x20] sm:$0xff]   ;;  %v543_v6 = vld [vmem:[%s674_s1 + $0x18] sm:$0xff]   ;;  %v544_v7 = vld [vmem:[%s674_s1 + $0x10] sm:$0xff]  }
   0x3   :  { %492 = vmatpush3.bf16.msra.mxu0 %v539_v0  ;;  %531 = vmatpush3.bf16.msra.mxu1 %v539_v0  ;;  %v547_v4 = vld [vmem:[%s675_s0] sm:$0xff]   ;;  %v545_v8 = vld [vmem:[%s674_s1 + $0x8] sm:$0xff]   ;;  %v551_v12 = vld [vmem:[%s675_s0 + $0x10] sm:$0xff]  }
   0x4   :  { %493 = vmatprep.subr.bf16.mxu0 %v540_v1  ;;  %524 = vmatprep.subr.bf16.mxu1 %v540_v1  ;;  %v548_v5 = vld [vmem:[%s675_s0 + $0x20] sm:$0xff]   ;;  %v549_v10 = vld [vmem:[%s675_s0 + $0x8] sm:$0xff]   ;;  %v552_v13 = vld [vmem:[%s675_s0 + $0x30] sm:$0xff]  }
   0x5   :  { %507 = vmatprep.mubr.bf16.mxu0 %v547_v4  ;;  %515 = vmatprep.mubr.bf16.mxu1 %v548_v5  ;;  %v546_v9 = vld [vmem:[%s674_s1] sm:$0xff]   ;;  %v550_v11 = vld [vmem:[%s675_s0 + $0x28] sm:$0xff]   ;;  %v553_v14 = vld [vmem:[%s675_s0 + $0x18] sm:$0xff]  }
   0x6   :  { %v554_v15 = vld [vmem:[%s675_s0 + $0x38] sm:$0xff]   ;;  %v626_v16 = vld [vmem:[%s676_s2] ss:$0 sm:$0xff] }
   0x7   :  { %494 = vmatpush3.bf16.msra.mxu0 %v540_v1  ;;  %532 = vmatpush3.bf16.msra.mxu1 %v540_v1 }
   0x8   :  { %495 = vmatprep.subr.bf16.mxu0 %v541_v2  ;;  %525 = vmatprep.subr.bf16.mxu1 %v541_v2 }
   0xb   :  { %496 = vmatpush3.bf16.msra.mxu0 %v541_v2  ;;  %533 = vmatpush3.bf16.msra.mxu1 %v541_v2 }
   0xc   :  { %497 = vmatprep.subr.bf16.mxu0 %v542_v3  ;;  %526 = vmatprep.subr.bf16.mxu1 %v542_v3 }
   0xf   :  { %498 = vmatpush3.bf16.msra.mxu0 %v542_v3  ;;  %534 = vmatpush3.bf16.msra.mxu1 %v542_v3 }
  0x10   :  { %499 = vmatprep.subr.bf16.mxu0 %v543_v6  ;;  %527 = vmatprep.subr.bf16.mxu1 %v543_v6 }
  0x13   :  { %500 = vmatpush3.bf16.msra.mxu0 %v543_v6  ;;  %535 = vmatpush3.bf16.msra.mxu1 %v543_v6 }
  0x14   :  { %501 = vmatprep.subr.bf16.mxu0 %v544_v7  ;;  %528 = vmatprep.subr.bf16.mxu1 %v544_v7 }
  0x17   :  { %502 = vmatpush3.bf16.msra.mxu0 %v544_v7  ;;  %536 = vmatpush3.bf16.msra.mxu1 %v544_v7 }
  0x18   :  { %503 = vmatprep.subr.bf16.mxu0 %v545_v8  ;;  %529 = vmatprep.subr.bf16.mxu1 %v545_v8 }
  0x1b   :  { %504 = vmatpush3.bf16.msra.mxu0 %v545_v8  ;;  %537 = vmatpush3.bf16.msra.mxu1 %v545_v8 }
  0x1c   :  { %505 = vmatprep.subr.bf16.mxu0 %v546_v9  ;;  %530 = vmatprep.subr.bf16.mxu1 %v546_v9 }
  0x1f   :  { %506 = vmatpush3.bf16.msra.mxu0 %v546_v9  ;;  %538 = vmatpush3.bf16.msra.mxu1 %v546_v9 }
  0x22   :  { %508 = vmatmul.mubr.bf16.vlgmr.msra.gmra.mxu0 %v549_v10  ;;  %516 = vmatmul.mubr.bf16.vlgmr.msra.gmra.mxu1 %v550_v11 }
  0x23   :  { %511 = vmatprep.mubr.bf16.mxu0 %v551_v12  ;;  %519 = vmatprep.mubr.bf16.mxu1 %v552_v13 }
  0x2a   :  { %512 = vmatmul.mubr.bf16.gmra.mxu0 %v553_v14  ;;  %520 = vmatmul.mubr.bf16.gmra.mxu1 %v554_v15 }
  0xe2   :  { %v509_v17 = vpop.f32.mrf.mxu0  ;;  %v517_v18 = vpop.f32.mrf.mxu1 }
  0xe3   :  { %v193_v19 = vadd.f32 %v509_v17, %v626_v16  ;;  %v225_v20 = vadd.f32 %v517_v18, %v626_v16 }
  0xe4   :  { %v184_v21 = vpop.f32.mrf.mxu0  ;;  %v216_v22 = vpop.f32.mrf.mxu1 }
  0xe5   :  { %vm249_vm0 = vcmp.ge.f32.partialorder %v193_v19, 0.0  ;;  %v265_v23 = vmul.f32 0.2, %v193_v19  ;;  %vm257_vm1 = vcmp.ge.f32.partialorder %v225_v20, 0.0  ;;  %v273_v24 = vmul.f32 0.2, %v225_v20 }
  0xe6   :  { %v185_v25 = vadd.f32 %v626_v16, %v184_v21  ;;  %v217_v26 = vadd.f32 %v626_v16, %v216_v22  ;;  %v510_v27 = vpop.f32.mrf.mxu0  ;;  %v518_v28 = vpop.f32.mrf.mxu1 }
  0xe7   :  { %v196_v29 = vadd.f32 %v510_v27, %v626_v16  ;;  %v228_v30 = vadd.f32 %v518_v28, %v626_v16  ;;  %v281_v31 = vsel %vm249_vm0, %v193_v19, %v265_v23  ;;  %v289_v32 = vsel %vm257_vm1, %v225_v20, %v273_v24 }
  0xe8   :  { %vm247_vm2 = vcmp.ge.f32.partialorder %v185_v25, 0.0  ;;  %v263_v33 = vmul.f32 0.2, %v185_v25  ;;  %v187_v34 = vpop.f32.mrf.mxu0  ;;  %v219_v35 = vpop.f32.mrf.mxu1  ;;  %vm255_vm5 = vcmp.ge.f32.partialorder %v217_v26, 0.0  ;;  %v271_v38 = vmul.f32 0.2, %v217_v26 }
  0xe9   :  { %vm250_vm3 = vcmp.ge.f32.partialorder %v196_v29, 0.0  ;;  %v266_v36 = vmul.f32 0.2, %v196_v29  ;;  %vm258_vm4 = vcmp.ge.f32.partialorder %v228_v30, 0.0  ;;  %v274_v37 = vmul.f32 0.2, %v228_v30 }
  0xea   :  { %v188_v39 = vadd.f32 %v626_v16, %v187_v34  ;;  %v220_v40 = vadd.f32 %v626_v16, %v219_v35  ;;  %v513_v41 = vpop.f32.mrf.mxu0  ;;  %v521_v42 = vpop.f32.mrf.mxu1  ;;  %v279_v53 = vsel %vm247_vm2, %v185_v25, %v263_v33  ;;  %v287_v58 = vsel %vm255_vm5, %v217_v26, %v271_v38 }
  0xeb   :  { %v282_v43 = vsel %vm250_vm3, %v196_v29, %v266_v36  ;;  %v290_v44 = vsel %vm258_vm4, %v228_v30, %v274_v37  ;;  %v209_v45 = vadd.f32 %v513_v41, %v626_v16  ;;  %v241_v46 = vadd.f32 %v521_v42, %v626_v16 }
  0xec   :  { %v436_v47 = vpack.c.bf16 %v282_v43, %v281_v31  ;;  %v456_v48 = vpack.c.bf16 %v290_v44, %v289_v32  ;;  %vm248_vm6 = vcmp.ge.f32.partialorder %v188_v39, 0.0  ;;  %v264_v49 = vmul.f32 0.2, %v188_v39  ;;  %v200_v50 = vpop.f32.mrf.mxu0  ;;  %v232_v51 = vpop.f32.mrf.mxu1 }
  0xed   :  { %vm256_vm7 = vcmp.ge.f32.partialorder %v220_v40, 0.0  ;;  %v272_v52 = vmul.f32 0.2, %v220_v40  ;;  %v201_v55 = vadd.f32 %v626_v16, %v200_v50  ;;  %v233_v61 = vadd.f32 %v626_v16, %v232_v51 }
  0xee   :  { %468 = vst [vmem:[%s677_s3 + $0x8] sm:$0xff] %v436_v47   ;;  %472 = vst [vmem:[%s677_s3 + $0x28] sm:$0xff] %v456_v48   ;;  %v280_v54 = vsel %vm248_vm6, %v188_v39, %v264_v49  ;;  %v514_v56 = vpop.f32.mrf.mxu0  ;;  %v522_v57 = vpop.f32.mrf.mxu1  ;;  %vm253_vm8 = vcmp.ge.f32.partialorder %v209_v45, 0.0  ;;  %v269_v63 = vmul.f32 0.2, %v209_v45  ;;  %vm261_vm9 = vcmp.ge.f32.partialorder %v241_v46, 0.0 }
  0xef   :  { %v431_v59 = vpack.c.bf16 %v280_v54, %v279_v53  ;;  %v288_v60 = vsel %vm256_vm7, %v220_v40, %v272_v52  ;;  %v277_v2 = vmul.f32 0.2, %v241_v46  ;;  %vm251_vm10 = vcmp.ge.f32.partialorder %v201_v55, 0.0 }
  0xf0   :  { %v451_v62 = vpack.c.bf16 %v288_v60, %v287_v58  ;;  %v203_v0 = vpop.f32.mrf.mxu0  ;;  %v235_v1 = vpop.f32.mrf.mxu1  ;;  %v212_v3 = vadd.f32 %v514_v56, %v626_v16  ;;  %v244_v4 = vadd.f32 %v522_v57, %v626_v16  ;;  %v267_v5 = vmul.f32 0.2, %v201_v55 }
  0xf1   :  { %432 = vst [vmem:[%s677_s3] sm:$0xff] %v431_v59   ;;  %vm259_vm11 = vcmp.ge.f32.partialorder %v233_v61, 0.0  ;;  %v204_v6 = vadd.f32 %v626_v16, %v203_v0  ;;  %v236_v7 = vadd.f32 %v626_v16, %v235_v1  ;;  %v275_v8 = vmul.f32 0.2, %v233_v61 }
  0xf2   :  { %471 = vst [vmem:[%s677_s3 + $0x20] sm:$0xff] %v451_v62   ;;  %vm254_vm12 = vcmp.ge.f32.partialorder %v212_v3, 0.0  ;;  %v270_v9 = vmul.f32 0.2, %v212_v3  ;;  %vm262_vm13 = vcmp.ge.f32.partialorder %v244_v4, 0.0  ;;  %v285_v12 = vsel %vm253_vm8, %v209_v45, %v269_v63 }
  0xf3   :  { %v278_v10 = vmul.f32 0.2, %v244_v4  ;;  %vm252_vm14 = vcmp.ge.f32.partialorder %v204_v6, 0.0  ;;  %v268_v11 = vmul.f32 0.2, %v204_v6  ;;  %vm260_vm15 = vcmp.ge.f32.partialorder %v236_v7, 0.0 }
  0xf4   :  { %v293_v13 = vsel %vm261_vm9, %v241_v46, %v277_v2  ;;  %v286_v14 = vsel %vm254_vm12, %v212_v3, %v270_v9  ;;  %v276_v15 = vmul.f32 0.2, %v236_v7  ;;  %v283_v17 = vsel %vm251_vm10, %v201_v55, %v267_v5 }
  0xf5   :  { %v446_v18 = vpack.c.bf16 %v286_v14, %v285_v12  ;;  %v294_v19 = vsel %vm262_vm13, %v244_v4, %v278_v10  ;;  %v284_v20 = vsel %vm252_vm14, %v204_v6, %v268_v11  ;;  %v291_v16 = vsel %vm259_vm11, %v233_v61, %v275_v8 }
  0xf6   :  { %v466_v21 = vpack.c.bf16 %v294_v19, %v293_v13  ;;  %v441_v22 = vpack.c.bf16 %v284_v20, %v283_v17  ;;  %v292_v23 = vsel %vm260_vm15, %v236_v7, %v276_v15 }
  0xf7   :  { %470 = vst [vmem:[%s677_s3 + $0x18] sm:$0xff] %v446_v18   ;;  %v461_v24 = vpack.c.bf16 %v292_v23, %v291_v16 }
  0xf8   :  { %474 = vst [vmem:[%s677_s3 + $0x38] sm:$0xff] %v466_v21   ;;  %469 = vst [vmem:[%s677_s3 + $0x10] sm:$0xff] %v441_v22  }
  0xf9   :  { %473 = vst [vmem:[%s677_s3 + $0x30] sm:$0xff] %v461_v24  }

// kernel: discriminator_forward.6
= control target key start
LH: loop header
LB: loop body
LE: loop exit
PB: predicated region body
PF: predicated region fallthrough
CT: control target
= control target key end

     0   :  { %s978_s1 = inlined_call_operand.vmem [shape: bf16[640,128], index: 1, kind: input, shape index: {}]   ;;  %s979_s0 = inlined_call_operand.vmem [shape: bf16[32,640], index: 0, kind: input, shape index: {}]   ;;  %s980_s2 = inlined_call_operand.vmem [shape: f32[1,128], index: 2, kind: input, shape index: {}]   ;;  %s981_s3 = inlined_call_operand.vmem [shape: bf16[32,128], index: 3, kind: output, shape index: {}]  }
   0x1   :  { %v745_v0 = vld [vmem:[%s978_s1 + $0x78] sm:$0xff]   ;;  %v749_v4 = vld [vmem:[%s978_s1 + $0x70] sm:$0xff]   ;;  %v753_v8 = vld [vmem:[%s978_s1 + $0x68] sm:$0xff]  }
   0x2   :  { %v746_v1 = vld [vmem:[%s978_s1 + $0x38] sm:$0xff]   ;;  %659 = vmatprep.subr.bf16.mxu0 %v745_v0  ;;  %v750_v5 = vld [vmem:[%s978_s1 + $0x30] sm:$0xff]   ;;  %v754_v9 = vld [vmem:[%s978_s1 + $0x28] sm:$0xff]  }
   0x3   :  { %v747_v2 = vld [vmem:[%s978_s1 + $0xf8] sm:$0xff]   ;;  %660 = vmatpush3.bf16.msra.mxu0 %v746_v1  ;;  %v751_v6 = vld [vmem:[%s978_s1 + $0xf0] sm:$0xff]   ;;  %v755_v10 = vld [vmem:[%s978_s1 + $0xe8] sm:$0xff]  }
   0x4   :  { %v748_v3 = vld [vmem:[%s978_s1 + $0xb8] sm:$0xff]   ;;  %687 = vmatprep.subr.bf16.mxu1 %v747_v2  ;;  %661 = vmatprep.subr.bf16.mxu0 %v749_v4  ;;  %v752_v7 = vld [vmem:[%s978_s1 + $0xb0] sm:$0xff]   ;;  %v756_v11 = vld [vmem:[%s978_s1 + $0xa8] sm:$0xff]  }
   0x5   :  { %688 = vmatpush3.bf16.msra.mxu1 %v748_v3  ;;  %v757_v12 = vld [vmem:[%s978_s1 + $0x60] sm:$0xff]   ;;  %v761_v16 = vld [vmem:[%s978_s1 + $0x58] sm:$0xff]   ;;  %v765_v20 = vld [vmem:[%s978_s1 + $0x50] sm:$0xff]  }
   0x6   :  { %689 = vmatprep.subr.bf16.mxu1 %v751_v6  ;;  %v758_v13 = vld [vmem:[%s978_s1 + $0x20] sm:$0xff]   ;;  %v762_v17 = vld [vmem:[%s978_s1 + $0x18] sm:$0xff]   ;;  %v766_v21 = vld [vmem:[%s978_s1 + $0x10] sm:$0xff]  }
   0x7   :  { %662 = vmatpush3.bf16.msra.mxu0 %v750_v5  ;;  %v759_v14 = vld [vmem:[%s978_s1 + $0xe0] sm:$0xff]   ;;  %v763_v18 = vld [vmem:[%s978_s1 + $0xd8] sm:$0xff]   ;;  %v767_v22 = vld [vmem:[%s978_s1 + $0xd0] sm:$0xff]  }
   0x8   :  { %663 = vmatprep.subr.bf16.mxu0 %v753_v8  ;;  %v760_v15 = vld [vmem:[%s978_s1 + $0xa0] sm:$0xff]   ;;  %v764_v19 = vld [vmem:[%s978_s1 + $0x98] sm:$0xff]   ;;  %v768_v23 = vld [vmem:[%s978_s1 + $0x90] sm:$0xff]  }
   0x9   :  { %690 = vmatpush3.bf16.msra.mxu1 %v752_v7  ;;  %v769_v24 = vld [vmem:[%s978_s1 + $0x48] sm:$0xff]   ;;  %v773_v28 = vld [vmem:[%s978_s1 + $0x40] sm:$0xff]   ;;  %v780_v34 = vld [vmem:[%s978_s1 + $0x138] sm:$0xff]  }
   0xa   :  { %691 = vmatprep.subr.bf16.mxu1 %v755_v10  ;;  %v770_v25 = vld [vmem:[%s978_s1 + $0x8] sm:$0xff]   ;;  %v774_v29 = vld [vmem:[%s978_s1] sm:$0xff]   ;;  %v784_v37 = vld [vmem:[%s978_s1 + $0x130] sm:$0xff]  }
   0xb   :  { %664 = vmatpush3.bf16.msra.mxu0 %v754_v9  ;;  %v771_v26 = vld [vmem:[%s978_s1 + $0xc8] sm:$0xff]   ;;  %v775_v30 = vld [vmem:[%s978_s1 + $0xc0] sm:$0xff]   ;;  %v787_v44 = vld [vmem:[%s978_s1 + $0x118] sm:$0xff]  }
   0xc   :  { %665 = vmatprep.subr.bf16.mxu0 %v757_v12  ;;  %v772_v27 = vld [vmem:[%s978_s1 + $0x88] sm:$0xff]   ;;  %v776_v31 = vld [vmem:[%s979_s0] ss:$20 sps:$4 sm:$0xff]   ;;  %v778_v32 = vld [vmem:[%s979_s0 + $0x4] ss:$20 sps:$4 sm:$0xff]  }
   0xd   :  { %692 = vmatpush3.bf16.msra.mxu1 %v756_v11  ;;  %v779_v33 = vld [vmem:[%s978_s1 + $0x80] sm:$0xff]   ;;  %438 = vmatprep.mubr.bf16.mxu0 %v778_v32  ;;  %v781_v35 = vld [vmem:[%s979_s0 + $0x8] ss:$20 sps:$4 sm:$0xff]   ;;  %v794_v46 = vld [vmem:[%s978_s1 + $0x110] sm:$0xff]  }
   0xe   :  { %693 = vmatprep.subr.bf16.mxu1 %v759_v14  ;;  %v783_v36 = vld [vmem:[%s979_s0 + $0xc] ss:$20 sps:$4 sm:$0xff]   ;;  %v790_v41 = vld [vmem:[%s979_s0 + $0x28] ss:$20 sps:$4 sm:$0xff]   ;;  %v793_v43 = vld [vmem:[%s979_s0 + $0x30] ss:$20 sps:$4 sm:$0xff]  }
   0xf   :  { %666 = vmatpush3.bf16.msra.mxu0 %v758_v13  ;;  %487 = vmatprep.mubr.bf16.mxu1 %v783_v36  ;;  %v785_v38 = vld [vmem:[%s978_s1 + $0x128] sm:$0xff]   ;;  %v786_v39 = vld [vmem:[%s978_s1 + $0x120] sm:$0xff]  }
  0x10   :  { %667 = vmatprep.subr.bf16.mxu0 %v761_v16  ;;  %v788_v40 = vld [vmem:[%s979_s0 + $0x2c] ss:$20 sps:$4 sm:$0xff]   ;;  %v791_v42 = vld [vmem:[%s979_s0 + $0x34] ss:$20 sps:$4 sm:$0xff]   ;;  %v797_v45 = vld [vmem:[%s979_s0 + $0x10] ss:$20 sps:$4 sm:$0xff]  }
  0x11   :  { %694 = vmatpush3.bf16.msra.mxu1 %v760_v15  ;;  %v795_v47 = vld [vmem:[%s978_s1 + $0x108] sm:$0xff]   ;;  %v796_v48 = vld [vmem:[%s978_s1 + $0x100] sm:$0xff]  }
  0x12   :  { %695 = vmatprep.subr.bf16.mxu1 %v763_v18  ;;  %v798_v49 = vld [vmem:[%s979_s0 + $0x38] ss:$20 sps:$4 sm:$0xff]   ;;  %v589_v3 = vld [vmem:[%s980_s2] ss:$0 sm:$0xff] }
  0x13   :  { %668 = vmatpush3.bf16.msra.mxu0 %v762_v17 }
  0x14   :  { %669 = vmatprep.subr.bf16.mxu0 %v765_v20 }
  0x15   :  { %696 = vmatpush3.bf16.msra.mxu1 %v764_v19 }
  0x16   :  { %697 = vmatprep.subr.bf16.mxu1 %v767_v22 }
  0x17   :  { %670 = vmatpush3.bf16.msra.mxu0 %v766_v21 }
  0x18   :  { %671 = vmatprep.subr.bf16.mxu0 %v769_v24 }
  0x19   :  { %698 = vmatpush3.bf16.msra.mxu1 %v768_v23 }
  0x1a   :  { %699 = vmatprep.subr.bf16.mxu1 %v771_v26 }
  0x1b   :  { %672 = vmatpush3.bf16.msra.mxu0 %v770_v25 }
  0x1c   :  { %673 = vmatprep.subr.bf16.mxu0 %v773_v28 }
  0x1d   :  { %700 = vmatpush3.bf16.msra.mxu1 %v772_v27 }
  0x1e   :  { %701 = vmatprep.subr.bf16.mxu1 %v775_v30 }
  0x1f   :  { %674 = vmatpush3.bf16.msra.mxu0 %v774_v29 }
  0x20   :  { %725 = vmatprep.subr.bf16.mxu0 %v780_v34 }
  0x21   :  { %702 = vmatpush3.bf16.msra.mxu1 %v779_v33 }
  0x22   :  { %439 = vmatmul.mubr.bf16.vlgmr.msra.gmra.mxu0 %v776_v31 }
  0x23   :  { %726 = vmatpush3.bf16.msra.mxu0 %v780_v34  ;;  %446 = vmatprep.mubr.bf16.mxu0 %v788_v40 }
  0x24   :  { %488 = vmatmul.mubr.bf16.vlgmr.msra.gmra.mxu1 %v781_v35  ;;  %727 = vmatprep.subr.bf16.mxu0 %v784_v37 }
  0x25   :  { %495 = vmatprep.mubr.bf16.mxu1 %v791_v42 }
  0x27   :  { %728 = vmatpush3.bf16.msra.mxu0 %v784_v37 }
  0x28   :  { %729 = vmatprep.subr.bf16.mxu0 %v785_v38 }
  0x2a   :  { %447 = vmatmul.mubr.bf16.gmra.mxu0 %v790_v41 }
  0x2b   :  { %730 = vmatpush3.bf16.msra.mxu0 %v785_v38  ;;  %741 = vmatprep.mubr.bf16.mxu0 %v797_v45 }
  0x2c   :  { %731 = vmatprep.subr.bf16.mxu0 %v786_v39  ;;  %496 = vmatmul.mubr.bf16.gmra.mxu1 %v793_v43 }
  0x2f   :  { %732 = vmatpush3.bf16.msra.mxu0 %v786_v39 }
  0x30   :  { %733 = vmatprep.subr.bf16.mxu0 %v787_v44 }
  0x33   :  { %734 = vmatpush3.bf16.msra.mxu0 %v787_v44 }
  0x34   :  { %735 = vmatprep.subr.bf16.mxu0 %v794_v46 }
  0x37   :  { %736 = vmatpush3.bf16.msra.mxu0 %v794_v46 }
  0x38   :  { %737 = vmatprep.subr.bf16.mxu0 %v795_v47 }
  0x3b   :  { %738 = vmatpush3.bf16.msra.mxu0 %v795_v47 }
  0x3c   :  { %739 = vmatprep.subr.bf16.mxu0 %v796_v48 }
  0x3f   :  { %740 = vmatpush3.bf16.msra.mxu0 %v796_v48 }
  0x42   :  { %742 = vmatmul.mubr.bf16.vlgmr.msra.gmra.mxu0 %v798_v49 }
  0xe2   :  { %v675_v50 = vpop.f32.mrf.mxu0 }
  0xe4   :  { %v676_v51 = vpop.f32.mrf.mxu0  ;;  %v703_v52 = vpop.f32.mrf.mxu1 }
  0xe5   :  { %v677_v2 = vadd.f32 %v676_v51, %v675_v50 }
  0xe6   :  { %v678_v53 = vpop.f32.mrf.mxu0  ;;  %v704_v54 = vpop.f32.mrf.mxu1 }
  0xe7   :  { %v441_v8 = vadd.f32 %v677_v2, %v589_v3  ;;  %v705_v9 = vadd.f32 %v704_v54, %v703_v52 }
  0xe8   :  { %v679_v55 = vpop.f32.mrf.mxu0  ;;  %v706_v56 = vpop.f32.mrf.mxu1 }
  0xe9   :  { %v680_v10 = vadd.f32 %v679_v55, %v678_v53  ;;  %v490_v18 = vadd.f32 %v705_v9, %v441_v8 }
  0xea   :  { %v681_v57 = vpop.f32.mrf.mxu0  ;;  %v707_v58 = vpop.f32.mrf.mxu1 }
  0xeb   :  { %v444_v15 = vadd.f32 %v680_v10, %v589_v3  ;;  %v708_v16 = vadd.f32 %v707_v58, %v706_v56 }
  0xec   :  { %v682_v59 = vpop.f32.mrf.mxu0  ;;  %v709_v60 = vpop.f32.mrf.mxu1 }
  0xed   :  { %v683_v63 = vadd.f32 %v682_v59, %v681_v57  ;;  %v493_v25 = vadd.f32 %v708_v16, %v444_v15 }
  0xee   :  { %v684_v61 = vpop.f32.mrf.mxu0  ;;  %v710_v62 = vpop.f32.mrf.mxu1 }
  0xef   :  { %v449_v4 = vadd.f32 %v683_v63, %v589_v3  ;;  %v711_v5 = vadd.f32 %v710_v62, %v709_v60 }
  0xf0   :  { %v685_v0 = vpop.f32.mrf.mxu0  ;;  %v712_v1 = vpop.f32.mrf.mxu1 }
  0xf1   :  { %v686_v6 = vadd.f32 %v685_v0, %v684_v61  ;;  %v498_v13 = vadd.f32 %v711_v5, %v449_v4 }
  0xf2   :  { %v713_v7 = vpop.f32.mrf.mxu1 }
  0xf3   :  { %v452_v11 = vadd.f32 %v686_v6, %v589_v3  ;;  %v714_v12 = vadd.f32 %v713_v7, %v712_v1 }
  0xf5   :  { %v501_v21 = vadd.f32 %v714_v12, %v452_v11 }
 0x102   :  { %v743_v14 = vpop.f32.mrf.mxu0 }
 0x103   :  { %v547_v17 = vadd.f32 %v743_v14, %v498_v13 }
 0x104   :  { %v538_v19 = vpop.f32.mrf.mxu0 }
 0x105   :  { %v539_v20 = vadd.f32 %v538_v19, %v490_v18  ;;  %v559_v23 = vmul.f32 0.2, %v547_v17  ;;  %vm555_vm0 = vcmp.ge.f32.partialorder %v547_v17, 0.0 }
 0x106   :  { %v744_v22 = vpop.f32.mrf.mxu0 }
 0x107   :  { %v550_v24 = vadd.f32 %v744_v22, %v501_v21  ;;  %v557_v27 = vmul.f32 0.2, %v539_v20  ;;  %vm553_vm2 = vcmp.ge.f32.partialorder %v539_v20, 0.0  ;;  %v563_v30 = vsel %vm555_vm0, %v547_v17, %v559_v23 }
 0x108   :  { %v541_v26 = vpop.f32.mrf.mxu0 }
 0x109   :  { %vm556_vm1 = vcmp.ge.f32.partialorder %v550_v24, 0.0  ;;  %v560_v28 = vmul.f32 0.2, %v550_v24  ;;  %v542_v29 = vadd.f32 %v541_v26, %v493_v25  ;;  %v561_v34 = vsel %vm553_vm2, %v539_v20, %v557_v27 }
 0x10b   :  { %v564_v31 = vsel %vm556_vm1, %v550_v24, %v560_v28  ;;  %vm554_vm3 = vcmp.ge.f32.partialorder %v542_v29, 0.0  ;;  %v558_v32 = vmul.f32 0.2, %v542_v29 }
 0x10c   :  { %v656_v33 = vpack.c.bf16 %v564_v31, %v563_v30 }
 0x10d   :  { %v562_v35 = vsel %vm554_vm3, %v542_v29, %v558_v32 }
 0x10e   :  { %658 = vst [vmem:[%s981_s3 + $0x8] sm:$0xff] %v656_v33   ;;  %v651_v36 = vpack.c.bf16 %v562_v35, %v561_v34 }
 0x110   :  { %652 = vst [vmem:[%s981_s3] sm:$0xff] %v651_v36  }

// kernel: discriminator_forward.7
= control target key start
LH: loop header
LB: loop body
LE: loop exit
PB: predicated region body
PF: predicated region fallthrough
CT: control target
= control target key end

     0   :  { %s2277_s1 = inlined_call_operand.vmem [shape: bf16[1152,256], index: 1, kind: input, shape index: {}]   ;;  %s2278_s0 = inlined_call_operand.vmem [shape: bf16[32,1152], index: 0, kind: input, shape index: {}]   ;;  %s2279_s2 = inlined_call_operand.vmem [shape: f32[1,256], index: 2, kind: input, shape index: {}]   ;;  %s2280_s3 = inlined_call_operand.vmem [shape: bf16[32,256], index: 3, kind: output, shape index: {}]  }
   0x1   :  { %v1511_v0 = vld [vmem:[%s2277_s1 + $0x74] ss:$8 sps:$4 sm:$0xff]   ;;  %v1515_v2 = vld [vmem:[%s2277_s1 + $0x70] ss:$8 sps:$4 sm:$0xff]   ;;  %v1517_v4 = vld [vmem:[%s2277_s1 + $0x64] ss:$8 sps:$4 sm:$0xff]  }
   0x2   :  { %v1513_v1 = vld [vmem:[%s2277_s1 + $0x174] ss:$8 sps:$4 sm:$0xff]   ;;  %1003 = vmatprep.subr.bf16.mxu0 %v1511_v0  ;;  %v1516_v3 = vld [vmem:[%s2277_s1 + $0x170] ss:$8 sps:$4 sm:$0xff]   ;;  %v1519_v5 = vld [vmem:[%s2277_s1 + $0x164] ss:$8 sps:$4 sm:$0xff]  }
   0x3   :  { %1056 = vmatprep.subr.bf16.mxu1 %v1513_v1  ;;  %1004 = vmatpush1.bf16.msra.mxu0 %v1515_v2  ;;  %v1521_v6 = vld [vmem:[%s2277_s1 + $0x60] ss:$8 sps:$4 sm:$0xff]   ;;  %v1523_v8 = vld [vmem:[%s2277_s1 + $0x54] ss:$8 sps:$4 sm:$0xff]   ;;  %v1527_v10 = vld [vmem:[%s2277_s1 + $0x50] ss:$8 sps:$4 sm:$0xff]  }
   0x4   :  { %1057 = vmatpush1.bf16.msra.mxu1 %v1516_v3  ;;  %1005 = vmatprep.subr.bf16.mxu0 %v1517_v4  ;;  %v1522_v7 = vld [vmem:[%s2277_s1 + $0x160] ss:$8 sps:$4 sm:$0xff]   ;;  %v1525_v9 = vld [vmem:[%s2277_s1 + $0x154] ss:$8 sps:$4 sm:$0xff]   ;;  %v1528_v11 = vld [vmem:[%s2277_s1 + $0x150] ss:$8 sps:$4 sm:$0xff]  }
   0x5   :  { %1058 = vmatprep.subr.bf16.mxu1 %v1519_v5  ;;  %v1529_v12 = vld [vmem:[%s2277_s1 + $0x44] ss:$8 sps:$4 sm:$0xff]   ;;  %v1533_v14 = vld [vmem:[%s2277_s1 + $0x40] ss:$8 sps:$4 sm:$0xff]   ;;  %v1535_v16 = vld [vmem:[%s2277_s1 + $0x34] ss:$8 sps:$4 sm:$0xff]  }
   0x6   :  { %v1531_v13 = vld [vmem:[%s2277_s1 + $0x144] ss:$8 sps:$4 sm:$0xff]   ;;  %v1534_v15 = vld [vmem:[%s2277_s1 + $0x140] ss:$8 sps:$4 sm:$0xff]   ;;  %v1537_v17 = vld [vmem:[%s2277_s1 + $0x134] ss:$8 sps:$4 sm:$0xff]  }
   0x7   :  { %1006 = vmatpush1.bf16.msra.mxu0 %v1521_v6  ;;  %v1539_v18 = vld [vmem:[%s2277_s1 + $0x30] ss:$8 sps:$4 sm:$0xff]   ;;  %v1541_v20 = vld [vmem:[%s2277_s1 + $0x24] ss:$8 sps:$4 sm:$0xff]   ;;  %v1545_v22 = vld [vmem:[%s2277_s1 + $0x20] ss:$8 sps:$4 sm:$0xff]  }
   0x8   :  { %1059 = vmatpush1.bf16.msra.mxu1 %v1522_v7  ;;  %1007 = vmatprep.subr.bf16.mxu0 %v1523_v8  ;;  %v1540_v19 = vld [vmem:[%s2277_s1 + $0x130] ss:$8 sps:$4 sm:$0xff]   ;;  %v1543_v21 = vld [vmem:[%s2277_s1 + $0x124] ss:$8 sps:$4 sm:$0xff]   ;;  %v1546_v23 = vld [vmem:[%s2277_s1 + $0x120] ss:$8 sps:$4 sm:$0xff]  }
   0x9   :  { %1060 = vmatprep.subr.bf16.mxu1 %v1525_v9  ;;  %v1547_v24 = vld [vmem:[%s2277_s1 + $0x14] ss:$8 sps:$4 sm:$0xff]   ;;  %v1551_v26 = vld [vmem:[%s2277_s1 + $0x10] ss:$8 sps:$4 sm:$0xff]   ;;  %v1553_v28 = vld [vmem:[%s2277_s1 + $0x4] ss:$8 sps:$4 sm:$0xff]  }
   0xa   :  { %v1549_v25 = vld [vmem:[%s2277_s1 + $0x114] ss:$8 sps:$4 sm:$0xff]   ;;  %v1552_v27 = vld [vmem:[%s2277_s1 + $0x110] ss:$8 sps:$4 sm:$0xff]   ;;  %v1555_v29 = vld [vmem:[%s2277_s1 + $0x104] ss:$8 sps:$4 sm:$0xff]  }
   0xb   :  { %1008 = vmatpush1.bf16.msra.mxu0 %v1527_v10  ;;  %v1557_v30 = vld [vmem:[%s2277_s1] ss:$8 sps:$4 sm:$0xff]   ;;  %v1559_v32 = vld [vmem:[%s2277_s1 + $0xf4] ss:$8 sps:$4 sm:$0xff]   ;;  %v1563_v34 = vld [vmem:[%s2277_s1 + $0xf0] ss:$8 sps:$4 sm:$0xff]  }
   0xc   :  { %1061 = vmatpush1.bf16.msra.mxu1 %v1528_v11  ;;  %1009 = vmatprep.subr.bf16.mxu0 %v1529_v12  ;;  %v1558_v31 = vld [vmem:[%s2277_s1 + $0x100] ss:$8 sps:$4 sm:$0xff]   ;;  %v1561_v33 = vld [vmem:[%s2277_s1 + $0x1f4] ss:$8 sps:$4 sm:$0xff]   ;;  %v1564_v35 = vld [vmem:[%s2277_s1 + $0x1f0] ss:$8 sps:$4 sm:$0xff]  }
   0xd   :  { %1062 = vmatprep.subr.bf16.mxu1 %v1531_v13  ;;  %v1565_v36 = vld [vmem:[%s2277_s1 + $0xe4] ss:$8 sps:$4 sm:$0xff]   ;;  %v1569_v38 = vld [vmem:[%s2277_s1 + $0xe0] ss:$8 sps:$4 sm:$0xff]   ;;  %v1571_v40 = vld [vmem:[%s2277_s1 + $0xd4] ss:$8 sps:$4 sm:$0xff]  }
   0xe   :  { %v1567_v37 = vld [vmem:[%s2277_s1 + $0x1e4] ss:$8 sps:$4 sm:$0xff]   ;;  %v1570_v39 = vld [vmem:[%s2277_s1 + $0x1e0] ss:$8 sps:$4 sm:$0xff]   ;;  %v1573_v41 = vld [vmem:[%s2277_s1 + $0x1d4] ss:$8 sps:$4 sm:$0xff]  }
   0xf   :  { %1010 = vmatpush1.bf16.msra.mxu0 %v1533_v14  ;;  %v1575_v42 = vld [vmem:[%s2277_s1 + $0xd0] ss:$8 sps:$4 sm:$0xff]   ;;  %v1577_v44 = vld [vmem:[%s2277_s1 + $0xc4] ss:$8 sps:$4 sm:$0xff]   ;;  %v1581_v46 = vld [vmem:[%s2277_s1 + $0xc0] ss:$8 sps:$4 sm:$0xff]  }
  0x10   :  { %1063 = vmatpush1.bf16.msra.mxu1 %v1534_v15  ;;  %1011 = vmatprep.subr.bf16.mxu0 %v1535_v16  ;;  %v1576_v43 = vld [vmem:[%s2277_s1 + $0x1d0] ss:$8 sps:$4 sm:$0xff]   ;;  %v1579_v45 = vld [vmem:[%s2277_s1 + $0x1c4] ss:$8 sps:$4 sm:$0xff]   ;;  %v1582_v47 = vld [vmem:[%s2277_s1 + $0x1c0] ss:$8 sps:$4 sm:$0xff]  }
  0x11   :  { %1064 = vmatprep.subr.bf16.mxu1 %v1537_v17  ;;  %v1583_v48 = vld [vmem:[%s2277_s1 + $0xb4] ss:$8 sps:$4 sm:$0xff]   ;;  %v1609_v49 = vld [vmem:[%s2278_s0 + $0x4] ss:$36 sps:$4 sm:$0xff]   ;;  %v1612_v51 = vld [vmem:[%s2278_s0 + $0xc] ss:$36 sps:$4 sm:$0xff]  }
  0x12   :  { %v1585_v50 = vld [vmem:[%s2277_s1 + $0x1b4] ss:$8 sps:$4 sm:$0xff]   ;;  %1035 = vmatprep.mubr.bf16.mxu0 %v1609_v49  ;;  %v1587_v52 = vld [vmem:[%s2277_s1 + $0xb0] ss:$8 sps:$4 sm:$0xff]   ;;  %1088 = vmatprep.mubr.bf16.mxu1 %v1612_v51  ;;  %v1589_v54 = vld [vmem:[%s2277_s1 + $0xa4] ss:$8 sps:$4 sm:$0xff]  }
  0x13   :  { %1012 = vmatpush1.bf16.msra.mxu0 %v1539_v18  ;;  %v1588_v53 = vld [vmem:[%s2277_s1 + $0x1b0] ss:$8 sps:$4 sm:$0xff]   ;;  %v1591_v55 = vld [vmem:[%s2277_s1 + $0x1a4] ss:$8 sps:$4 sm:$0xff]   ;;  %v1593_v56 = vld [vmem:[%s2277_s1 + $0xa0] ss:$8 sps:$4 sm:$0xff]  }
  0x14   :  { %1065 = vmatpush1.bf16.msra.mxu1 %v1540_v19  ;;  %1013 = vmatprep.subr.bf16.mxu0 %v1541_v20  ;;  %v1594_v57 = vld [vmem:[%s2277_s1 + $0x1a0] ss:$8 sps:$4 sm:$0xff]   ;;  %v1595_v58 = vld [vmem:[%s2277_s1 + $0x94] ss:$8 sps:$4 sm:$0xff]   ;;  %v1599_v60 = vld [vmem:[%s2277_s1 + $0x90] ss:$8 sps:$4 sm:$0xff]  }
  0x15   :  { %1066 = vmatprep.subr.bf16.mxu1 %v1543_v21  ;;  %v1597_v59 = vld [vmem:[%s2277_s1 + $0x194] ss:$8 sps:$4 sm:$0xff]   ;;  %v1600_v61 = vld [vmem:[%s2277_s1 + $0x190] ss:$8 sps:$4 sm:$0xff]   ;;  %v1601_v62 = vld [vmem:[%s2277_s1 + $0x84] ss:$8 sps:$4 sm:$0xff]  }
  0x16   :  { %v1603_v63 = vld [vmem:[%s2277_s1 + $0x184] ss:$8 sps:$4 sm:$0xff]   ;;  %v1605_v0 = vld [vmem:[%s2277_s1 + $0x80] ss:$8 sps:$4 sm:$0xff]   ;;  %v1615_v2 = vld [vmem:[%s2277_s1 + $0x274] ss:$8 sps:$4 sm:$0xff]  }
  0x17   :  { %1014 = vmatpush1.bf16.msra.mxu0 %v1545_v22  ;;  %v1606_v1 = vld [vmem:[%s2277_s1 + $0x180] ss:$8 sps:$4 sm:$0xff]   ;;  %v1618_v3 = vld [vmem:[%s2277_s1 + $0x374] ss:$8 sps:$4 sm:$0xff]   ;;  %v1613_v6 = vld [vmem:[%s2277_s1 + $0x270] ss:$8 sps:$4 sm:$0xff]  }
  0x18   :  { %1067 = vmatpush1.bf16.msra.mxu1 %v1546_v23  ;;  %1015 = vmatprep.subr.bf16.mxu0 %v1547_v24  ;;  %v1607_v4 = vld [vmem:[%s2278_s0] ss:$36 sps:$4 sm:$0xff]   ;;  %v1610_v5 = vld [vmem:[%s2278_s0 + $0x8] ss:$36 sps:$4 sm:$0xff]   ;;  %v1616_v7 = vld [vmem:[%s2277_s1 + $0x370] ss:$8 sps:$4 sm:$0xff]  }
  0x19   :  { %1068 = vmatprep.subr.bf16.mxu1 %v1549_v25  ;;  %v1621_v8 = vld [vmem:[%s2277_s1 + $0x264] ss:$8 sps:$4 sm:$0xff]   ;;  %v1619_v10 = vld [vmem:[%s2277_s1 + $0x260] ss:$8 sps:$4 sm:$0xff]   ;;  %v1627_v12 = vld [vmem:[%s2277_s1 + $0x254] ss:$8 sps:$4 sm:$0xff]  }
  0x1a   :  { %v1624_v9 = vld [vmem:[%s2277_s1 + $0x364] ss:$8 sps:$4 sm:$0xff]   ;;  %v1622_v11 = vld [vmem:[%s2277_s1 + $0x360] ss:$8 sps:$4 sm:$0xff]   ;;  %v1630_v13 = vld [vmem:[%s2277_s1 + $0x354] ss:$8 sps:$4 sm:$0xff]  }
  0x1b   :  { %1016 = vmatpush1.bf16.msra.mxu0 %v1551_v26  ;;  %v1625_v14 = vld [vmem:[%s2277_s1 + $0x250] ss:$8 sps:$4 sm:$0xff]   ;;  %v1633_v16 = vld [vmem:[%s2277_s1 + $0x244] ss:$8 sps:$4 sm:$0xff]   ;;  %v1631_v18 = vld [vmem:[%s2277_s1 + $0x240] ss:$8 sps:$4 sm:$0xff]  }
  0x1c   :  { %1069 = vmatpush1.bf16.msra.mxu1 %v1552_v27  ;;  %1017 = vmatprep.subr.bf16.mxu0 %v1553_v28  ;;  %v1628_v15 = vld [vmem:[%s2277_s1 + $0x350] ss:$8 sps:$4 sm:$0xff]   ;;  %v1636_v17 = vld [vmem:[%s2277_s1 + $0x344] ss:$8 sps:$4 sm:$0xff]   ;;  %v1634_v19 = vld [vmem:[%s2277_s1 + $0x340] ss:$8 sps:$4 sm:$0xff]  }
  0x1d   :  { %1070 = vmatprep.subr.bf16.mxu1 %v1555_v29  ;;  %v1639_v20 = vld [vmem:[%s2277_s1 + $0x234] ss:$8 sps:$4 sm:$0xff]   ;;  %v1685_v22 = vld [vmem:[%s2278_s0 + $0x4c] ss:$36 sps:$4 sm:$0xff]   ;;  %v1643_v28 = vld [vmem:[%s2277_s1 + $0x220] ss:$8 sps:$4 sm:$0xff]  }
  0x1e   :  { %v1642_v21 = vld [vmem:[%s2277_s1 + $0x334] ss:$8 sps:$4 sm:$0xff]   ;;  %v1637_v23 = vld [vmem:[%s2277_s1 + $0x230] ss:$8 sps:$4 sm:$0xff]   ;;  %v1645_v25 = vld [vmem:[%s2277_s1 + $0x224] ss:$8 sps:$4 sm:$0xff]  }
  0x1f   :  { %1018 = vmatpush1.bf16.msra.mxu0 %v1557_v30  ;;  %v1640_v24 = vld [vmem:[%s2277_s1 + $0x330] ss:$8 sps:$4 sm:$0xff]   ;;  %v1648_v26 = vld [vmem:[%s2277_s1 + $0x324] ss:$8 sps:$4 sm:$0xff]   ;;  %v1646_v30 = vld [vmem:[%s2277_s1 + $0x320] ss:$8 sps:$4 sm:$0xff]  }
  0x20   :  { %1071 = vmatpush1.bf16.msra.mxu1 %v1558_v31  ;;  %1019 = vmatprep.subr.bf16.mxu0 %v1559_v32  ;;  %v1693_v27 = vld [vmem:[%s2278_s0 + $0x48] ss:$36 sps:$4 sm:$0xff]   ;;  %v1694_v29 = vld [vmem:[%s2278_s0 + $0x54] ss:$36 sps:$4 sm:$0xff]  }
  0x21   :  { %1072 = vmatprep.subr.bf16.mxu1 %v1561_v33  ;;  %v1696_v31 = vld [vmem:[%s2278_s0 + $0x50] ss:$36 sps:$4 sm:$0xff]   ;;  %v1670_v49 = vld [vmem:[%s2277_s1 + $0x3e0] ss:$8 sps:$4 sm:$0xff]  }
  0x22   :  { %v1651_v32 = vld [vmem:[%s2277_s1 + $0x214] ss:$8 sps:$4 sm:$0xff]  }
  0x23   :  { %1020 = vmatpush2.bf16.msra.mxu0 %v1563_v34  ;;  %v1654_v33 = vld [vmem:[%s2277_s1 + $0x314] ss:$8 sps:$4 sm:$0xff]   ;;  %v1649_v34 = vld [vmem:[%s2277_s1 + $0x210] ss:$8 sps:$4 sm:$0xff]  }
  0x24   :  { %1073 = vmatpush2.bf16.msra.mxu1 %v1564_v35  ;;  %1021 = vmatprep.subr.bf16.mxu0 %v1565_v36  ;;  %v1652_v35 = vld [vmem:[%s2277_s1 + $0x310] ss:$8 sps:$4 sm:$0xff]   ;;  %v1657_v36 = vld [vmem:[%s2277_s1 + $0x204] ss:$8 sps:$4 sm:$0xff]   ;;  %v1678_v51 = vld [vmem:[%s2277_s1 + $0x3d4] ss:$8 sps:$4 sm:$0xff]  }
  0x25   :  { %1074 = vmatprep.subr.bf16.mxu1 %v1567_v37  ;;  %v1660_v37 = vld [vmem:[%s2277_s1 + $0x304] ss:$8 sps:$4 sm:$0xff]  }
  0x27   :  { %1022 = vmatpush2.bf16.msra.mxu0 %v1569_v38  ;;  %v1655_v38 = vld [vmem:[%s2277_s1 + $0x200] ss:$8 sps:$4 sm:$0xff]  }
  0x28   :  { %1075 = vmatpush2.bf16.msra.mxu1 %v1570_v39  ;;  %1023 = vmatprep.subr.bf16.mxu0 %v1571_v40  ;;  %v1658_v39 = vld [vmem:[%s2277_s1 + $0x300] ss:$8 sps:$4 sm:$0xff]   ;;  %v1663_v40 = vld [vmem:[%s2277_s1 + $0x2f4] ss:$8 sps:$4 sm:$0xff]  }
  0x29   :  { %1076 = vmatprep.subr.bf16.mxu1 %v1573_v41  ;;  %v1717_v41 = vld [vmem:[%s2278_s0 + $0x14] ss:$36 sps:$4 sm:$0xff]  }
  0x2b   :  { %1024 = vmatpush2.bf16.msra.mxu0 %v1575_v42  ;;  %v1666_v42 = vld [vmem:[%s2277_s1 + $0x3f4] ss:$8 sps:$4 sm:$0xff]  }
  0x2c   :  { %1077 = vmatpush2.bf16.msra.mxu1 %v1576_v43  ;;  %1025 = vmatprep.subr.bf16.mxu0 %v1577_v44  ;;  %v1720_v43 = vld [vmem:[%s2278_s0 + $0x1c] ss:$36 sps:$4 sm:$0xff]   ;;  %v1661_v44 = vld [vmem:[%s2277_s1 + $0x2f0] ss:$8 sps:$4 sm:$0xff]  }
  0x2d   :  { %1078 = vmatprep.subr.bf16.mxu1 %v1579_v45  ;;  %v1664_v45 = vld [vmem:[%s2277_s1 + $0x3f0] ss:$8 sps:$4 sm:$0xff]  }
  0x2f   :  { %1026 = vmatpush2.bf16.msra.mxu0 %v1581_v46  ;;  %v1669_v46 = vld [vmem:[%s2277_s1 + $0x2e4] ss:$8 sps:$4 sm:$0xff]  }
  0x30   :  { %1079 = vmatpush2.bf16.msra.mxu1 %v1582_v47  ;;  %1027 = vmatprep.subr.bf16.mxu0 %v1583_v48  ;;  %v1672_v47 = vld [vmem:[%s2277_s1 + $0x3e4] ss:$8 sps:$4 sm:$0xff]   ;;  %v1667_v48 = vld [vmem:[%s2277_s1 + $0x2e0] ss:$8 sps:$4 sm:$0xff]  }
  0x31   :  { %1080 = vmatprep.subr.bf16.mxu1 %v1585_v50  ;;  %v1675_v50 = vld [vmem:[%s2277_s1 + $0x2d4] ss:$8 sps:$4 sm:$0xff]  }
  0x33   :  { %1028 = vmatpush2.bf16.msra.mxu0 %v1587_v52  ;;  %v1673_v52 = vld [vmem:[%s2277_s1 + $0x2d0] ss:$8 sps:$4 sm:$0xff]  }
  0x34   :  { %1081 = vmatpush2.bf16.msra.mxu1 %v1588_v53  ;;  %1029 = vmatprep.subr.bf16.mxu0 %v1589_v54  ;;  %v1676_v53 = vld [vmem:[%s2277_s1 + $0x3d0] ss:$8 sps:$4 sm:$0xff]   ;;  %v1681_v54 = vld [vmem:[%s2277_s1 + $0x2c4] ss:$8 sps:$4 sm:$0xff]  }
  0x35   :  { %1082 = vmatprep.subr.bf16.mxu1 %v1591_v55  ;;  %v1684_v55 = vld [vmem:[%s2277_s1 + $0x3c4] ss:$8 sps:$4 sm:$0xff]  }
  0x37   :  { %1030 = vmatpush2.bf16.msra.mxu0 %v1593_v56  ;;  %v1679_v56 = vld [vmem:[%s2277_s1 + $0x2c0] ss:$8 sps:$4 sm:$0xff]  }
  0x38   :  { %1083 = vmatpush2.bf16.msra.mxu1 %v1594_v57  ;;  %1031 = vmatprep.subr.bf16.mxu0 %v1595_v58  ;;  %v1682_v57 = vld [vmem:[%s2277_s1 + $0x3c0] ss:$8 sps:$4 sm:$0xff]   ;;  %v1689_v58 = vld [vmem:[%s2277_s1 + $0x2b4] ss:$8 sps:$4 sm:$0xff]  }
  0x39   :  { %1084 = vmatprep.subr.bf16.mxu1 %v1597_v59  ;;  %v1692_v59 = vld [vmem:[%s2277_s1 + $0x3b4] ss:$8 sps:$4 sm:$0xff]  }
  0x3b   :  { %1032 = vmatpush2.bf16.msra.mxu0 %v1599_v60  ;;  %v1687_v60 = vld [vmem:[%s2277_s1 + $0x2b0] ss:$8 sps:$4 sm:$0xff]  }
  0x3c   :  { %1085 = vmatpush2.bf16.msra.mxu1 %v1600_v61  ;;  %1033 = vmatprep.subr.bf16.mxu0 %v1601_v62  ;;  %v1690_v61 = vld [vmem:[%s2277_s1 + $0x3b0] ss:$8 sps:$4 sm:$0xff]   ;;  %v1699_v62 = vld [vmem:[%s2277_s1 + $0x2a4] ss:$8 sps:$4 sm:$0xff]  }
  0x3d   :  { %1086 = vmatprep.subr.bf16.mxu1 %v1603_v63  ;;  %v1702_v63 = vld [vmem:[%s2277_s1 + $0x3a4] ss:$8 sps:$4 sm:$0xff]  }
  0x3f   :  { %1034 = vmatpush2.bf16.msra.mxu0 %v1605_v0  ;;  %v1697_v0 = vld [vmem:[%s2277_s1 + $0x2a0] ss:$8 sps:$4 sm:$0xff]  }
  0x40   :  { %1087 = vmatpush2.bf16.msra.mxu1 %v1606_v1  ;;  %1109 = vmatprep.subr.bf16.mxu0 %v1615_v2  ;;  %v1700_v1 = vld [vmem:[%s2277_s1 + $0x3a0] ss:$8 sps:$4 sm:$0xff]   ;;  %v1705_v2 = vld [vmem:[%s2277_s1 + $0x294] ss:$8 sps:$4 sm:$0xff]  }
  0x41   :  { %1162 = vmatprep.subr.bf16.mxu1 %v1618_v3  ;;  %v1708_v3 = vld [vmem:[%s2277_s1 + $0x394] ss:$8 sps:$4 sm:$0xff]  }
  0x42   :  { %1036 = vmatmul.mubr.bf16.vlgmr.msra.gmra.mxu0 %v1607_v4  ;;  %v1703_v4 = vld [vmem:[%s2277_s1 + $0x290] ss:$8 sps:$4 sm:$0xff]  }
  0x43   :  { %1089 = vmatmul.mubr.bf16.vlgmr.msra.gmra.mxu1 %v1610_v5  ;;  %1110 = vmatpush1.bf16.msra.mxu0 %v1613_v6  ;;  %v1706_v5 = vld [vmem:[%s2277_s1 + $0x390] ss:$8 sps:$4 sm:$0xff]   ;;  %v1711_v6 = vld [vmem:[%s2277_s1 + $0x284] ss:$8 sps:$4 sm:$0xff]  }
  0x44   :  { %1163 = vmatpush1.bf16.msra.mxu1 %v1616_v7  ;;  %1111 = vmatprep.subr.bf16.mxu0 %v1621_v8  ;;  %v1714_v7 = vld [vmem:[%s2277_s1 + $0x384] ss:$8 sps:$4 sm:$0xff]   ;;  %v1709_v8 = vld [vmem:[%s2277_s1 + $0x280] ss:$8 sps:$4 sm:$0xff]  }
  0x45   :  { %1164 = vmatprep.subr.bf16.mxu1 %v1624_v9  ;;  %1045 = vmatprep.mubr.bf16.mxu0 %v1685_v22  ;;  %v1712_v9 = vld [vmem:[%s2277_s1 + $0x380] ss:$8 sps:$4 sm:$0xff]   ;;  %v1738_v22 = vld [vmem:[%s2277_s1 + $0x444] ss:$8 sps:$4 sm:$0xff]  }
  0x46   :  { %1098 = vmatprep.mubr.bf16.mxu1 %v1694_v29  ;;  %v1747_v29 = vld [vmem:[%s2277_s1 + $0x414] ss:$8 sps:$4 sm:$0xff]  }
  0x47   :  { %1112 = vmatpush1.bf16.msra.mxu0 %v1619_v10  ;;  %v1723_v10 = vld [vmem:[%s2277_s1 + $0x474] ss:$8 sps:$4 sm:$0xff]  }
  0x48   :  { %1165 = vmatpush1.bf16.msra.mxu1 %v1622_v11  ;;  %1113 = vmatprep.subr.bf16.mxu0 %v1627_v12  ;;  %v1715_v11 = vld [vmem:[%s2278_s0 + $0x10] ss:$36 sps:$4 sm:$0xff]   ;;  %v1718_v12 = vld [vmem:[%s2278_s0 + $0x18] ss:$36 sps:$4 sm:$0xff]  }
  0x49   :  { %1166 = vmatprep.subr.bf16.mxu1 %v1630_v13  ;;  %v1721_v13 = vld [vmem:[%s2277_s1 + $0x470] ss:$8 sps:$4 sm:$0xff]  }
  0x4a   :  { %1046 = vmatmul.mubr.bf16.gmra.mxu0 %v1693_v27  ;;  %v1744_v27 = vld [vmem:[%s2277_s1 + $0x424] ss:$8 sps:$4 sm:$0xff]  }
  0x4b   :  { %1114 = vmatpush1.bf16.msra.mxu0 %v1625_v14  ;;  %1099 = vmatmul.mubr.bf16.gmra.mxu1 %v1696_v31  ;;  %v1726_v14 = vld [vmem:[%s2277_s1 + $0x464] ss:$8 sps:$4 sm:$0xff]  }
  0x4c   :  { %1167 = vmatpush1.bf16.msra.mxu1 %v1628_v15  ;;  %1115 = vmatprep.subr.bf16.mxu0 %v1633_v16  ;;  %v1727_v15 = vld [vmem:[%s2278_s0 + $0x5c] ss:$36 sps:$4 sm:$0xff]   ;;  %v1733_v16 = vld [vmem:[%s2278_s0 + $0x64] ss:$36 sps:$4 sm:$0xff]  }
  0x4d   :  { %1168 = vmatprep.subr.bf16.mxu1 %v1636_v17  ;;  %1141 = vmatprep.mubr.bf16.mxu0 %v1717_v41  ;;  %v1724_v17 = vld [vmem:[%s2277_s1 + $0x460] ss:$8 sps:$4 sm:$0xff]   ;;  %v1750_v31 = vld [vmem:[%s2277_s1 + $0x404] ss:$8 sps:$4 sm:$0xff]  }
  0x4e   :  { %1194 = vmatprep.mubr.bf16.mxu1 %v1720_v43 }
  0x4f   :  { %1116 = vmatpush1.bf16.msra.mxu0 %v1631_v18  ;;  %v1732_v18 = vld [vmem:[%s2277_s1 + $0x454] ss:$8 sps:$4 sm:$0xff]  }
  0x50   :  { %1169 = vmatpush1.bf16.msra.mxu1 %v1634_v19  ;;  %1117 = vmatprep.subr.bf16.mxu0 %v1639_v20  ;;  %v1729_v19 = vld [vmem:[%s2278_s0 + $0x58] ss:$36 sps:$4 sm:$0xff]   ;;  %v1735_v20 = vld [vmem:[%s2278_s0 + $0x60] ss:$36 sps:$4 sm:$0xff]  }
  0x51   :  { %1170 = vmatprep.subr.bf16.mxu1 %v1642_v21  ;;  %v1730_v21 = vld [vmem:[%s2277_s1 + $0x450] ss:$8 sps:$4 sm:$0xff]  }
  0x53   :  { %1118 = vmatpush1.bf16.msra.mxu0 %v1637_v23  ;;  %v1736_v23 = vld [vmem:[%s2277_s1 + $0x440] ss:$8 sps:$4 sm:$0xff]  }
  0x54   :  { %1171 = vmatpush1.bf16.msra.mxu1 %v1640_v24  ;;  %1119 = vmatprep.subr.bf16.mxu0 %v1645_v25  ;;  %v1741_v24 = vld [vmem:[%s2277_s1 + $0x434] ss:$8 sps:$4 sm:$0xff]   ;;  %v1753_v25 = vmov 0  }
  0x55   :  { %1172 = vmatprep.subr.bf16.mxu1 %v1648_v26  ;;  %v1739_v26 = vld [vmem:[%s2277_s1 + $0x430] ss:$8 sps:$4 sm:$0xff]  }
  0x57   :  { %1120 = vmatpush1.bf16.msra.mxu0 %v1643_v28  ;;  %v1742_v28 = vld [vmem:[%s2277_s1 + $0x420] ss:$8 sps:$4 sm:$0xff]  }
  0x58   :  { %1173 = vmatpush1.bf16.msra.mxu1 %v1646_v30  ;;  %1121 = vmatprep.subr.bf16.mxu0 %v1651_v32  ;;  %v1745_v30 = vld [vmem:[%s2277_s1 + $0x410] ss:$8 sps:$4 sm:$0xff]   ;;  %v1748_v32 = vld [vmem:[%s2277_s1 + $0x400] ss:$8 sps:$4 sm:$0xff]  }
  0x59   :  { %1174 = vmatprep.subr.bf16.mxu1 %v1654_v33  ;;  %v1751_v33 = vld [vmem:[%s2278_s0 + $0x20] ss:$36 sps:$4 sm:$0xff]  }
  0x5b   :  { %1122 = vmatpush1.bf16.msra.mxu0 %v1649_v34  ;;  %v1752_v34 = vld [vmem:[%s2278_s0 + $0x68] ss:$36 sps:$4 sm:$0xff]  }
  0x5c   :  { %1175 = vmatpush1.bf16.msra.mxu1 %v1652_v35  ;;  %1123 = vmatprep.subr.bf16.mxu0 %v1657_v36 }
  0x5d   :  { %1176 = vmatprep.subr.bf16.mxu1 %v1660_v37 }
  0x5f   :  { %1124 = vmatpush1.bf16.msra.mxu0 %v1655_v38 }
  0x60   :  { %1177 = vmatpush1.bf16.msra.mxu1 %v1658_v39  ;;  %1125 = vmatprep.subr.bf16.mxu0 %v1663_v40 }
  0x61   :  { %1178 = vmatprep.subr.bf16.mxu1 %v1666_v42 }
  0x63   :  { %1126 = vmatpush2.bf16.msra.mxu0 %v1661_v44 }
  0x64   :  { %1179 = vmatpush2.bf16.msra.mxu1 %v1664_v45  ;;  %1127 = vmatprep.subr.bf16.mxu0 %v1669_v46 }
  0x65   :  { %1180 = vmatprep.subr.bf16.mxu1 %v1672_v47 }
  0x67   :  { %1128 = vmatpush2.bf16.msra.mxu0 %v1667_v48 }
  0x68   :  { %1181 = vmatpush2.bf16.msra.mxu1 %v1670_v49  ;;  %1129 = vmatprep.subr.bf16.mxu0 %v1675_v50 }
  0x69   :  { %1182 = vmatprep.subr.bf16.mxu1 %v1678_v51 }
  0x6b   :  { %1130 = vmatpush2.bf16.msra.mxu0 %v1673_v52 }
  0x6c   :  { %1183 = vmatpush2.bf16.msra.mxu1 %v1676_v53  ;;  %1131 = vmatprep.subr.bf16.mxu0 %v1681_v54  ;;  %v181_v53 = vlaneseq }
  0x6d   :  { %1184 = vmatprep.subr.bf16.mxu1 %v1684_v55 }
  0x6f   :  { %1132 = vmatpush2.bf16.msra.mxu0 %v1679_v56  ;;  %v182_v56 = vshrl.u32 %v181_v53, 7 }
  0x70   :  { %1185 = vmatpush2.bf16.msra.mxu1 %v1682_v57  ;;  %1133 = vmatprep.subr.bf16.mxu0 %v1689_v58 }
  0x71   :  { %1186 = vmatprep.subr.bf16.mxu1 %v1692_v59  ;;  %v183_v59 = vsub.s32 0, %v182_v56 }
  0x73   :  { %1134 = vmatpush2.bf16.msra.mxu0 %v1687_v60  ;;  %v179_v60 = vld [vmem:[%s2279_s2] sm:$0x3] }
  0x74   :  { %1187 = vmatpush2.bf16.msra.mxu1 %v1690_v61  ;;  %1135 = vmatprep.subr.bf16.mxu0 %v1699_v62  ;;  %v187_v62 = vsub.s32 1, %v182_v56 }
  0x75   :  { %1188 = vmatprep.subr.bf16.mxu1 %v1702_v63 }
  0x77   :  { %1136 = vmatpush2.bf16.msra.mxu0 %v1697_v0  ;;  %v184_v0 = vrot.slane %v179_v60, %v183_v59 }
  0x78   :  { %1189 = vmatpush2.bf16.msra.mxu1 %v1700_v1  ;;  %1137 = vmatprep.subr.bf16.mxu0 %v1705_v2 }
  0x79   :  { %1190 = vmatprep.subr.bf16.mxu1 %v1708_v3  ;;  %v188_v3 = vrot.slane %v179_v60, %v187_v62 }
  0x7b   :  { %1138 = vmatpush2.bf16.msra.mxu0 %v1703_v4 }
  0x7c   :  { %1191 = vmatpush2.bf16.msra.mxu1 %v1706_v5  ;;  %1139 = vmatprep.subr.bf16.mxu0 %v1711_v6 }
  0x7d   :  { %1192 = vmatprep.subr.bf16.mxu1 %v1714_v7 }
  0x7f   :  { %1140 = vmatpush2.bf16.msra.mxu0 %v1709_v8 }
  0x80   :  { %1193 = vmatpush2.bf16.msra.mxu1 %v1712_v9  ;;  %1215 = vmatprep.subr.bf16.mxu0 %v1723_v10 }
  0x81   :  { %1494 = vmatprep.subr.bf16.mxu1 %v1723_v10 }
  0x82   :  { %1142 = vmatmul.mubr.bf16.vlgmr.msra.gmra.mxu0 %v1715_v11 }
  0x83   :  { %1195 = vmatmul.mubr.bf16.vlgmr.msra.gmra.mxu1 %v1718_v12  ;;  %1216 = vmatpush1.bf16.msra.mxu0 %v1721_v13 }
  0x84   :  { %1502 = vmatpush1.bf16.msra.mxu1 %v1721_v13  ;;  %1217 = vmatprep.subr.bf16.mxu0 %v1726_v14 }
  0x85   :  { %1495 = vmatprep.subr.bf16.mxu1 %v1726_v14  ;;  %1151 = vmatprep.mubr.bf16.mxu0 %v1727_v15 }
  0x86   :  { %1204 = vmatprep.mubr.bf16.mxu1 %v1733_v16 }
  0x87   :  { %1218 = vmatpush1.bf16.msra.mxu0 %v1724_v17 }
  0x88   :  { %1503 = vmatpush1.bf16.msra.mxu1 %v1724_v17  ;;  %1219 = vmatprep.subr.bf16.mxu0 %v1732_v18 }
  0x89   :  { %1496 = vmatprep.subr.bf16.mxu1 %v1732_v18 }
  0x8a   :  { %1152 = vmatmul.mubr.bf16.gmra.mxu0 %v1729_v19 }
  0x8b   :  { %1205 = vmatmul.mubr.bf16.gmra.mxu1 %v1735_v20  ;;  %1220 = vmatpush1.bf16.msra.mxu0 %v1730_v21 }
  0x8c   :  { %1504 = vmatpush1.bf16.msra.mxu1 %v1730_v21  ;;  %1221 = vmatprep.subr.bf16.mxu0 %v1738_v22 }
  0x8d   :  { %1497 = vmatprep.subr.bf16.mxu1 %v1738_v22  ;;  %1247 = vmatprep.mubr.bf16.mxu0 %v1753_v25 }
  0x8e   :  { %1257 = vmatprep.mubr.bf16.mxu1 %v1753_v25 }
  0x8f   :  { %1222 = vmatpush1.bf16.msra.mxu0 %v1736_v23 }
  0x90   :  { %1505 = vmatpush1.bf16.msra.mxu1 %v1736_v23  ;;  %1223 = vmatprep.subr.bf16.mxu0 %v1741_v24 }
  0x91   :  { %1498 = vmatprep.subr.bf16.mxu1 %v1741_v24 }
  0x93   :  { %1224 = vmatpush1.bf16.msra.mxu0 %v1739_v26 }
  0x94   :  { %1506 = vmatpush1.bf16.msra.mxu1 %v1739_v26  ;;  %1225 = vmatprep.subr.bf16.mxu0 %v1744_v27 }
  0x95   :  { %1499 = vmatprep.subr.bf16.mxu1 %v1744_v27 }
  0x97   :  { %1226 = vmatpush1.bf16.msra.mxu0 %v1742_v28 }
  0x98   :  { %1507 = vmatpush1.bf16.msra.mxu1 %v1742_v28  ;;  %1227 = vmatprep.subr.bf16.mxu0 %v1747_v29 }
  0x99   :  { %1500 = vmatprep.subr.bf16.mxu1 %v1747_v29 }
  0x9b   :  { %1228 = vmatpush1.bf16.msra.mxu0 %v1745_v30 }
  0x9c   :  { %1508 = vmatpush1.bf16.msra.mxu1 %v1745_v30  ;;  %1229 = vmatprep.subr.bf16.mxu0 %v1750_v31 }
  0x9d   :  { %1501 = vmatprep.subr.bf16.mxu1 %v1750_v31 }
  0x9f   :  { %1230 = vmatpush1.bf16.msra.mxu0 %v1748_v32 }
  0xa0   :  { %1509 = vmatpush1.bf16.msra.mxu1 %v1748_v32 }
  0xa2   :  { %1248 = vmatmul.mubr.bf16.vlgmr.msra.gmra.mxu0 %v1751_v33 }
  0xa3   :  { %1258 = vmatmul.mubr.bf16.vlgmr.msra.gmra.mxu1 %v1752_v34 }
 0x102   :  { %v1037_v35 = vpop.f32.mrf.mxu0 }
 0x103   :  { %v1090_v36 = vpop.f32.mrf.mxu1  ;;  %v1038_v4 = vadd.f32 %v1037_v35, %v184_v0 }
 0x104   :  { %v1039_v37 = vpop.f32.mrf.mxu0 }
 0x105   :  { %v1092_v38 = vpop.f32.mrf.mxu1  ;;  %v1040_v8 = vadd.f32 %v1039_v37, %v188_v3  ;;  %v1091_v10 = vadd.f32 %v1090_v36, %v1038_v4 }
 0x106   :  { %v1041_v39 = vpop.f32.mrf.mxu0 }
 0x107   :  { %v1094_v40 = vpop.f32.mrf.mxu1  ;;  %v1042_v11 = vadd.f32 %v1041_v39, %v184_v0  ;;  %v1093_v20 = vadd.f32 %v1092_v38, %v1040_v8 }
 0x108   :  { %v1043_v41 = vpop.f32.mrf.mxu0 }
 0x109   :  { %v1096_v42 = vpop.f32.mrf.mxu1  ;;  %v1044_v14 = vadd.f32 %v1043_v41, %v188_v3  ;;  %v1095_v22 = vadd.f32 %v1094_v40, %v1042_v11 }
 0x10a   :  { %v1047_v43 = vpop.f32.mrf.mxu0 }
 0x10b   :  { %v1100_v44 = vpop.f32.mrf.mxu1  ;;  %v1048_v5 = vadd.f32 %v1047_v43, %v184_v0  ;;  %v1097_v24 = vadd.f32 %v1096_v42, %v1044_v14 }
 0x10c   :  { %v1049_v45 = vpop.f32.mrf.mxu0 }
 0x10d   :  { %v1102_v46 = vpop.f32.mrf.mxu1  ;;  %v1050_v9 = vadd.f32 %v1049_v45, %v188_v3  ;;  %v1101_v12 = vadd.f32 %v1100_v44, %v1048_v5 }
 0x10e   :  { %v1051_v47 = vpop.f32.mrf.mxu0 }
 0x10f   :  { %v1104_v48 = vpop.f32.mrf.mxu1  ;;  %v1052_v13 = vadd.f32 %v1051_v47, %v184_v0  ;;  %v1103_v21 = vadd.f32 %v1102_v46, %v1050_v9 }
 0x110   :  { %v1053_v49 = vpop.f32.mrf.mxu0 }
 0x111   :  { %v1106_v50 = vpop.f32.mrf.mxu1  ;;  %v1054_v15 = vadd.f32 %v1053_v49, %v188_v3  ;;  %v1105_v23 = vadd.f32 %v1104_v48, %v1052_v13 }
 0x113   :  { %v1107_v25 = vadd.f32 %v1106_v50, %v1054_v15 }
 0x142   :  { %v1143_v51 = vpop.f32.mrf.mxu0 }
 0x143   :  { %v1196_v52 = vpop.f32.mrf.mxu1  ;;  %v1144_v18 = vadd.f32 %v1143_v51, %v1091_v10 }
 0x144   :  { %v1145_v54 = vpop.f32.mrf.mxu0 }
 0x145   :  { %v1198_v55 = vpop.f32.mrf.mxu1  ;;  %v1146_v26 = vadd.f32 %v1145_v54, %v1093_v20  ;;  %v1197_v30 = vadd.f32 %v1196_v52, %v1144_v18 }
 0x146   :  { %v1147_v57 = vpop.f32.mrf.mxu0 }
 0x147   :  { %v1200_v58 = vpop.f32.mrf.mxu1  ;;  %v1148_v31 = vadd.f32 %v1147_v57, %v1095_v22  ;;  %v1199_v38 = vadd.f32 %v1198_v55, %v1146_v26 }
 0x148   :  { %v1149_v61 = vpop.f32.mrf.mxu0 }
 0x149   :  { %v1202_v63 = vpop.f32.mrf.mxu1  ;;  %v1150_v36 = vadd.f32 %v1149_v61, %v1097_v24  ;;  %v1201_v42 = vadd.f32 %v1200_v58, %v1148_v31 }
 0x14a   :  { %v1153_v1 = vpop.f32.mrf.mxu0 }
 0x14b   :  { %v1206_v2 = vpop.f32.mrf.mxu1  ;;  %v1154_v19 = vadd.f32 %v1153_v1, %v1101_v12  ;;  %v1203_v52 = vadd.f32 %v1202_v63, %v1150_v36 }
 0x14c   :  { %v1155_v6 = vpop.f32.mrf.mxu0 }
 0x14d   :  { %v1208_v7 = vpop.f32.mrf.mxu1  ;;  %v1156_v27 = vadd.f32 %v1155_v6, %v1103_v21  ;;  %v1207_v32 = vadd.f32 %v1206_v2, %v1154_v19 }
 0x14e   :  { %v1157_v16 = vpop.f32.mrf.mxu0 }
 0x14f   :  { %v1210_v17 = vpop.f32.mrf.mxu1  ;;  %v1158_v33 = vadd.f32 %v1157_v16, %v1105_v23  ;;  %v1209_v43 = vadd.f32 %v1208_v7, %v1156_v27 }
 0x150   :  { %v1159_v28 = vpop.f32.mrf.mxu0 }
 0x151   :  { %v1212_v29 = vpop.f32.mrf.mxu1  ;;  %v1160_v37 = vadd.f32 %v1159_v28, %v1107_v25  ;;  %v1211_v45 = vadd.f32 %v1210_v17, %v1158_v33 }
 0x153   :  { %v1213_v53 = vadd.f32 %v1212_v29, %v1160_v37 }
 0x162   :  { %v1249_v34 = vpop.f32.mrf.mxu0 }
 0x163   :  { %v1259_v35 = vpop.f32.mrf.mxu1  ;;  %v1250_v39 = vadd.f32 %v1249_v34, %v1197_v30 }
 0x164   :  { %v1260_v41 = vadd.f32 %v1259_v35, %v1207_v32  ;;  %v1251_v40 = vpop.f32.mrf.mxu0 }
 0x165   :  { %v1261_v44 = vpop.f32.mrf.mxu1  ;;  %v1276_v46 = vmul.f32 0.2, %v1250_v39  ;;  %vm1268_vm0 = vcmp.ge.f32.partialorder %v1250_v39, 0.0  ;;  %v1252_v48 = vadd.f32 %v1251_v40, %v1199_v38 }
 0x166   :  { %v1280_v47 = vmul.f32 0.2, %v1260_v41  ;;  %vm1272_vm1 = vcmp.ge.f32.partialorder %v1260_v41, 0.0  ;;  %v1262_v49 = vadd.f32 %v1261_v44, %v1209_v43  ;;  %v1253_v50 = vpop.f32.mrf.mxu0 }
 0x167   :  { %v1263_v51 = vpop.f32.mrf.mxu1  ;;  %v1254_v54 = vadd.f32 %v1253_v50, %v1201_v42  ;;  %vm1269_vm2 = vcmp.ge.f32.partialorder %v1252_v48, 0.0  ;;  %v1277_v57 = vmul.f32 0.2, %v1252_v48  ;;  %v1284_v58 = vsel %vm1268_vm0, %v1250_v39, %v1276_v46 }
 0x168   :  { %v1264_v56 = vadd.f32 %v1263_v51, %v1211_v45  ;;  %vm1273_vm3 = vcmp.ge.f32.partialorder %v1262_v49, 0.0  ;;  %v1281_v55 = vmul.f32 0.2, %v1262_v49  ;;  %v1255_v59 = vpop.f32.mrf.mxu0  ;;  %v1288_v61 = vsel %vm1272_vm1, %v1260_v41, %v1280_v47 }
 0x169   :  { %v1265_v60 = vpop.f32.mrf.mxu1  ;;  %v1278_v62 = vmul.f32 0.2, %v1254_v54  ;;  %v1285_v1 = vsel %vm1269_vm2, %v1252_v48, %v1277_v57  ;;  %v1256_v3 = vadd.f32 %v1255_v59, %v1203_v52  ;;  %vm1270_vm4 = vcmp.ge.f32.partialorder %v1254_v54, 0.0 }
 0x16a   :  { %v1282_v0 = vmul.f32 0.2, %v1264_v56  ;;  %v1289_v2 = vsel %vm1273_vm3, %v1262_v49, %v1281_v55  ;;  %v1266_v4 = vadd.f32 %v1265_v60, %v1213_v53  ;;  %v1490_v63 = vpack.c.bf16 %v1285_v1, %v1284_v58 }
 0x16b   :  { %v1492_v5 = vpack.c.bf16 %v1289_v2, %v1288_v61  ;;  %vm1274_vm5 = vcmp.ge.f32.partialorder %v1264_v56, 0.0  ;;  %vm1271_vm6 = vcmp.ge.f32.partialorder %v1256_v3, 0.0  ;;  %v1279_v6 = vmul.f32 0.2, %v1256_v3 }
 0x16c   :  { %vm1275_vm7 = vcmp.ge.f32.partialorder %v1266_v4, 0.0  ;;  %v1283_v7 = vmul.f32 0.2, %v1266_v4  ;;  %1316 = vst [vmem:[%s2280_s3] sm:$0xff] %v1490_v63  ;;  %v1286_v8 = vsel %vm1270_vm4, %v1254_v54, %v1278_v62  ;;  %v1290_v9 = vsel %vm1274_vm5, %v1264_v56, %v1282_v0 }
 0x16d   :  { %1318 = vst [vmem:[%s2280_s3 + $0x10] sm:$0xff] %v1492_v5  ;;  %v1287_v10 = vsel %vm1271_vm6, %v1256_v3, %v1279_v6 }
 0x16e   :  { %v1291_v11 = vsel %vm1275_vm7, %v1266_v4, %v1283_v7  ;;  %v1491_v12 = vpack.c.bf16 %v1287_v10, %v1286_v8 }
 0x16f   :  { %v1493_v13 = vpack.c.bf16 %v1291_v11, %v1290_v9 }
 0x170   :  { %1317 = vst [vmem:[%s2280_s3 + $0x8] sm:$0xff] %v1491_v12 }
 0x171   :  { %1319 = vst [vmem:[%s2280_s3 + $0x18] sm:$0xff] %v1493_v13 }

// kernel: discriminator_forward.8
= control target key start
LH: loop header
LB: loop body
LE: loop exit
PB: predicated region body
PF: predicated region fallthrough
CT: control target
= control target key end

     0   :  { %s3793_s0 = inlined_call_operand.vmem [shape: bf16[32,2304], index: 0, kind: input, shape index: {}]   ;;  %s3794_s1 = inlined_call_operand.vmem [shape: bf16[2304,512], index: 1, kind: input, shape index: {}]   ;;  %s3795_s2 = inlined_call_operand.vmem [shape: f32[1,512], index: 2, kind: input, shape index: {}]   ;;  %s3796_s3 = inlined_call_operand.vmem [shape: bf16[32,512], index: 3, kind: output, shape index: {}]  }
   0x1   :  { %3798 = sst [smem:[#allocation7_spill]] %s3793_s0 }
   0x2   :  { %3799 = sst [smem:[#allocation8_spill]] %s3794_s1 }
   0x3   :  { %s3109_s12 = smov 0   ;;  %s3111_s13 = smov 0  }
   0x4   :  { %s3113_s14 = smov 0   ;;  %s3115_s15 = smov 0  }
   0x5   :  { %s3117_s16 = smov 0   ;;  %s3119_s17 = smov 0  }
   0x6   :  { %s3121_s18 = smov 0   ;;  %s3123_s19 = smov 0  }
   0x7   :  { %s3125_s20 = smov 0   ;;  %s3127_s21 = smov 0  }
   0x8   :  { %s3129_s22 = smov 0  }
   0x9 LB: > { %s2448_s23 = sadd.s32 4294967295, %s3085_s22   ;;  %s25_s24 = sadd.s32 1, %s3077_s20  ;;  %s3085_s22 = sphi %s3129_s22, %s13_s22   ;;  %s3081_s21 = sphi %s3127_s21, %s3816_s21   ;;  %s3077_s20 = sphi %s3125_s20, %s3815_s20   ;;  %s3073_s19 = sphi %s3123_s19, %s3814_s19   ;;  %s3069_s18 = sphi %s3121_s18, %s3813_s18   ;;  %s3065_s17 = sphi %s3119_s17, %s3812_s17   ;;  %s3061_s16 = sphi %s3117_s16, %s3811_s16   ;;  %s3057_s15 = sphi %s3115_s15, %s3810_s15   ;;  %s3053_s14 = sphi %s3113_s14, %s3809_s14   ;;  %s3049_s13 = sphi %s3111_s13, %s3808_s13   ;;  %s3045_s12 = sphi %s3109_s12, %s3807_s12  }
   0xa   : > { %p26_p0 = scmp.ge.s32.totalorder %s25_s24, 2  ;;  %s28_s25 = sadd.s32 1, %s3081_s21 }
   0xb   : > { %s41_s26 = sadd.s32 1, %s3065_s17  ;;  %p48_p1 = scmp.ne.s32.totalorder %s3065_s17, %s3061_s16 }
   0xc   : > { %s3818_s24 = smov (%p26_p0, %s25_s24), 0  ;;  %s3820_s25 = smov (!%p26_p0, %s28_s25), %s3081_s21 }
   0xd   : > { %s37_s27 = ssub.s32 %s3077_s20, %s3818_s24  ;;  %p49_p2 = scmp.eq.s32.totalorder %s3085_s22, 0 }
   0xe   : > { %p30_p3 = scmp.ge.s32.totalorder %s3820_s25, 2  ;;  %p39_p4 = scmp.eq.s32.totalorder %s37_s27, 0 }
   0xf   : > { %p3176_p5 = por %p49_p2, %p48_p1  ;;  %s69_s29 = sadd.s32 1, %s3057_s15 }
  0x10   : > { %s3822_s25 = smov (%p30_p3, %s3820_s25), 0  ;;  %p76_p6 = scmp.ne.s32.totalorder %s3057_s15, %s3053_s14 }
  0x11   : > { %3801 = sst [smem:[#allocation6_spill]] %s3822_s25  ;;  %s65_s4 = ssub.s32 %s3081_s21, %s3822_s25 }
  0x12   : > { %s3184_s30 = scalar_select %p39_p4, %s3065_s17, %s41_s26  }
  0x13   : > { %s66_s5 = sor.u32 %s65_s4, %s37_s27  ;;  %p121_p7 = scmp.eq.s32.totalorder %s65_s4, 0 }
  0x14   : > { %p67_p8 = scmp.eq.s32.totalorder %s66_s5, 0  ;;  %p3190_p9 = por %p76_p6, %p49_p2 }
  0x15   : > { %s123_s7 = sadd.s32 1, %s3049_s13  ;;  %p133_p10 = scmp.ne.s32.totalorder %s3049_s13, %s3045_s12 }
  0x16   : > { %s3198_s8 = scalar_select %p67_p8, %s3057_s15, %s69_s29  }
  0x17   : > { %s3201_s9 = scalar_select %p121_p7, %s3049_s13, %s123_s7  }
  0x18   : > { %p134_p11 = scmp.eq.s32.totalorder %s2448_s23, 3  ;;  %p2451_p13 = scmp.ge.s32.totalorder %s3085_s22, 4 }
  0x1a   : > { %p3203_p12 = por %p134_p11, %p133_p10  ;;  %156 = sbr.rel (%p2451_p13) target bundleno = 132 (0x84), region = 16 }
  0x1f   : > { %159 = sbr.rel (!%p3176_p5) target bundleno = 50 (0x32), region = 20  ;;  %s161_s11 = sand.u32 (%p3176_p5), 1, %s3065_s17  }
  0x20   : > { %s2640_s26 = smul.u32 (%p3176_p5), 36, %s3077_s20  ;;  %s3804_s0 = sld [smem:[#allocation7_spill]] (%p3176_p5) }
  0x21   : > { %s2663_s27 = smul.u32 (%p3176_p5), 144, %s161_s11 }
  0x23   : > { %s3220_s23 = scalar_lea.vmem (%p3176_p5), [#allocation3], %s2663_s27 }
  0x26   : > { %s3215_s5 = scalar_lea.vmem %s3804_s0, %s2640_s26 }
  0x27   : > { %v184_v0 = vld [vmem:[%s3215_s5] sm:$0xff]  ;;  %v186_v1 = vld [vmem:[%s3215_s5 + $0x8] sm:$0xff]  ;;  %v188_v2 = vld [vmem:[%s3215_s5 + $0x10] sm:$0xff] }
  0x28   : > { %185 = vst [vmem:[%s3220_s23] sm:$0xff] %v184_v0  ;;  %187 = vst [vmem:[%s3220_s23 + $0x8] sm:$0xff] %v186_v1  ;;  %v190_v3 = vld [vmem:[%s3215_s5 + $0x18] sm:$0xff]  ;;  %v192_v4 = vld [vmem:[%s3215_s5 + $0x48] sm:$0xff] }
  0x29   : > { %189 = vst [vmem:[%s3220_s23 + $0x10] sm:$0xff] %v188_v2  ;;  %v194_v5 = vld [vmem:[%s3215_s5 + $0x50] sm:$0xff]  ;;  %191 = vst [vmem:[%s3220_s23 + $0x18] sm:$0xff] %v190_v3  ;;  %v196_v6 = vld [vmem:[%s3215_s5 + $0x58] sm:$0xff] }
  0x2a   : > { %193 = vst [vmem:[%s3220_s23 + $0x24] sm:$0xff] %v192_v4  ;;  %195 = vst [vmem:[%s3220_s23 + $0x2c] sm:$0xff] %v194_v5  ;;  %v198_v7 = vld [vmem:[%s3215_s5 + $0x60] sm:$0xff]  ;;  %v200_v8 = vld [vmem:[%s3215_s5 + $0x90] sm:$0xff] }
  0x2b   : > { %197 = vst [vmem:[%s3220_s23 + $0x34] sm:$0xff] %v196_v6  ;;  %199 = vst [vmem:[%s3220_s23 + $0x3c] sm:$0xff] %v198_v7  ;;  %v202_v9 = vld [vmem:[%s3215_s5 + $0x98] sm:$0xff]  ;;  %v204_v10 = vld [vmem:[%s3215_s5 + $0xa0] sm:$0xff] }
  0x2c   : > { %201 = vst [vmem:[%s3220_s23 + $0x48] sm:$0xff] %v200_v8  ;;  %v206_v11 = vld [vmem:[%s3215_s5 + $0xa8] sm:$0xff]  ;;  %203 = vst [vmem:[%s3220_s23 + $0x50] sm:$0xff] %v202_v9  ;;  %v208_v12 = vld [vmem:[%s3215_s5 + $0xd8] sm:$0xff] }
  0x2d   : > { %205 = vst [vmem:[%s3220_s23 + $0x58] sm:$0xff] %v204_v10  ;;  %207 = vst [vmem:[%s3220_s23 + $0x60] sm:$0xff] %v206_v11  ;;  %v210_v13 = vld [vmem:[%s3215_s5 + $0xe0] sm:$0xff]  ;;  %v212_v14 = vld [vmem:[%s3215_s5 + $0xe8] sm:$0xff] }
  0x2e   : > { %209 = vst [vmem:[%s3220_s23 + $0x6c] sm:$0xff] %v208_v12  ;;  %211 = vst [vmem:[%s3220_s23 + $0x74] sm:$0xff] %v210_v13  ;;  %v214_v15 = vld [vmem:[%s3215_s5 + $0xf0] sm:$0xff]  ;;  %v2453_v16 = vld [vmem:[%s3215_s5 + $0x20] sm:$0xf] }
  0x2f   : > { %213 = vst [vmem:[%s3220_s23 + $0x7c] sm:$0xff] %v212_v14  ;;  %v2455_v17 = vld [vmem:[%s3215_s5 + $0x68] sm:$0xf]  ;;  %215 = vst [vmem:[%s3220_s23 + $0x84] sm:$0xff] %v214_v15  ;;  %v2457_v18 = vld [vmem:[%s3215_s5 + $0xb0] sm:$0xf] }
  0x30   : > { %2454 = vst [vmem:[%s3220_s23 + $0x20] sm:$0xf] %v2453_v16  ;;  %2456 = vst [vmem:[%s3220_s23 + $0x44] sm:$0xf] %v2455_v17  ;;  %v2459_v19 = vld [vmem:[%s3215_s5 + $0xf8] sm:$0xf] }
  0x31   : > { %2458 = vst [vmem:[%s3220_s23 + $0x68] sm:$0xf] %v2457_v18  ;;  %2460 = vst [vmem:[%s3220_s23 + $0x8c] sm:$0xf] %v2459_v19 }
  0x32 PF: > { %237 = sbr.rel (!%p3190_p9) target bundleno = 132 (0x84), region = 46  ;;  %s239_s28 = sand.u32 (%p3190_p9), 1, %s3057_s15  }
  0x33   : > { %s2664_s7 = smul.u32 (%p3190_p9), 1152, %s239_s28  ;;  %s2461_s11 = sshll.u32 (%p3190_p9), %s3081_s21, 1 }
  0x34   : > { %s2641_s26 = smul.u32 (%p3190_p9), 576, %s3077_s20  ;;  %s3805_s1 = sld [smem:[#allocation8_spill]] (%p3190_p9) }
  0x35   : > { %s3272_s6 = scalar_lea.vmem (%p3190_p9), [#allocation4], %s2664_s7 }
  0x36   : > { %s245_s27 = sadd.s32 (%p3190_p9), %s2641_s26, %s2461_s11 }
  0x37   : > { %s2463_s29 = sshll.u32 %s245_s27, 2 }
  0x3a   : > { %s3267_s25 = scalar_lea.vmem %s3805_s1, %s2463_s29 }
  0x3b   : > { %v562_v20 = vld [vmem:[%s3267_s25] sm:$0xff]  ;;  %v564_v21 = vld [vmem:[%s3267_s25 + $0x10] sm:$0xff] }
  0x3c   : > { %v566_v22 = vld [vmem:[%s3267_s25 + $0x20] sm:$0xff]  ;;  %563 = vst [vmem:[%s3272_s6] sm:$0xff] %v562_v20  ;;  %565 = vst [vmem:[%s3272_s6 + $0x8] sm:$0xff] %v564_v21  ;;  %v568_v23 = vld [vmem:[%s3267_s25 + $0x30] sm:$0xff] }
  0x3d   : > { %567 = vst [vmem:[%s3272_s6 + $0x10] sm:$0xff] %v566_v22  ;;  %v570_v24 = vld [vmem:[%s3267_s25 + $0x40] sm:$0xff]  ;;  %v572_v25 = vld [vmem:[%s3267_s25 + $0x50] sm:$0xff]  ;;  %569 = vst [vmem:[%s3272_s6 + $0x18] sm:$0xff] %v568_v23 }
  0x3e   : > { %571 = vst [vmem:[%s3272_s6 + $0x20] sm:$0xff] %v570_v24  ;;  %573 = vst [vmem:[%s3272_s6 + $0x28] sm:$0xff] %v572_v25  ;;  %v574_v26 = vld [vmem:[%s3267_s25 + $0x60] sm:$0xff]  ;;  %v576_v27 = vld [vmem:[%s3267_s25 + $0x70] sm:$0xff] }
  0x3f   : > { %v578_v28 = vld [vmem:[%s3267_s25 + $0x80] sm:$0xff]  ;;  %575 = vst [vmem:[%s3272_s6 + $0x30] sm:$0xff] %v574_v26  ;;  %577 = vst [vmem:[%s3272_s6 + $0x38] sm:$0xff] %v576_v27  ;;  %v580_v29 = vld [vmem:[%s3267_s25 + $0x90] sm:$0xff] }
  0x40   : > { %579 = vst [vmem:[%s3272_s6 + $0x40] sm:$0xff] %v578_v28  ;;  %v582_v30 = vld [vmem:[%s3267_s25 + $0xa0] sm:$0xff]  ;;  %v584_v31 = vld [vmem:[%s3267_s25 + $0xb0] sm:$0xff]  ;;  %581 = vst [vmem:[%s3272_s6 + $0x48] sm:$0xff] %v580_v29 }
  0x41   : > { %583 = vst [vmem:[%s3272_s6 + $0x50] sm:$0xff] %v582_v30  ;;  %585 = vst [vmem:[%s3272_s6 + $0x58] sm:$0xff] %v584_v31  ;;  %v586_v32 = vld [vmem:[%s3267_s25 + $0xc0] sm:$0xff]  ;;  %v588_v33 = vld [vmem:[%s3267_s25 + $0xd0] sm:$0xff] }
  0x42   : > { %v590_v34 = vld [vmem:[%s3267_s25 + $0xe0] sm:$0xff]  ;;  %587 = vst [vmem:[%s3272_s6 + $0x60] sm:$0xff] %v586_v32  ;;  %589 = vst [vmem:[%s3272_s6 + $0x68] sm:$0xff] %v588_v33  ;;  %v592_v35 = vld [vmem:[%s3267_s25 + $0xf0] sm:$0xff] }
  0x43   : > { %591 = vst [vmem:[%s3272_s6 + $0x70] sm:$0xff] %v590_v34  ;;  %v594_v36 = vld [vmem:[%s3267_s25 + $0x100] sm:$0xff]  ;;  %v596_v37 = vld [vmem:[%s3267_s25 + $0x110] sm:$0xff]  ;;  %593 = vst [vmem:[%s3272_s6 + $0x78] sm:$0xff] %v592_v35 }
  0x44   : > { %595 = vst [vmem:[%s3272_s6 + $0x80] sm:$0xff] %v594_v36  ;;  %597 = vst [vmem:[%s3272_s6 + $0x88] sm:$0xff] %v596_v37  ;;  %v598_v38 = vld [vmem:[%s3267_s25 + $0x120] sm:$0xff]  ;;  %v600_v39 = vld [vmem:[%s3267_s25 + $0x130] sm:$0xff] }
  0x45   : > { %v602_v40 = vld [vmem:[%s3267_s25 + $0x140] sm:$0xff]  ;;  %599 = vst [vmem:[%s3272_s6 + $0x90] sm:$0xff] %v598_v38  ;;  %601 = vst [vmem:[%s3272_s6 + $0x98] sm:$0xff] %v600_v39  ;;  %v604_v41 = vld [vmem:[%s3267_s25 + $0x150] sm:$0xff] }
  0x46   : > { %603 = vst [vmem:[%s3272_s6 + $0xa0] sm:$0xff] %v602_v40  ;;  %v606_v42 = vld [vmem:[%s3267_s25 + $0x160] sm:$0xff]  ;;  %v608_v43 = vld [vmem:[%s3267_s25 + $0x170] sm:$0xff]  ;;  %605 = vst [vmem:[%s3272_s6 + $0xa8] sm:$0xff] %v604_v41 }
  0x47   : > { %607 = vst [vmem:[%s3272_s6 + $0xb0] sm:$0xff] %v606_v42  ;;  %609 = vst [vmem:[%s3272_s6 + $0xb8] sm:$0xff] %v608_v43  ;;  %v610_v44 = vld [vmem:[%s3267_s25 + $0x180] sm:$0xff]  ;;  %v612_v45 = vld [vmem:[%s3267_s25 + $0x190] sm:$0xff] }
  0x48   : > { %v614_v46 = vld [vmem:[%s3267_s25 + $0x1a0] sm:$0xff]  ;;  %611 = vst [vmem:[%s3272_s6 + $0xc0] sm:$0xff] %v610_v44  ;;  %613 = vst [vmem:[%s3272_s6 + $0xc8] sm:$0xff] %v612_v45  ;;  %v616_v47 = vld [vmem:[%s3267_s25 + $0x1b0] sm:$0xff] }
  0x49   : > { %615 = vst [vmem:[%s3272_s6 + $0xd0] sm:$0xff] %v614_v46  ;;  %v618_v48 = vld [vmem:[%s3267_s25 + $0x1c0] sm:$0xff]  ;;  %v620_v49 = vld [vmem:[%s3267_s25 + $0x1d0] sm:$0xff]  ;;  %617 = vst [vmem:[%s3272_s6 + $0xd8] sm:$0xff] %v616_v47 }
  0x4a   : > { %619 = vst [vmem:[%s3272_s6 + $0xe0] sm:$0xff] %v618_v48  ;;  %621 = vst [vmem:[%s3272_s6 + $0xe8] sm:$0xff] %v620_v49  ;;  %v622_v50 = vld [vmem:[%s3267_s25 + $0x1e0] sm:$0xff]  ;;  %v624_v51 = vld [vmem:[%s3267_s25 + $0x1f0] sm:$0xff] }
  0x4b   : > { %v626_v52 = vld [vmem:[%s3267_s25 + $0x200] sm:$0xff]  ;;  %623 = vst [vmem:[%s3272_s6 + $0xf0] sm:$0xff] %v622_v50  ;;  %625 = vst [vmem:[%s3272_s6 + $0xf8] sm:$0xff] %v624_v51  ;;  %v628_v53 = vld [vmem:[%s3267_s25 + $0x210] sm:$0xff] }
  0x4c   : > { %627 = vst [vmem:[%s3272_s6 + $0x100] sm:$0xff] %v626_v52  ;;  %v630_v54 = vld [vmem:[%s3267_s25 + $0x220] sm:$0xff]  ;;  %v632_v55 = vld [vmem:[%s3267_s25 + $0x230] sm:$0xff]  ;;  %629 = vst [vmem:[%s3272_s6 + $0x108] sm:$0xff] %v628_v53 }
  0x4d   : > { %631 = vst [vmem:[%s3272_s6 + $0x110] sm:$0xff] %v630_v54  ;;  %633 = vst [vmem:[%s3272_s6 + $0x118] sm:$0xff] %v632_v55  ;;  %v634_v56 = vld [vmem:[%s3267_s25 + $0x240] sm:$0xff]  ;;  %v636_v57 = vld [vmem:[%s3267_s25 + $0x250] sm:$0xff] }
  0x4e   : > { %v638_v58 = vld [vmem:[%s3267_s25 + $0x260] sm:$0xff]  ;;  %635 = vst [vmem:[%s3272_s6 + $0x120] sm:$0xff] %v634_v56  ;;  %637 = vst [vmem:[%s3272_s6 + $0x128] sm:$0xff] %v636_v57  ;;  %v640_v59 = vld [vmem:[%s3267_s25 + $0x270] sm:$0xff] }
  0x4f   : > { %639 = vst [vmem:[%s3272_s6 + $0x130] sm:$0xff] %v638_v58  ;;  %v642_v60 = vld [vmem:[%s3267_s25 + $0x280] sm:$0xff]  ;;  %v644_v61 = vld [vmem:[%s3267_s25 + $0x290] sm:$0xff]  ;;  %641 = vst [vmem:[%s3272_s6 + $0x138] sm:$0xff] %v640_v59 }
  0x50   : > { %643 = vst [vmem:[%s3272_s6 + $0x140] sm:$0xff] %v642_v60  ;;  %645 = vst [vmem:[%s3272_s6 + $0x148] sm:$0xff] %v644_v61  ;;  %v646_v62 = vld [vmem:[%s3267_s25 + $0x2a0] sm:$0xff]  ;;  %v648_v63 = vld [vmem:[%s3267_s25 + $0x2b0] sm:$0xff] }
  0x51   : > { %v650_v0 = vld [vmem:[%s3267_s25 + $0x2c0] sm:$0xff]  ;;  %647 = vst [vmem:[%s3272_s6 + $0x150] sm:$0xff] %v646_v62  ;;  %649 = vst [vmem:[%s3272_s6 + $0x158] sm:$0xff] %v648_v63  ;;  %v652_v1 = vld [vmem:[%s3267_s25 + $0x2d0] sm:$0xff] }
  0x52   : > { %651 = vst [vmem:[%s3272_s6 + $0x160] sm:$0xff] %v650_v0  ;;  %v654_v2 = vld [vmem:[%s3267_s25 + $0x2e0] sm:$0xff]  ;;  %v656_v3 = vld [vmem:[%s3267_s25 + $0x2f0] sm:$0xff]  ;;  %653 = vst [vmem:[%s3272_s6 + $0x168] sm:$0xff] %v652_v1 }
  0x53   : > { %655 = vst [vmem:[%s3272_s6 + $0x170] sm:$0xff] %v654_v2  ;;  %657 = vst [vmem:[%s3272_s6 + $0x178] sm:$0xff] %v656_v3  ;;  %v658_v4 = vld [vmem:[%s3267_s25 + $0x300] sm:$0xff]  ;;  %v660_v5 = vld [vmem:[%s3267_s25 + $0x310] sm:$0xff] }
  0x54   : > { %v662_v6 = vld [vmem:[%s3267_s25 + $0x320] sm:$0xff]  ;;  %659 = vst [vmem:[%s3272_s6 + $0x180] sm:$0xff] %v658_v4  ;;  %661 = vst [vmem:[%s3272_s6 + $0x188] sm:$0xff] %v660_v5  ;;  %v664_v7 = vld [vmem:[%s3267_s25 + $0x330] sm:$0xff] }
  0x55   : > { %663 = vst [vmem:[%s3272_s6 + $0x190] sm:$0xff] %v662_v6  ;;  %v666_v8 = vld [vmem:[%s3267_s25 + $0x340] sm:$0xff]  ;;  %v668_v9 = vld [vmem:[%s3267_s25 + $0x350] sm:$0xff]  ;;  %665 = vst [vmem:[%s3272_s6 + $0x198] sm:$0xff] %v664_v7 }
  0x56   : > { %667 = vst [vmem:[%s3272_s6 + $0x1a0] sm:$0xff] %v666_v8  ;;  %669 = vst [vmem:[%s3272_s6 + $0x1a8] sm:$0xff] %v668_v9  ;;  %v670_v10 = vld [vmem:[%s3267_s25 + $0x360] sm:$0xff]  ;;  %v672_v11 = vld [vmem:[%s3267_s25 + $0x370] sm:$0xff] }
  0x57   : > { %v674_v12 = vld [vmem:[%s3267_s25 + $0x380] sm:$0xff]  ;;  %671 = vst [vmem:[%s3272_s6 + $0x1b0] sm:$0xff] %v670_v10  ;;  %673 = vst [vmem:[%s3272_s6 + $0x1b8] sm:$0xff] %v672_v11  ;;  %v676_v13 = vld [vmem:[%s3267_s25 + $0x390] sm:$0xff] }
  0x58   : > { %675 = vst [vmem:[%s3272_s6 + $0x1c0] sm:$0xff] %v674_v12  ;;  %v678_v14 = vld [vmem:[%s3267_s25 + $0x3a0] sm:$0xff]  ;;  %v680_v15 = vld [vmem:[%s3267_s25 + $0x3b0] sm:$0xff]  ;;  %677 = vst [vmem:[%s3272_s6 + $0x1c8] sm:$0xff] %v676_v13 }
  0x59   : > { %679 = vst [vmem:[%s3272_s6 + $0x1d0] sm:$0xff] %v678_v14  ;;  %681 = vst [vmem:[%s3272_s6 + $0x1d8] sm:$0xff] %v680_v15  ;;  %v682_v16 = vld [vmem:[%s3267_s25 + $0x3c0] sm:$0xff]  ;;  %v684_v17 = vld [vmem:[%s3267_s25 + $0x3d0] sm:$0xff] }
  0x5a   : > { %v686_v18 = vld [vmem:[%s3267_s25 + $0x3e0] sm:$0xff]  ;;  %683 = vst [vmem:[%s3272_s6 + $0x1e0] sm:$0xff] %v682_v16  ;;  %685 = vst [vmem:[%s3272_s6 + $0x1e8] sm:$0xff] %v684_v17  ;;  %v688_v19 = vld [vmem:[%s3267_s25 + $0x3f0] sm:$0xff] }
  0x5b   : > { %687 = vst [vmem:[%s3272_s6 + $0x1f0] sm:$0xff] %v686_v18  ;;  %v690_v20 = vld [vmem:[%s3267_s25 + $0x400] sm:$0xff]  ;;  %v692_v21 = vld [vmem:[%s3267_s25 + $0x410] sm:$0xff]  ;;  %689 = vst [vmem:[%s3272_s6 + $0x1f8] sm:$0xff] %v688_v19 }
  0x5c   : > { %691 = vst [vmem:[%s3272_s6 + $0x200] sm:$0xff] %v690_v20  ;;  %693 = vst [vmem:[%s3272_s6 + $0x208] sm:$0xff] %v692_v21  ;;  %v694_v22 = vld [vmem:[%s3267_s25 + $0x420] sm:$0xff]  ;;  %v696_v23 = vld [vmem:[%s3267_s25 + $0x430] sm:$0xff] }
  0x5d   : > { %v698_v24 = vld [vmem:[%s3267_s25 + $0x440] sm:$0xff]  ;;  %695 = vst [vmem:[%s3272_s6 + $0x210] sm:$0xff] %v694_v22  ;;  %697 = vst [vmem:[%s3272_s6 + $0x218] sm:$0xff] %v696_v23  ;;  %v700_v25 = vld [vmem:[%s3267_s25 + $0x450] sm:$0xff] }
  0x5e   : > { %699 = vst [vmem:[%s3272_s6 + $0x220] sm:$0xff] %v698_v24  ;;  %v702_v26 = vld [vmem:[%s3267_s25 + $0x460] sm:$0xff]  ;;  %v704_v27 = vld [vmem:[%s3267_s25 + $0x470] sm:$0xff]  ;;  %701 = vst [vmem:[%s3272_s6 + $0x228] sm:$0xff] %v700_v25 }
  0x5f   : > { %703 = vst [vmem:[%s3272_s6 + $0x230] sm:$0xff] %v702_v26  ;;  %705 = vst [vmem:[%s3272_s6 + $0x238] sm:$0xff] %v704_v27  ;;  %v706_v28 = vld [vmem:[%s3267_s25 + $0x480] sm:$0xff]  ;;  %v708_v29 = vld [vmem:[%s3267_s25 + $0x490] sm:$0xff] }
  0x60   : > { %v710_v30 = vld [vmem:[%s3267_s25 + $0x4a0] sm:$0xff]  ;;  %707 = vst [vmem:[%s3272_s6 + $0x240] sm:$0xff] %v706_v28  ;;  %709 = vst [vmem:[%s3272_s6 + $0x248] sm:$0xff] %v708_v29  ;;  %v712_v31 = vld [vmem:[%s3267_s25 + $0x4b0] sm:$0xff] }
  0x61   : > { %711 = vst [vmem:[%s3272_s6 + $0x250] sm:$0xff] %v710_v30  ;;  %v714_v32 = vld [vmem:[%s3267_s25 + $0x4c0] sm:$0xff]  ;;  %v716_v33 = vld [vmem:[%s3267_s25 + $0x4d0] sm:$0xff]  ;;  %713 = vst [vmem:[%s3272_s6 + $0x258] sm:$0xff] %v712_v31 }
  0x62   : > { %715 = vst [vmem:[%s3272_s6 + $0x260] sm:$0xff] %v714_v32  ;;  %717 = vst [vmem:[%s3272_s6 + $0x268] sm:$0xff] %v716_v33  ;;  %v718_v34 = vld [vmem:[%s3267_s25 + $0x4e0] sm:$0xff]  ;;  %v720_v35 = vld [vmem:[%s3267_s25 + $0x4f0] sm:$0xff] }
  0x63   : > { %v722_v36 = vld [vmem:[%s3267_s25 + $0x500] sm:$0xff]  ;;  %719 = vst [vmem:[%s3272_s6 + $0x270] sm:$0xff] %v718_v34  ;;  %721 = vst [vmem:[%s3272_s6 + $0x278] sm:$0xff] %v720_v35  ;;  %v724_v37 = vld [vmem:[%s3267_s25 + $0x510] sm:$0xff] }
  0x64   : > { %723 = vst [vmem:[%s3272_s6 + $0x280] sm:$0xff] %v722_v36  ;;  %v726_v38 = vld [vmem:[%s3267_s25 + $0x520] sm:$0xff]  ;;  %v728_v39 = vld [vmem:[%s3267_s25 + $0x530] sm:$0xff]  ;;  %725 = vst [vmem:[%s3272_s6 + $0x288] sm:$0xff] %v724_v37 }
  0x65   : > { %727 = vst [vmem:[%s3272_s6 + $0x290] sm:$0xff] %v726_v38  ;;  %729 = vst [vmem:[%s3272_s6 + $0x298] sm:$0xff] %v728_v39  ;;  %v730_v40 = vld [vmem:[%s3267_s25 + $0x540] sm:$0xff]  ;;  %v732_v41 = vld [vmem:[%s3267_s25 + $0x550] sm:$0xff] }
  0x66   : > { %v734_v42 = vld [vmem:[%s3267_s25 + $0x560] sm:$0xff]  ;;  %731 = vst [vmem:[%s3272_s6 + $0x2a0] sm:$0xff] %v730_v40  ;;  %733 = vst [vmem:[%s3272_s6 + $0x2a8] sm:$0xff] %v732_v41  ;;  %v736_v43 = vld [vmem:[%s3267_s25 + $0x570] sm:$0xff] }
  0x67   : > { %735 = vst [vmem:[%s3272_s6 + $0x2b0] sm:$0xff] %v734_v42  ;;  %v738_v44 = vld [vmem:[%s3267_s25 + $0x580] sm:$0xff]  ;;  %v740_v45 = vld [vmem:[%s3267_s25 + $0x590] sm:$0xff]  ;;  %737 = vst [vmem:[%s3272_s6 + $0x2b8] sm:$0xff] %v736_v43 }
  0x68   : > { %739 = vst [vmem:[%s3272_s6 + $0x2c0] sm:$0xff] %v738_v44  ;;  %741 = vst [vmem:[%s3272_s6 + $0x2c8] sm:$0xff] %v740_v45  ;;  %v742_v46 = vld [vmem:[%s3267_s25 + $0x5a0] sm:$0xff]  ;;  %v744_v47 = vld [vmem:[%s3267_s25 + $0x5b0] sm:$0xff] }
  0x69   : > { %v746_v48 = vld [vmem:[%s3267_s25 + $0x5c0] sm:$0xff]  ;;  %743 = vst [vmem:[%s3272_s6 + $0x2d0] sm:$0xff] %v742_v46  ;;  %745 = vst [vmem:[%s3272_s6 + $0x2d8] sm:$0xff] %v744_v47  ;;  %v748_v49 = vld [vmem:[%s3267_s25 + $0x5d0] sm:$0xff] }
  0x6a   : > { %747 = vst [vmem:[%s3272_s6 + $0x2e0] sm:$0xff] %v746_v48  ;;  %v750_v50 = vld [vmem:[%s3267_s25 + $0x5e0] sm:$0xff]  ;;  %v752_v51 = vld [vmem:[%s3267_s25 + $0x5f0] sm:$0xff]  ;;  %749 = vst [vmem:[%s3272_s6 + $0x2e8] sm:$0xff] %v748_v49 }
  0x6b   : > { %751 = vst [vmem:[%s3272_s6 + $0x2f0] sm:$0xff] %v750_v50  ;;  %753 = vst [vmem:[%s3272_s6 + $0x2f8] sm:$0xff] %v752_v51  ;;  %v754_v52 = vld [vmem:[%s3267_s25 + $0x600] sm:$0xff]  ;;  %v756_v53 = vld [vmem:[%s3267_s25 + $0x610] sm:$0xff] }
  0x6c   : > { %v758_v54 = vld [vmem:[%s3267_s25 + $0x620] sm:$0xff]  ;;  %755 = vst [vmem:[%s3272_s6 + $0x300] sm:$0xff] %v754_v52  ;;  %757 = vst [vmem:[%s3272_s6 + $0x308] sm:$0xff] %v756_v53  ;;  %v760_v55 = vld [vmem:[%s3267_s25 + $0x630] sm:$0xff] }
  0x6d   : > { %759 = vst [vmem:[%s3272_s6 + $0x310] sm:$0xff] %v758_v54  ;;  %v762_v56 = vld [vmem:[%s3267_s25 + $0x640] sm:$0xff]  ;;  %v764_v57 = vld [vmem:[%s3267_s25 + $0x650] sm:$0xff]  ;;  %761 = vst [vmem:[%s3272_s6 + $0x318] sm:$0xff] %v760_v55 }
  0x6e   : > { %763 = vst [vmem:[%s3272_s6 + $0x320] sm:$0xff] %v762_v56  ;;  %765 = vst [vmem:[%s3272_s6 + $0x328] sm:$0xff] %v764_v57  ;;  %v766_v58 = vld [vmem:[%s3267_s25 + $0x660] sm:$0xff]  ;;  %v768_v59 = vld [vmem:[%s3267_s25 + $0x670] sm:$0xff] }
  0x6f   : > { %v770_v60 = vld [vmem:[%s3267_s25 + $0x680] sm:$0xff]  ;;  %767 = vst [vmem:[%s3272_s6 + $0x330] sm:$0xff] %v766_v58  ;;  %769 = vst [vmem:[%s3272_s6 + $0x338] sm:$0xff] %v768_v59  ;;  %v772_v61 = vld [vmem:[%s3267_s25 + $0x690] sm:$0xff] }
  0x70   : > { %771 = vst [vmem:[%s3272_s6 + $0x340] sm:$0xff] %v770_v60  ;;  %v774_v62 = vld [vmem:[%s3267_s25 + $0x6a0] sm:$0xff]  ;;  %v776_v63 = vld [vmem:[%s3267_s25 + $0x6b0] sm:$0xff]  ;;  %773 = vst [vmem:[%s3272_s6 + $0x348] sm:$0xff] %v772_v61 }
  0x71   : > { %775 = vst [vmem:[%s3272_s6 + $0x350] sm:$0xff] %v774_v62  ;;  %777 = vst [vmem:[%s3272_s6 + $0x358] sm:$0xff] %v776_v63  ;;  %v778_v0 = vld [vmem:[%s3267_s25 + $0x6c0] sm:$0xff]  ;;  %v780_v1 = vld [vmem:[%s3267_s25 + $0x6d0] sm:$0xff] }
  0x72   : > { %v782_v2 = vld [vmem:[%s3267_s25 + $0x6e0] sm:$0xff]  ;;  %779 = vst [vmem:[%s3272_s6 + $0x360] sm:$0xff] %v778_v0  ;;  %781 = vst [vmem:[%s3272_s6 + $0x368] sm:$0xff] %v780_v1  ;;  %v784_v3 = vld [vmem:[%s3267_s25 + $0x6f0] sm:$0xff] }
  0x73   : > { %783 = vst [vmem:[%s3272_s6 + $0x370] sm:$0xff] %v782_v2  ;;  %v786_v4 = vld [vmem:[%s3267_s25 + $0x700] sm:$0xff]  ;;  %v788_v5 = vld [vmem:[%s3267_s25 + $0x710] sm:$0xff]  ;;  %785 = vst [vmem:[%s3272_s6 + $0x378] sm:$0xff] %v784_v3 }
  0x74   : > { %787 = vst [vmem:[%s3272_s6 + $0x380] sm:$0xff] %v786_v4  ;;  %789 = vst [vmem:[%s3272_s6 + $0x388] sm:$0xff] %v788_v5  ;;  %v790_v6 = vld [vmem:[%s3267_s25 + $0x720] sm:$0xff]  ;;  %v792_v7 = vld [vmem:[%s3267_s25 + $0x730] sm:$0xff] }
  0x75   : > { %v794_v8 = vld [vmem:[%s3267_s25 + $0x740] sm:$0xff]  ;;  %791 = vst [vmem:[%s3272_s6 + $0x390] sm:$0xff] %v790_v6  ;;  %793 = vst [vmem:[%s3272_s6 + $0x398] sm:$0xff] %v792_v7  ;;  %v796_v9 = vld [vmem:[%s3267_s25 + $0x750] sm:$0xff] }
  0x76   : > { %795 = vst [vmem:[%s3272_s6 + $0x3a0] sm:$0xff] %v794_v8  ;;  %v798_v10 = vld [vmem:[%s3267_s25 + $0x760] sm:$0xff]  ;;  %v800_v11 = vld [vmem:[%s3267_s25 + $0x770] sm:$0xff]  ;;  %797 = vst [vmem:[%s3272_s6 + $0x3a8] sm:$0xff] %v796_v9 }
  0x77   : > { %799 = vst [vmem:[%s3272_s6 + $0x3b0] sm:$0xff] %v798_v10  ;;  %801 = vst [vmem:[%s3272_s6 + $0x3b8] sm:$0xff] %v800_v11  ;;  %v802_v12 = vld [vmem:[%s3267_s25 + $0x780] sm:$0xff]  ;;  %v804_v13 = vld [vmem:[%s3267_s25 + $0x790] sm:$0xff] }
  0x78   : > { %v806_v14 = vld [vmem:[%s3267_s25 + $0x7a0] sm:$0xff]  ;;  %803 = vst [vmem:[%s3272_s6 + $0x3c0] sm:$0xff] %v802_v12  ;;  %805 = vst [vmem:[%s3272_s6 + $0x3c8] sm:$0xff] %v804_v13  ;;  %v808_v15 = vld [vmem:[%s3267_s25 + $0x7b0] sm:$0xff] }
  0x79   : > { %807 = vst [vmem:[%s3272_s6 + $0x3d0] sm:$0xff] %v806_v14  ;;  %v810_v16 = vld [vmem:[%s3267_s25 + $0x7c0] sm:$0xff]  ;;  %v812_v17 = vld [vmem:[%s3267_s25 + $0x7d0] sm:$0xff]  ;;  %809 = vst [vmem:[%s3272_s6 + $0x3d8] sm:$0xff] %v808_v15 }
  0x7a   : > { %811 = vst [vmem:[%s3272_s6 + $0x3e0] sm:$0xff] %v810_v16  ;;  %813 = vst [vmem:[%s3272_s6 + $0x3e8] sm:$0xff] %v812_v17  ;;  %v814_v18 = vld [vmem:[%s3267_s25 + $0x7e0] sm:$0xff]  ;;  %v816_v19 = vld [vmem:[%s3267_s25 + $0x7f0] sm:$0xff] }
  0x7b   : > { %v818_v20 = vld [vmem:[%s3267_s25 + $0x800] sm:$0xff]  ;;  %815 = vst [vmem:[%s3272_s6 + $0x3f0] sm:$0xff] %v814_v18  ;;  %817 = vst [vmem:[%s3272_s6 + $0x3f8] sm:$0xff] %v816_v19  ;;  %v820_v21 = vld [vmem:[%s3267_s25 + $0x810] sm:$0xff] }
  0x7c   : > { %819 = vst [vmem:[%s3272_s6 + $0x400] sm:$0xff] %v818_v20  ;;  %v822_v22 = vld [vmem:[%s3267_s25 + $0x820] sm:$0xff]  ;;  %v824_v23 = vld [vmem:[%s3267_s25 + $0x830] sm:$0xff]  ;;  %821 = vst [vmem:[%s3272_s6 + $0x408] sm:$0xff] %v820_v21 }
  0x7d   : > { %823 = vst [vmem:[%s3272_s6 + $0x410] sm:$0xff] %v822_v22  ;;  %825 = vst [vmem:[%s3272_s6 + $0x418] sm:$0xff] %v824_v23  ;;  %v826_v24 = vld [vmem:[%s3267_s25 + $0x840] sm:$0xff]  ;;  %v828_v25 = vld [vmem:[%s3267_s25 + $0x850] sm:$0xff] }
  0x7e   : > { %v830_v26 = vld [vmem:[%s3267_s25 + $0x860] sm:$0xff]  ;;  %827 = vst [vmem:[%s3272_s6 + $0x420] sm:$0xff] %v826_v24  ;;  %829 = vst [vmem:[%s3272_s6 + $0x428] sm:$0xff] %v828_v25  ;;  %v832_v27 = vld [vmem:[%s3267_s25 + $0x870] sm:$0xff] }
  0x7f   : > { %831 = vst [vmem:[%s3272_s6 + $0x430] sm:$0xff] %v830_v26  ;;  %v834_v28 = vld [vmem:[%s3267_s25 + $0x880] sm:$0xff]  ;;  %v836_v29 = vld [vmem:[%s3267_s25 + $0x890] sm:$0xff]  ;;  %833 = vst [vmem:[%s3272_s6 + $0x438] sm:$0xff] %v832_v27 }
  0x80   : > { %835 = vst [vmem:[%s3272_s6 + $0x440] sm:$0xff] %v834_v28  ;;  %837 = vst [vmem:[%s3272_s6 + $0x448] sm:$0xff] %v836_v29  ;;  %v838_v30 = vld [vmem:[%s3267_s25 + $0x8a0] sm:$0xff]  ;;  %v840_v31 = vld [vmem:[%s3267_s25 + $0x8b0] sm:$0xff] }
  0x81   : > { %v842_v32 = vld [vmem:[%s3267_s25 + $0x8c0] sm:$0xff]  ;;  %839 = vst [vmem:[%s3272_s6 + $0x450] sm:$0xff] %v838_v30  ;;  %841 = vst [vmem:[%s3272_s6 + $0x458] sm:$0xff] %v840_v31  ;;  %v844_v33 = vld [vmem:[%s3267_s25 + $0x8d0] sm:$0xff] }
  0x82   : > { %843 = vst [vmem:[%s3272_s6 + $0x460] sm:$0xff] %v842_v32  ;;  %v846_v34 = vld [vmem:[%s3267_s25 + $0x8e0] sm:$0xff]  ;;  %v848_v35 = vld [vmem:[%s3267_s25 + $0x8f0] sm:$0xff]  ;;  %845 = vst [vmem:[%s3272_s6 + $0x468] sm:$0xff] %v844_v33 }
  0x83   : > { %847 = vst [vmem:[%s3272_s6 + $0x470] sm:$0xff] %v846_v34  ;;  %849 = vst [vmem:[%s3272_s6 + $0x478] sm:$0xff] %v848_v35 }
  0x84 PF: > { %p2464_p0 = scmp.ge.s32.totalorder %s3085_s22, 1  ;;  %p862_p1 = scmp.lt.s32.totalorder %s3085_s22, 5 }
  0x86   : > { %p863_p2 = pnand %p2464_p0, %p862_p1 }
  0x87   : > { %s869_s0 = sand.u32 (!%p863_p2), 1, %s3061_s16   ;;  %s876_s5 = sand.u32 (!%p863_p2), 1, %s3053_s14  }
  0x88   : > { %866 = sbr.rel (%p863_p2) target bundleno = 548 (0x224), region = 88  ;;  %s903_s28 = sand.u32 (!%p863_p2), 1, %s3045_s12  }
  0x89   : > { %s2665_s23 = smul.u32 (!%p863_p2), 144, %s869_s0  ;;  %s2465_s7 = sshll.u32 (!%p863_p2), %s903_s28, 5 }
  0x8a   : > { %s2666_s25 = smul.u32 (!%p863_p2), 1152, %s876_s5  ;;  %s2466_s11 = sshll.u32 (!%p863_p2), %s3073_s19, 1 }
  0x8b   : > { %p911_p3 = scmp.lt.s32.totalorder (!%p863_p2), %s2466_s11, 3  ;;  %s3571_s4 = scalar_lea.vmem (!%p863_p2), [#allocation3], %s2665_s23 }
  0x8c   : > { %s3573_s6 = scalar_lea.vmem (!%p863_p2), [#allocation4], %s2666_s25  ;;  %s3575_s1 = scalar_lea.vmem (!%p863_p2), [#allocation5], %s2465_s7 }
  0x8d   : > { %s3824_s11 = smov (!%p911_p3, %s2466_s11), 3  ;;  %p2467_p4 = scmp.ne.s32.totalorder %s3069_s18, 0 }
  0x8e   : > { %s913_s29 = scalar_lea.vmem %s3795_s2, %s3824_s11 }
  0x8f   : > { %921 = sbr.rel (%p2467_p4) target bundleno = 153 (0x99), region = 100 }
  0x94   : > { %v3087_v36 = vmov 0.0  }
  0x95   : > { %922 = vst [vmem:[#allocation2 + $0x30] sm:$0xff] %v3087_v36  ;;  %923 = vst [vmem:[#allocation2] sm:$0xff] %v3087_v36 }
  0x96   : > { %924 = vst [vmem:[#allocation2 + $0x18] sm:$0xff] %v3087_v36  ;;  %925 = vst [vmem:[#allocation2 + $0x10] sm:$0xff] %v3087_v36 }
  0x97   : > { %926 = vst [vmem:[#allocation2 + $0x8] sm:$0xff] %v3087_v36  ;;  %927 = vst [vmem:[#allocation2 + $0x20] sm:$0xff] %v3087_v36 }
  0x98   : > { %928 = vst [vmem:[#allocation2 + $0x28] sm:$0xff] %v3087_v36  ;;  %929 = vst [vmem:[#allocation2 + $0x38] sm:$0xff] %v3087_v36 }
  0x99 PF: > { %v2757_v37 = vld [vmem:[%s3573_s6 + $0x74] ss:$8 sps:$4 sm:$0xff]   ;;  %v2761_v39 = vld [vmem:[%s3573_s6 + $0x70] ss:$8 sps:$4 sm:$0xff]   ;;  %v2763_v41 = vld [vmem:[%s3573_s6 + $0x64] ss:$8 sps:$4 sm:$0xff]  }
  0x9a   : > { %v2759_v38 = vld [vmem:[%s3573_s6 + $0x174] ss:$8 sps:$4 sm:$0xff]   ;;  %1914 = vmatprep.subr.bf16.mxu0 %v2757_v37  ;;  %v2762_v40 = vld [vmem:[%s3573_s6 + $0x170] ss:$8 sps:$4 sm:$0xff]   ;;  %v2765_v42 = vld [vmem:[%s3573_s6 + $0x164] ss:$8 sps:$4 sm:$0xff]  }
  0x9b   : > { %1967 = vmatprep.subr.bf16.mxu1 %v2759_v38  ;;  %1915 = vmatpush1.bf16.msra.mxu0 %v2761_v39  ;;  %v2767_v43 = vld [vmem:[%s3573_s6 + $0x60] ss:$8 sps:$4 sm:$0xff]   ;;  %v2769_v45 = vld [vmem:[%s3573_s6 + $0x54] ss:$8 sps:$4 sm:$0xff]   ;;  %v2773_v47 = vld [vmem:[%s3573_s6 + $0x50] ss:$8 sps:$4 sm:$0xff]  }
  0x9c   : > { %1968 = vmatpush1.bf16.msra.mxu1 %v2762_v40  ;;  %1916 = vmatprep.subr.bf16.mxu0 %v2763_v41  ;;  %v2768_v44 = vld [vmem:[%s3573_s6 + $0x160] ss:$8 sps:$4 sm:$0xff]   ;;  %v2771_v46 = vld [vmem:[%s3573_s6 + $0x154] ss:$8 sps:$4 sm:$0xff]   ;;  %v2774_v48 = vld [vmem:[%s3573_s6 + $0x150] ss:$8 sps:$4 sm:$0xff]  }
  0x9d   : > { %1969 = vmatprep.subr.bf16.mxu1 %v2765_v42  ;;  %v2775_v49 = vld [vmem:[%s3573_s6 + $0x44] ss:$8 sps:$4 sm:$0xff]   ;;  %v2779_v51 = vld [vmem:[%s3573_s6 + $0x40] ss:$8 sps:$4 sm:$0xff]   ;;  %v2781_v53 = vld [vmem:[%s3573_s6 + $0x34] ss:$8 sps:$4 sm:$0xff]  }
  0x9e   : > { %v2777_v50 = vld [vmem:[%s3573_s6 + $0x144] ss:$8 sps:$4 sm:$0xff]   ;;  %v2780_v52 = vld [vmem:[%s3573_s6 + $0x140] ss:$8 sps:$4 sm:$0xff]   ;;  %v2783_v54 = vld [vmem:[%s3573_s6 + $0x134] ss:$8 sps:$4 sm:$0xff]  }
  0x9f   : > { %1917 = vmatpush1.bf16.msra.mxu0 %v2767_v43  ;;  %v2785_v55 = vld [vmem:[%s3573_s6 + $0x30] ss:$8 sps:$4 sm:$0xff]   ;;  %v2787_v57 = vld [vmem:[%s3573_s6 + $0x24] ss:$8 sps:$4 sm:$0xff]   ;;  %v2791_v59 = vld [vmem:[%s3573_s6 + $0x20] ss:$8 sps:$4 sm:$0xff]  }
  0xa0   : > { %1970 = vmatpush1.bf16.msra.mxu1 %v2768_v44  ;;  %1918 = vmatprep.subr.bf16.mxu0 %v2769_v45  ;;  %v2786_v56 = vld [vmem:[%s3573_s6 + $0x130] ss:$8 sps:$4 sm:$0xff]   ;;  %v2789_v58 = vld [vmem:[%s3573_s6 + $0x124] ss:$8 sps:$4 sm:$0xff]   ;;  %v2792_v60 = vld [vmem:[%s3573_s6 + $0x120] ss:$8 sps:$4 sm:$0xff]  }
  0xa1   : > { %1971 = vmatprep.subr.bf16.mxu1 %v2771_v46  ;;  %v2793_v61 = vld [vmem:[%s3573_s6 + $0x14] ss:$8 sps:$4 sm:$0xff]   ;;  %v2797_v63 = vld [vmem:[%s3573_s6 + $0x10] ss:$8 sps:$4 sm:$0xff]   ;;  %v2799_v1 = vld [vmem:[%s3573_s6 + $0x4] ss:$8 sps:$4 sm:$0xff]  }
  0xa2   : > { %v2795_v62 = vld [vmem:[%s3573_s6 + $0x114] ss:$8 sps:$4 sm:$0xff]   ;;  %v2798_v0 = vld [vmem:[%s3573_s6 + $0x110] ss:$8 sps:$4 sm:$0xff]   ;;  %v2801_v2 = vld [vmem:[%s3573_s6 + $0x104] ss:$8 sps:$4 sm:$0xff]  }
  0xa3   : > { %1919 = vmatpush1.bf16.msra.mxu0 %v2773_v47  ;;  %v2803_v3 = vld [vmem:[%s3573_s6] ss:$8 sps:$4 sm:$0xff]   ;;  %v2805_v5 = vld [vmem:[%s3573_s6 + $0xf4] ss:$8 sps:$4 sm:$0xff]   ;;  %v2809_v7 = vld [vmem:[%s3573_s6 + $0xf0] ss:$8 sps:$4 sm:$0xff]  }
  0xa4   : > { %1972 = vmatpush1.bf16.msra.mxu1 %v2774_v48  ;;  %1920 = vmatprep.subr.bf16.mxu0 %v2775_v49  ;;  %v2804_v4 = vld [vmem:[%s3573_s6 + $0x100] ss:$8 sps:$4 sm:$0xff]   ;;  %v2807_v6 = vld [vmem:[%s3573_s6 + $0x1f4] ss:$8 sps:$4 sm:$0xff]   ;;  %v2810_v8 = vld [vmem:[%s3573_s6 + $0x1f0] ss:$8 sps:$4 sm:$0xff]  }
  0xa5   : > { %1973 = vmatprep.subr.bf16.mxu1 %v2777_v50  ;;  %v2811_v9 = vld [vmem:[%s3573_s6 + $0xe4] ss:$8 sps:$4 sm:$0xff]   ;;  %v2815_v11 = vld [vmem:[%s3573_s6 + $0xe0] ss:$8 sps:$4 sm:$0xff]   ;;  %v2817_v13 = vld [vmem:[%s3573_s6 + $0xd4] ss:$8 sps:$4 sm:$0xff]  }
  0xa6   : > { %v2813_v10 = vld [vmem:[%s3573_s6 + $0x1e4] ss:$8 sps:$4 sm:$0xff]   ;;  %v2816_v12 = vld [vmem:[%s3573_s6 + $0x1e0] ss:$8 sps:$4 sm:$0xff]   ;;  %v2819_v14 = vld [vmem:[%s3573_s6 + $0x1d4] ss:$8 sps:$4 sm:$0xff]  }
  0xa7   : > { %1921 = vmatpush1.bf16.msra.mxu0 %v2779_v51  ;;  %v2821_v15 = vld [vmem:[%s3573_s6 + $0xd0] ss:$8 sps:$4 sm:$0xff]   ;;  %v2823_v17 = vld [vmem:[%s3573_s6 + $0xc4] ss:$8 sps:$4 sm:$0xff]   ;;  %v2827_v19 = vld [vmem:[%s3573_s6 + $0xc0] ss:$8 sps:$4 sm:$0xff]  }
  0xa8   : > { %1974 = vmatpush1.bf16.msra.mxu1 %v2780_v52  ;;  %1922 = vmatprep.subr.bf16.mxu0 %v2781_v53  ;;  %v2822_v16 = vld [vmem:[%s3573_s6 + $0x1d0] ss:$8 sps:$4 sm:$0xff]   ;;  %v2825_v18 = vld [vmem:[%s3573_s6 + $0x1c4] ss:$8 sps:$4 sm:$0xff]   ;;  %v2828_v20 = vld [vmem:[%s3573_s6 + $0x1c0] ss:$8 sps:$4 sm:$0xff]  }
  0xa9   : > { %1975 = vmatprep.subr.bf16.mxu1 %v2783_v54  ;;  %v2829_v21 = vld [vmem:[%s3573_s6 + $0xb4] ss:$8 sps:$4 sm:$0xff]   ;;  %v2833_v25 = vld [vmem:[%s3573_s6 + $0xb0] ss:$8 sps:$4 sm:$0xff]   ;;  %v2835_v27 = vld [vmem:[%s3573_s6 + $0xa4] ss:$8 sps:$4 sm:$0xff]  }
  0xaa   : > { %v2855_v22 = vld [vmem:[%s3571_s4 + $0x4] ss:$36 sps:$4 sm:$0xff]   ;;  %v2858_v24 = vld [vmem:[%s3571_s4 + $0xc] ss:$36 sps:$4 sm:$0xff]   ;;  %p2630_p5 = scmp.ne.s32.totalorder %s3069_s18, 1 }
  0xab   : > { %1923 = vmatpush1.bf16.msra.mxu0 %v2785_v55  ;;  %v2831_v23 = vld [vmem:[%s3573_s6 + $0x1b4] ss:$8 sps:$4 sm:$0xff]   ;;  %1946 = vmatprep.mubr.bf16.mxu0 %v2855_v22  ;;  %v2834_v26 = vld [vmem:[%s3573_s6 + $0x1b0] ss:$8 sps:$4 sm:$0xff]   ;;  %v2837_v28 = vld [vmem:[%s3573_s6 + $0x1a4] ss:$8 sps:$4 sm:$0xff]  }
  0xac   : > { %1976 = vmatpush1.bf16.msra.mxu1 %v2786_v56  ;;  %1924 = vmatprep.subr.bf16.mxu0 %v2787_v57  ;;  %v2839_v29 = vld [vmem:[%s3573_s6 + $0xa0] ss:$8 sps:$4 sm:$0xff]   ;;  %v2841_v31 = vld [vmem:[%s3573_s6 + $0x94] ss:$8 sps:$4 sm:$0xff]   ;;  %v2845_v33 = vld [vmem:[%s3573_s6 + $0x90] ss:$8 sps:$4 sm:$0xff]  }
  0xad   : > { %1977 = vmatprep.subr.bf16.mxu1 %v2789_v58  ;;  %1999 = vmatprep.mubr.bf16.mxu1 %v2858_v24  ;;  %v2840_v30 = vld [vmem:[%s3573_s6 + $0x1a0] ss:$8 sps:$4 sm:$0xff]   ;;  %v2843_v32 = vld [vmem:[%s3573_s6 + $0x194] ss:$8 sps:$4 sm:$0xff]   ;;  %v2846_v34 = vld [vmem:[%s3573_s6 + $0x190] ss:$8 sps:$4 sm:$0xff]  }
  0xae   : > { %v2847_v35 = vld [vmem:[%s3573_s6 + $0x84] ss:$8 sps:$4 sm:$0xff]   ;;  %v2851_v37 = vld [vmem:[%s3573_s6 + $0x80] ss:$8 sps:$4 sm:$0xff]   ;;  %v2861_v39 = vld [vmem:[%s3573_s6 + $0x274] ss:$8 sps:$4 sm:$0xff]  }
  0xaf   : > { %1925 = vmatpush1.bf16.msra.mxu0 %v2791_v59  ;;  %v2849_v36 = vld [vmem:[%s3573_s6 + $0x184] ss:$8 sps:$4 sm:$0xff]   ;;  %v2852_v38 = vld [vmem:[%s3573_s6 + $0x180] ss:$8 sps:$4 sm:$0xff]   ;;  %v2864_v40 = vld [vmem:[%s3573_s6 + $0x374] ss:$8 sps:$4 sm:$0xff]  }
  0xb0   : > { %1978 = vmatpush1.bf16.msra.mxu1 %v2792_v60  ;;  %1926 = vmatprep.subr.bf16.mxu0 %v2793_v61  ;;  %v2853_v41 = vld [vmem:[%s3571_s4] ss:$36 sps:$4 sm:$0xff]   ;;  %v2856_v42 = vld [vmem:[%s3571_s4 + $0x8] ss:$36 sps:$4 sm:$0xff]  }
  0xb1   : > { %1979 = vmatprep.subr.bf16.mxu1 %v2795_v62  ;;  %v2859_v43 = vld [vmem:[%s3573_s6 + $0x270] ss:$8 sps:$4 sm:$0xff]   ;;  %v2867_v45 = vld [vmem:[%s3573_s6 + $0x264] ss:$8 sps:$4 sm:$0xff]   ;;  %v2865_v47 = vld [vmem:[%s3573_s6 + $0x260] ss:$8 sps:$4 sm:$0xff]  }
  0xb2   : > { %v2862_v44 = vld [vmem:[%s3573_s6 + $0x370] ss:$8 sps:$4 sm:$0xff]   ;;  %v2870_v46 = vld [vmem:[%s3573_s6 + $0x364] ss:$8 sps:$4 sm:$0xff]   ;;  %v2868_v48 = vld [vmem:[%s3573_s6 + $0x360] ss:$8 sps:$4 sm:$0xff]  }
  0xb3   : > { %1927 = vmatpush1.bf16.msra.mxu0 %v2797_v63  ;;  %v2873_v49 = vld [vmem:[%s3573_s6 + $0x254] ss:$8 sps:$4 sm:$0xff]   ;;  %v2871_v51 = vld [vmem:[%s3573_s6 + $0x250] ss:$8 sps:$4 sm:$0xff]   ;;  %v2879_v53 = vld [vmem:[%s3573_s6 + $0x244] ss:$8 sps:$4 sm:$0xff]  }
  0xb4   : > { %1980 = vmatpush1.bf16.msra.mxu1 %v2798_v0  ;;  %1928 = vmatprep.subr.bf16.mxu0 %v2799_v1  ;;  %v2876_v50 = vld [vmem:[%s3573_s6 + $0x354] ss:$8 sps:$4 sm:$0xff]   ;;  %v2874_v52 = vld [vmem:[%s3573_s6 + $0x350] ss:$8 sps:$4 sm:$0xff]   ;;  %v2882_v54 = vld [vmem:[%s3573_s6 + $0x344] ss:$8 sps:$4 sm:$0xff]  }
  0xb5   : > { %1981 = vmatprep.subr.bf16.mxu1 %v2801_v2  ;;  %v2877_v55 = vld [vmem:[%s3573_s6 + $0x240] ss:$8 sps:$4 sm:$0xff]   ;;  %v2885_v57 = vld [vmem:[%s3573_s6 + $0x234] ss:$8 sps:$4 sm:$0xff]   ;;  %v2883_v59 = vld [vmem:[%s3573_s6 + $0x230] ss:$8 sps:$4 sm:$0xff]  }
  0xb6   : > { %v2880_v56 = vld [vmem:[%s3573_s6 + $0x340] ss:$8 sps:$4 sm:$0xff]   ;;  %v2888_v58 = vld [vmem:[%s3573_s6 + $0x334] ss:$8 sps:$4 sm:$0xff]   ;;  %v2886_v60 = vld [vmem:[%s3573_s6 + $0x330] ss:$8 sps:$4 sm:$0xff]  }
  0xb7   : > { %1929 = vmatpush1.bf16.msra.mxu0 %v2803_v3  ;;  %v2891_v61 = vld [vmem:[%s3573_s6 + $0x224] ss:$8 sps:$4 sm:$0xff]   ;;  %v2889_v3 = vld [vmem:[%s3573_s6 + $0x220] ss:$8 sps:$4 sm:$0xff]   ;;  %v2924_v24 = vld [vmem:[%s3573_s6 + $0x3d4] ss:$8 sps:$4 sm:$0xff]  }
  0xb8   : > { %1982 = vmatpush1.bf16.msra.mxu1 %v2804_v4  ;;  %1930 = vmatprep.subr.bf16.mxu0 %v2805_v5  ;;  %v2894_v62 = vld [vmem:[%s3573_s6 + $0x324] ss:$8 sps:$4 sm:$0xff]   ;;  %v2892_v4 = vld [vmem:[%s3573_s6 + $0x320] ss:$8 sps:$4 sm:$0xff]   ;;  %v2897_v5 = vld [vmem:[%s3573_s6 + $0x214] ss:$8 sps:$4 sm:$0xff]  }
  0xb9   : > { %1983 = vmatprep.subr.bf16.mxu1 %v2807_v6  ;;  %v2937_v63 = vld [vmem:[%s3571_s4 + $0x4c] ss:$36 sps:$4 sm:$0xff]   ;;  %v2939_v0 = vld [vmem:[%s3571_s4 + $0x54] ss:$36 sps:$4 sm:$0xff]  }
  0xba   : > { %v2941_v1 = vld [vmem:[%s3571_s4 + $0x48] ss:$36 sps:$4 sm:$0xff]   ;;  %v2942_v2 = vld [vmem:[%s3571_s4 + $0x50] ss:$36 sps:$4 sm:$0xff]  }
  0xbb   : > { %1931 = vmatpush2.bf16.msra.mxu0 %v2809_v7  ;;  %v2900_v6 = vld [vmem:[%s3573_s6 + $0x314] ss:$8 sps:$4 sm:$0xff]   ;;  %v2895_v7 = vld [vmem:[%s3573_s6 + $0x210] ss:$8 sps:$4 sm:$0xff]   ;;  %v2916_v22 = vld [vmem:[%s3573_s6 + $0x3e0] ss:$8 sps:$4 sm:$0xff]  }
  0xbc   : > { %1984 = vmatpush2.bf16.msra.mxu1 %v2810_v8  ;;  %1932 = vmatprep.subr.bf16.mxu0 %v2811_v9  ;;  %v2898_v8 = vld [vmem:[%s3573_s6 + $0x310] ss:$8 sps:$4 sm:$0xff]   ;;  %v2903_v9 = vld [vmem:[%s3573_s6 + $0x204] ss:$8 sps:$4 sm:$0xff]  }
  0xbd   : > { %1985 = vmatprep.subr.bf16.mxu1 %v2813_v10  ;;  %v2906_v10 = vld [vmem:[%s3573_s6 + $0x304] ss:$8 sps:$4 sm:$0xff]  }
  0xbf   : > { %1933 = vmatpush2.bf16.msra.mxu0 %v2815_v11  ;;  %v2901_v11 = vld [vmem:[%s3573_s6 + $0x200] ss:$8 sps:$4 sm:$0xff]  }
  0xc0   : > { %1986 = vmatpush2.bf16.msra.mxu1 %v2816_v12  ;;  %1934 = vmatprep.subr.bf16.mxu0 %v2817_v13  ;;  %v2904_v12 = vld [vmem:[%s3573_s6 + $0x300] ss:$8 sps:$4 sm:$0xff]   ;;  %v2909_v13 = vld [vmem:[%s3573_s6 + $0x2f4] ss:$8 sps:$4 sm:$0xff]  }
  0xc1   : > { %1987 = vmatprep.subr.bf16.mxu1 %v2819_v14  ;;  %v2963_v14 = vld [vmem:[%s3571_s4 + $0x14] ss:$36 sps:$4 sm:$0xff]  }
  0xc3   : > { %1935 = vmatpush2.bf16.msra.mxu0 %v2821_v15  ;;  %v2912_v15 = vld [vmem:[%s3573_s6 + $0x3f4] ss:$8 sps:$4 sm:$0xff]  }
  0xc4   : > { %1988 = vmatpush2.bf16.msra.mxu1 %v2822_v16  ;;  %1936 = vmatprep.subr.bf16.mxu0 %v2823_v17  ;;  %v2966_v16 = vld [vmem:[%s3571_s4 + $0x1c] ss:$36 sps:$4 sm:$0xff]  }
  0xc5   : > { %1989 = vmatprep.subr.bf16.mxu1 %v2825_v18  ;;  %v2907_v17 = vld [vmem:[%s3573_s6 + $0x2f0] ss:$8 sps:$4 sm:$0xff]  }
  0xc6   : > { %v2910_v18 = vld [vmem:[%s3573_s6 + $0x3f0] ss:$8 sps:$4 sm:$0xff]  }
  0xc7   : > { %1937 = vmatpush2.bf16.msra.mxu0 %v2827_v19  ;;  %v2915_v19 = vld [vmem:[%s3573_s6 + $0x2e4] ss:$8 sps:$4 sm:$0xff]  }
  0xc8   : > { %1990 = vmatpush2.bf16.msra.mxu1 %v2828_v20  ;;  %1938 = vmatprep.subr.bf16.mxu0 %v2829_v21  ;;  %v2918_v20 = vld [vmem:[%s3573_s6 + $0x3e4] ss:$8 sps:$4 sm:$0xff]   ;;  %v2913_v21 = vld [vmem:[%s3573_s6 + $0x2e0] ss:$8 sps:$4 sm:$0xff]  }
  0xc9   : > { %1991 = vmatprep.subr.bf16.mxu1 %v2831_v23  ;;  %v2921_v23 = vld [vmem:[%s3573_s6 + $0x2d4] ss:$8 sps:$4 sm:$0xff]  }
  0xcb   : > { %1939 = vmatpush2.bf16.msra.mxu0 %v2833_v25  ;;  %v2919_v25 = vld [vmem:[%s3573_s6 + $0x2d0] ss:$8 sps:$4 sm:$0xff]  }
  0xcc   : > { %1992 = vmatpush2.bf16.msra.mxu1 %v2834_v26  ;;  %1940 = vmatprep.subr.bf16.mxu0 %v2835_v27  ;;  %v2922_v26 = vld [vmem:[%s3573_s6 + $0x3d0] ss:$8 sps:$4 sm:$0xff]   ;;  %v2927_v27 = vld [vmem:[%s3573_s6 + $0x2c4] ss:$8 sps:$4 sm:$0xff]  }
  0xcd   : > { %1993 = vmatprep.subr.bf16.mxu1 %v2837_v28  ;;  %v2930_v28 = vld [vmem:[%s3573_s6 + $0x3c4] ss:$8 sps:$4 sm:$0xff]  }
  0xcf   : > { %1941 = vmatpush2.bf16.msra.mxu0 %v2839_v29  ;;  %v2925_v29 = vld [vmem:[%s3573_s6 + $0x2c0] ss:$8 sps:$4 sm:$0xff]  }
  0xd0   : > { %1994 = vmatpush2.bf16.msra.mxu1 %v2840_v30  ;;  %1942 = vmatprep.subr.bf16.mxu0 %v2841_v31  ;;  %v2928_v30 = vld [vmem:[%s3573_s6 + $0x3c0] ss:$8 sps:$4 sm:$0xff]   ;;  %v2933_v31 = vld [vmem:[%s3573_s6 + $0x2b4] ss:$8 sps:$4 sm:$0xff]  }
  0xd1   : > { %1995 = vmatprep.subr.bf16.mxu1 %v2843_v32  ;;  %v2936_v32 = vld [vmem:[%s3573_s6 + $0x3b4] ss:$8 sps:$4 sm:$0xff]  }
  0xd3   : > { %1943 = vmatpush2.bf16.msra.mxu0 %v2845_v33  ;;  %v2931_v33 = vld [vmem:[%s3573_s6 + $0x2b0] ss:$8 sps:$4 sm:$0xff]  }
  0xd4   : > { %1996 = vmatpush2.bf16.msra.mxu1 %v2846_v34  ;;  %1944 = vmatprep.subr.bf16.mxu0 %v2847_v35  ;;  %v2934_v34 = vld [vmem:[%s3573_s6 + $0x3b0] ss:$8 sps:$4 sm:$0xff]   ;;  %v2945_v35 = vld [vmem:[%s3573_s6 + $0x2a4] ss:$8 sps:$4 sm:$0xff]  }
  0xd5   : > { %1997 = vmatprep.subr.bf16.mxu1 %v2849_v36  ;;  %v2948_v36 = vld [vmem:[%s3573_s6 + $0x3a4] ss:$8 sps:$4 sm:$0xff]  }
  0xd7   : > { %1945 = vmatpush2.bf16.msra.mxu0 %v2851_v37  ;;  %v2943_v37 = vld [vmem:[%s3573_s6 + $0x2a0] ss:$8 sps:$4 sm:$0xff]  }
  0xd8   : > { %1998 = vmatpush2.bf16.msra.mxu1 %v2852_v38  ;;  %2020 = vmatprep.subr.bf16.mxu0 %v2861_v39  ;;  %v2946_v38 = vld [vmem:[%s3573_s6 + $0x3a0] ss:$8 sps:$4 sm:$0xff]   ;;  %v2951_v39 = vld [vmem:[%s3573_s6 + $0x294] ss:$8 sps:$4 sm:$0xff]  }
  0xd9   : > { %2073 = vmatprep.subr.bf16.mxu1 %v2864_v40  ;;  %v2954_v40 = vld [vmem:[%s3573_s6 + $0x394] ss:$8 sps:$4 sm:$0xff]  }
  0xda   : > { %1947 = vmatmul.mubr.bf16.vlgmr.msra.gmra.mxu0 %v2853_v41  ;;  %v2949_v41 = vld [vmem:[%s3573_s6 + $0x290] ss:$8 sps:$4 sm:$0xff]  }
  0xdb   : > { %2000 = vmatmul.mubr.bf16.vlgmr.msra.gmra.mxu1 %v2856_v42  ;;  %2021 = vmatpush1.bf16.msra.mxu0 %v2859_v43  ;;  %v2952_v42 = vld [vmem:[%s3573_s6 + $0x390] ss:$8 sps:$4 sm:$0xff]   ;;  %v2957_v43 = vld [vmem:[%s3573_s6 + $0x284] ss:$8 sps:$4 sm:$0xff]  }
  0xdc   : > { %2074 = vmatpush1.bf16.msra.mxu1 %v2862_v44  ;;  %2022 = vmatprep.subr.bf16.mxu0 %v2867_v45  ;;  %v2960_v44 = vld [vmem:[%s3573_s6 + $0x384] ss:$8 sps:$4 sm:$0xff]   ;;  %v2955_v45 = vld [vmem:[%s3573_s6 + $0x280] ss:$8 sps:$4 sm:$0xff]  }
  0xdd   : > { %2075 = vmatprep.subr.bf16.mxu1 %v2870_v46  ;;  %1956 = vmatprep.mubr.bf16.mxu0 %v2937_v63  ;;  %v2958_v46 = vld [vmem:[%s3573_s6 + $0x380] ss:$8 sps:$4 sm:$0xff]   ;;  %v2985_v63 = vld [vmem:[%s3573_s6 + $0x430] ss:$8 sps:$4 sm:$0xff]  }
  0xde   : > { %2009 = vmatprep.mubr.bf16.mxu1 %v2939_v0  ;;  %v2990_v0 = vld [vmem:[%s3573_s6 + $0x424] ss:$8 sps:$4 sm:$0xff]  }
  0xdf   : > { %2023 = vmatpush1.bf16.msra.mxu0 %v2865_v47  ;;  %v2969_v47 = vld [vmem:[%s3573_s6 + $0x474] ss:$8 sps:$4 sm:$0xff]  }
  0xe0   : > { %2076 = vmatpush1.bf16.msra.mxu1 %v2868_v48  ;;  %2024 = vmatprep.subr.bf16.mxu0 %v2873_v49  ;;  %v2961_v48 = vld [vmem:[%s3571_s4 + $0x10] ss:$36 sps:$4 sm:$0xff]   ;;  %v2964_v49 = vld [vmem:[%s3571_s4 + $0x18] ss:$36 sps:$4 sm:$0xff]  }
  0xe1   : > { %2077 = vmatprep.subr.bf16.mxu1 %v2876_v50  ;;  %v2967_v50 = vld [vmem:[%s3573_s6 + $0x470] ss:$8 sps:$4 sm:$0xff]  }
  0xe2   : > { %1957 = vmatmul.mubr.bf16.gmra.mxu0 %v2941_v1  ;;  %v2988_v1 = vld [vmem:[%s3573_s6 + $0x420] ss:$8 sps:$4 sm:$0xff]  }
  0xe3   : > { %2025 = vmatpush1.bf16.msra.mxu0 %v2871_v51  ;;  %2010 = vmatmul.mubr.bf16.gmra.mxu1 %v2942_v2  ;;  %v2972_v51 = vld [vmem:[%s3573_s6 + $0x464] ss:$8 sps:$4 sm:$0xff]   ;;  %v2993_v2 = vld [vmem:[%s3573_s6 + $0x414] ss:$8 sps:$4 sm:$0xff]  }
  0xe4   : > { %2078 = vmatpush1.bf16.msra.mxu1 %v2874_v52  ;;  %2026 = vmatprep.subr.bf16.mxu0 %v2879_v53  ;;  %v2973_v52 = vld [vmem:[%s3571_s4 + $0x5c] ss:$36 sps:$4 sm:$0xff]   ;;  %v2979_v53 = vld [vmem:[%s3571_s4 + $0x64] ss:$36 sps:$4 sm:$0xff]  }
  0xe5   : > { %2079 = vmatprep.subr.bf16.mxu1 %v2882_v54  ;;  %2052 = vmatprep.mubr.bf16.mxu0 %v2963_v14  ;;  %v2970_v54 = vld [vmem:[%s3573_s6 + $0x460] ss:$8 sps:$4 sm:$0xff]  }
  0xe6   : > { %2105 = vmatprep.mubr.bf16.mxu1 %v2966_v16 }
  0xe7   : > { %2027 = vmatpush1.bf16.msra.mxu0 %v2877_v55  ;;  %v2978_v55 = vld [vmem:[%s3573_s6 + $0x454] ss:$8 sps:$4 sm:$0xff]  }
  0xe8   : > { %2080 = vmatpush1.bf16.msra.mxu1 %v2880_v56  ;;  %2028 = vmatprep.subr.bf16.mxu0 %v2885_v57  ;;  %v2975_v56 = vld [vmem:[%s3571_s4 + $0x58] ss:$36 sps:$4 sm:$0xff]   ;;  %v2981_v57 = vld [vmem:[%s3571_s4 + $0x60] ss:$36 sps:$4 sm:$0xff]  }
  0xe9   : > { %2081 = vmatprep.subr.bf16.mxu1 %v2888_v58  ;;  %v2976_v58 = vld [vmem:[%s3573_s6 + $0x450] ss:$8 sps:$4 sm:$0xff]  }
  0xeb   : > { %2029 = vmatpush1.bf16.msra.mxu0 %v2883_v59  ;;  %v2984_v59 = vld [vmem:[%s3573_s6 + $0x444] ss:$8 sps:$4 sm:$0xff]  }
  0xec   : > { %2082 = vmatpush1.bf16.msra.mxu1 %v2886_v60  ;;  %2030 = vmatprep.subr.bf16.mxu0 %v2891_v61  ;;  %v2982_v60 = vld [vmem:[%s3573_s6 + $0x440] ss:$8 sps:$4 sm:$0xff]   ;;  %v2987_v61 = vld [vmem:[%s3573_s6 + $0x434] ss:$8 sps:$4 sm:$0xff]  }
  0xed   : > { %2083 = vmatprep.subr.bf16.mxu1 %v2894_v62  ;;  %v3088_v62 = vmov 0  }
  0xef   : > { %2031 = vmatpush1.bf16.msra.mxu0 %v2889_v3  ;;  %v2991_v3 = vld [vmem:[%s3573_s6 + $0x410] ss:$8 sps:$4 sm:$0xff]  }
  0xf0   : > { %2084 = vmatpush1.bf16.msra.mxu1 %v2892_v4  ;;  %2032 = vmatprep.subr.bf16.mxu0 %v2897_v5  ;;  %v2996_v4 = vld [vmem:[%s3573_s6 + $0x404] ss:$8 sps:$4 sm:$0xff]   ;;  %v2994_v5 = vld [vmem:[%s3573_s6 + $0x400] ss:$8 sps:$4 sm:$0xff]  }
  0xf1   : > { %2085 = vmatprep.subr.bf16.mxu1 %v2900_v6  ;;  %v2997_v6 = vld [vmem:[%s3571_s4 + $0x20] ss:$36 sps:$4 sm:$0xff]  }
  0xf3   : > { %2033 = vmatpush1.bf16.msra.mxu0 %v2895_v7  ;;  %v2998_v7 = vld [vmem:[%s3571_s4 + $0x68] ss:$36 sps:$4 sm:$0xff]  }
  0xf4   : > { %2086 = vmatpush1.bf16.msra.mxu1 %v2898_v8  ;;  %2034 = vmatprep.subr.bf16.mxu0 %v2903_v9 }
  0xf5   : > { %2087 = vmatprep.subr.bf16.mxu1 %v2906_v10 }
  0xf7   : > { %2035 = vmatpush1.bf16.msra.mxu0 %v2901_v11 }
  0xf8   : > { %2088 = vmatpush1.bf16.msra.mxu1 %v2904_v12  ;;  %2036 = vmatprep.subr.bf16.mxu0 %v2909_v13 }
  0xf9   : > { %2089 = vmatprep.subr.bf16.mxu1 %v2912_v15 }
  0xfb   : > { %2037 = vmatpush2.bf16.msra.mxu0 %v2907_v17 }
  0xfc   : > { %2090 = vmatpush2.bf16.msra.mxu1 %v2910_v18  ;;  %2038 = vmatprep.subr.bf16.mxu0 %v2915_v19 }
  0xfd   : > { %2091 = vmatprep.subr.bf16.mxu1 %v2918_v20 }
  0xff   : > { %2039 = vmatpush2.bf16.msra.mxu0 %v2913_v21 }
 0x100   : > { %2092 = vmatpush2.bf16.msra.mxu1 %v2916_v22  ;;  %2040 = vmatprep.subr.bf16.mxu0 %v2921_v23 }
 0x101   : > { %2093 = vmatprep.subr.bf16.mxu1 %v2924_v24 }
 0x103   : > { %2041 = vmatpush2.bf16.msra.mxu0 %v2919_v25 }
 0x104   : > { %2094 = vmatpush2.bf16.msra.mxu1 %v2922_v26  ;;  %2042 = vmatprep.subr.bf16.mxu0 %v2927_v27 }
 0x105   : > { %2095 = vmatprep.subr.bf16.mxu1 %v2930_v28 }
 0x107   : > { %2043 = vmatpush2.bf16.msra.mxu0 %v2925_v29 }
 0x108   : > { %2096 = vmatpush2.bf16.msra.mxu1 %v2928_v30  ;;  %2044 = vmatprep.subr.bf16.mxu0 %v2933_v31 }
 0x109   : > { %2097 = vmatprep.subr.bf16.mxu1 %v2936_v32 }
 0x10b   : > { %2045 = vmatpush2.bf16.msra.mxu0 %v2931_v33 }
 0x10c   : > { %2098 = vmatpush2.bf16.msra.mxu1 %v2934_v34  ;;  %2046 = vmatprep.subr.bf16.mxu0 %v2945_v35 }
 0x10d   : > { %2099 = vmatprep.subr.bf16.mxu1 %v2948_v36 }
 0x10f   : > { %2047 = vmatpush2.bf16.msra.mxu0 %v2943_v37 }
 0x110   : > { %2100 = vmatpush2.bf16.msra.mxu1 %v2946_v38  ;;  %2048 = vmatprep.subr.bf16.mxu0 %v2951_v39 }
 0x111   : > { %2101 = vmatprep.subr.bf16.mxu1 %v2954_v40 }
 0x113   : > { %2049 = vmatpush2.bf16.msra.mxu0 %v2949_v41 }
 0x114   : > { %2102 = vmatpush2.bf16.msra.mxu1 %v2952_v42  ;;  %2050 = vmatprep.subr.bf16.mxu0 %v2957_v43 }
 0x115   : > { %2103 = vmatprep.subr.bf16.mxu1 %v2960_v44 }
 0x117   : > { %2051 = vmatpush2.bf16.msra.mxu0 %v2955_v45 }
 0x118   : > { %2104 = vmatpush2.bf16.msra.mxu1 %v2958_v46  ;;  %2126 = vmatprep.subr.bf16.mxu0 %v2969_v47 }
 0x119   : > { %2647 = vmatprep.subr.bf16.mxu1 %v2969_v47 }
 0x11a   : > { %2053 = vmatmul.mubr.bf16.vlgmr.msra.gmra.mxu0 %v2961_v48 }
 0x11b   : > { %2106 = vmatmul.mubr.bf16.vlgmr.msra.gmra.mxu1 %v2964_v49  ;;  %2127 = vmatpush1.bf16.msra.mxu0 %v2967_v50 }
 0x11c   : > { %2655 = vmatpush1.bf16.msra.mxu1 %v2967_v50  ;;  %2128 = vmatprep.subr.bf16.mxu0 %v2972_v51 }
 0x11d   : > { %2648 = vmatprep.subr.bf16.mxu1 %v2972_v51  ;;  %2062 = vmatprep.mubr.bf16.mxu0 %v2973_v52 }
 0x11e   : > { %2115 = vmatprep.mubr.bf16.mxu1 %v2979_v53 }
 0x11f   : > { %2129 = vmatpush1.bf16.msra.mxu0 %v2970_v54 }
 0x120   : > { %2656 = vmatpush1.bf16.msra.mxu1 %v2970_v54  ;;  %2130 = vmatprep.subr.bf16.mxu0 %v2978_v55 }
 0x121   : > { %2649 = vmatprep.subr.bf16.mxu1 %v2978_v55 }
 0x122   : > { %2063 = vmatmul.mubr.bf16.gmra.mxu0 %v2975_v56 }
 0x123   : > { %2116 = vmatmul.mubr.bf16.gmra.mxu1 %v2981_v57  ;;  %2131 = vmatpush1.bf16.msra.mxu0 %v2976_v58 }
 0x124   : > { %2657 = vmatpush1.bf16.msra.mxu1 %v2976_v58  ;;  %2132 = vmatprep.subr.bf16.mxu0 %v2984_v59  ;;  %v930_v58 = vld [vmem:[#allocation2 + $0x30] sm:$0xff] }
 0x125   : > { %2650 = vmatprep.subr.bf16.mxu1 %v2984_v59  ;;  %2158 = vmatprep.mubr.bf16.mxu0 %v3088_v62 }
 0x126   : > { %2168 = vmatprep.mubr.bf16.mxu1 %v3088_v62 }
 0x127   : > { %2133 = vmatpush1.bf16.msra.mxu0 %v2982_v60 }
 0x128   : > { %2658 = vmatpush1.bf16.msra.mxu1 %v2982_v60  ;;  %2134 = vmatprep.subr.bf16.mxu0 %v2987_v61  ;;  %v934_v60 = vld [vmem:[#allocation2 + $0x8] sm:$0xff] }
 0x129   : > { %2651 = vmatprep.subr.bf16.mxu1 %v2987_v61 }
 0x12b   : > { %2135 = vmatpush1.bf16.msra.mxu0 %v2985_v63 }
 0x12c   : > { %2659 = vmatpush1.bf16.msra.mxu1 %v2985_v63  ;;  %2136 = vmatprep.subr.bf16.mxu0 %v2990_v0 }
 0x12d   : > { %2652 = vmatprep.subr.bf16.mxu1 %v2990_v0 }
 0x12f   : > { %2137 = vmatpush1.bf16.msra.mxu0 %v2988_v1 }
 0x130   : > { %2660 = vmatpush1.bf16.msra.mxu1 %v2988_v1  ;;  %2138 = vmatprep.subr.bf16.mxu0 %v2993_v2 }
 0x131   : > { %2653 = vmatprep.subr.bf16.mxu1 %v2993_v2 }
 0x133   : > { %2139 = vmatpush1.bf16.msra.mxu0 %v2991_v3 }
 0x134   : > { %2661 = vmatpush1.bf16.msra.mxu1 %v2991_v3  ;;  %2140 = vmatprep.subr.bf16.mxu0 %v2996_v4 }
 0x135   : > { %2654 = vmatprep.subr.bf16.mxu1 %v2996_v4  ;;  %v931_v4 = vld [vmem:[#allocation2] sm:$0xff] }
 0x137   : > { %2141 = vmatpush1.bf16.msra.mxu0 %v2994_v5 }
 0x138   : > { %2662 = vmatpush1.bf16.msra.mxu1 %v2994_v5 }
 0x13a   : > { %2159 = vmatmul.mubr.bf16.vlgmr.msra.gmra.mxu0 %v2997_v6  ;;  %v935_v6 = vld [vmem:[#allocation2 + $0x20] sm:$0xff] }
 0x13b   : > { %2169 = vmatmul.mubr.bf16.vlgmr.msra.gmra.mxu1 %v2998_v7 }
 0x19a   : > { %v1948_v8 = vpop.f32.mrf.mxu0 }
 0x19b   : > { %v2001_v9 = vpop.f32.mrf.mxu1 }
 0x19c   : > { %v1950_v10 = vpop.f32.mrf.mxu0  ;;  %v2002_v36 = vadd.f32 %v2001_v9, %v1948_v8 }
 0x19d   : > { %v2003_v11 = vpop.f32.mrf.mxu1 }
 0x19e   : > { %v1952_v12 = vpop.f32.mrf.mxu0  ;;  %v2004_v40 = vadd.f32 %v2003_v11, %v1950_v10 }
 0x19f   : > { %v2005_v13 = vpop.f32.mrf.mxu1 }
 0x1a0   : > { %v1954_v14 = vpop.f32.mrf.mxu0  ;;  %v2006_v44 = vadd.f32 %v2005_v13, %v1952_v12 }
 0x1a1   : > { %v2007_v16 = vpop.f32.mrf.mxu1 }
 0x1a2   : > { %v1958_v15 = vpop.f32.mrf.mxu0  ;;  %v2008_v49 = vadd.f32 %v2007_v16, %v1954_v14  ;;  %v932_v14 = vld [vmem:[#allocation2 + $0x18] sm:$0xff]  ;;  %v936_v16 = vld [vmem:[#allocation2 + $0x28] sm:$0xff] }
 0x1a3   : > { %v2011_v17 = vpop.f32.mrf.mxu1 }
 0x1a4   : > { %v1960_v18 = vpop.f32.mrf.mxu0  ;;  %v2012_v37 = vadd.f32 %v2011_v17, %v1958_v15 }
 0x1a5   : > { %v2013_v19 = vpop.f32.mrf.mxu1 }
 0x1a6   : > { %v1962_v20 = vpop.f32.mrf.mxu0  ;;  %v2014_v41 = vadd.f32 %v2013_v19, %v1960_v18 }
 0x1a7   : > { %v2015_v21 = vpop.f32.mrf.mxu1 }
 0x1a8   : > { %v1964_v22 = vpop.f32.mrf.mxu0  ;;  %v2016_v45 = vadd.f32 %v2015_v21, %v1962_v20 }
 0x1a9   : > { %v2017_v24 = vpop.f32.mrf.mxu1 }
 0x1aa   : > { %v2018_v50 = vadd.f32 %v2017_v24, %v1964_v22  ;;  %v933_v22 = vld [vmem:[#allocation2 + $0x10] sm:$0xff]  ;;  %v937_v24 = vld [vmem:[#allocation2 + $0x38] sm:$0xff] }
 0x1da   : > { %v2054_v23 = vpop.f32.mrf.mxu0 }
 0x1db   : > { %v2107_v25 = vpop.f32.mrf.mxu1  ;;  %v2055_v42 = vadd.f32 %v2054_v23, %v2002_v36 }
 0x1dc   : > { %v2056_v26 = vpop.f32.mrf.mxu0 }
 0x1dd   : > { %v2109_v27 = vpop.f32.mrf.mxu1  ;;  %v2057_v46 = vadd.f32 %v2056_v26, %v2004_v40  ;;  %v2108_v54 = vadd.f32 %v2107_v25, %v2055_v42 }
 0x1de   : > { %v2058_v28 = vpop.f32.mrf.mxu0 }
 0x1df   : > { %v2111_v29 = vpop.f32.mrf.mxu1  ;;  %v2059_v51 = vadd.f32 %v2058_v28, %v2006_v44  ;;  %v2110_v62 = vadd.f32 %v2109_v27, %v2057_v46 }
 0x1e0   : > { %v2060_v30 = vpop.f32.mrf.mxu0 }
 0x1e1   : > { %v2113_v31 = vpop.f32.mrf.mxu1  ;;  %v2061_v56 = vadd.f32 %v2060_v30, %v2008_v49  ;;  %v2112_v2 = vadd.f32 %v2111_v29, %v2059_v51 }
 0x1e2   : > { %v2064_v32 = vpop.f32.mrf.mxu0 }
 0x1e3   : > { %v2117_v33 = vpop.f32.mrf.mxu1  ;;  %v2065_v43 = vadd.f32 %v2064_v32, %v2012_v37  ;;  %v2114_v12 = vadd.f32 %v2113_v31, %v2061_v56 }
 0x1e4   : > { %v2066_v34 = vpop.f32.mrf.mxu0 }
 0x1e5   : > { %v2119_v35 = vpop.f32.mrf.mxu1  ;;  %v2067_v47 = vadd.f32 %v2066_v34, %v2014_v41  ;;  %v2118_v55 = vadd.f32 %v2117_v33, %v2065_v43 }
 0x1e6   : > { %v2068_v38 = vpop.f32.mrf.mxu0 }
 0x1e7   : > { %v2121_v39 = vpop.f32.mrf.mxu1  ;;  %v2069_v52 = vadd.f32 %v2068_v38, %v2016_v45  ;;  %v2120_v63 = vadd.f32 %v2119_v35, %v2067_v47 }
 0x1e8   : > { %v2070_v48 = vpop.f32.mrf.mxu0 }
 0x1e9   : > { %v2123_v53 = vpop.f32.mrf.mxu1  ;;  %v2071_v57 = vadd.f32 %v2070_v48, %v2018_v50  ;;  %v2122_v3 = vadd.f32 %v2121_v39, %v2069_v52 }
 0x1eb   : > { %v2124_v13 = vadd.f32 %v2123_v53, %v2071_v57 }
 0x1fa   : > { %v2160_v59 = vpop.f32.mrf.mxu0 }
 0x1fb   : > { %v2170_v61 = vpop.f32.mrf.mxu1  ;;  %v2161_v0 = vadd.f32 %v2160_v59, %v2108_v54 }
 0x1fc   : > { %v2171_v1 = vadd.f32 %v2170_v61, %v2118_v55  ;;  %v2162_v5 = vpop.f32.mrf.mxu0 }
 0x1fd   : > { %v2172_v7 = vpop.f32.mrf.mxu1  ;;  %v2179_v8 = vadd.f32 %v2161_v0, %v930_v58  ;;  %v2163_v10 = vadd.f32 %v2162_v5, %v2110_v62 }
 0x1fe   : > { %v2183_v9 = vadd.f32 %v2171_v1, %v934_v60  ;;  %v2173_v11 = vadd.f32 %v2172_v7, %v2120_v63  ;;  %v2164_v15 = vpop.f32.mrf.mxu0 }
 0x1ff   : > { %v2174_v17 = vpop.f32.mrf.mxu1  ;;  %2187 = vst [vmem:[#allocation2 + $0x30] sm:$0xff] %v2179_v8  ;;  %v2180_v18 = vadd.f32 %v2163_v10, %v931_v4  ;;  %v2165_v20 = vadd.f32 %v2164_v15, %v2112_v2 }
 0x200   : > { %2191 = vst [vmem:[#allocation2 + $0x8] sm:$0xff] %v2183_v9  ;;  %v2184_v19 = vadd.f32 %v2173_v11, %v935_v6  ;;  %v2175_v21 = vadd.f32 %v2174_v17, %v2122_v3  ;;  %v2166_v23 = vpop.f32.mrf.mxu0 }
 0x201   : > { %v2176_v25 = vpop.f32.mrf.mxu1  ;;  %2188 = vst [vmem:[#allocation2] sm:$0xff] %v2180_v18  ;;  %v2181_v26 = vadd.f32 %v2165_v20, %v932_v14  ;;  %v2167_v28 = vadd.f32 %v2166_v23, %v2114_v12 }
 0x202   : > { %2192 = vst [vmem:[#allocation2 + $0x20] sm:$0xff] %v2184_v19  ;;  %v2185_v27 = vadd.f32 %v2175_v21, %v936_v16  ;;  %v2177_v29 = vadd.f32 %v2176_v25, %v2124_v13  ;;  %2198 = sbr.rel (%p2630_p5) target bundleno = 540 (0x21c), region = 104 }
 0x203   : > { %2189 = vst [vmem:[#allocation2 + $0x18] sm:$0xff] %v2181_v26  ;;  %v2182_v30 = vadd.f32 %v2167_v28, %v933_v22 }
 0x204   : > { %2193 = vst [vmem:[#allocation2 + $0x28] sm:$0xff] %v2185_v27  ;;  %v2186_v31 = vadd.f32 %v2177_v29, %v937_v24 }
 0x205   : > { %2190 = vst [vmem:[#allocation2 + $0x10] sm:$0xff] %v2182_v30 }
 0x206   : > { %2194 = vst [vmem:[#allocation2 + $0x38] sm:$0xff] %v2186_v31 }
 0x207   : > { %v2209_v32 = vlaneseq  ;;  %v2207_v34 = vld [vmem:[%s913_s29] sm:$0x3]  ;;  %v2199_v35 = vld [vmem:[#allocation2 + $0x30] sm:$0xff]  ;;  %v2203_v41 = vld [vmem:[#allocation2 + $0x8] sm:$0xff] }
 0x208   : > { %v2200_v36 = vld [vmem:[#allocation2] sm:$0xff] }
 0x209   : > { %v2210_v33 = vshrl.u32 %v2209_v32, 7  ;;  %v2204_v44 = vld [vmem:[#allocation2 + $0x20] sm:$0xff] }
 0x20a   : > { %v2201_v39 = vld [vmem:[#allocation2 + $0x18] sm:$0xff] }
 0x20b   : > { %v2211_v37 = vsub.s32 0, %v2210_v33  ;;  %v2215_v38 = vsub.s32 1, %v2210_v33  ;;  %v2205_v45 = vld [vmem:[#allocation2 + $0x28] sm:$0xff] }
 0x20c   : > { %v2202_v40 = vld [vmem:[#allocation2 + $0x10] sm:$0xff] }
 0x20d   : > { %v2212_v42 = vrot.slane %v2207_v34, %v2211_v37  ;;  %v2216_v43 = vrot.slane %v2207_v34, %v2215_v38  ;;  %v2206_v46 = vld [vmem:[#allocation2 + $0x38] sm:$0xff] }
 0x20f   : > { %v2219_v47 = vadd.f32 %v2212_v42, %v2199_v35  ;;  %v2220_v48 = vadd.f32 %v2216_v43, %v2200_v36  ;;  %v2221_v49 = vadd.f32 %v2212_v42, %v2201_v39  ;;  %v2222_v50 = vadd.f32 %v2216_v43, %v2202_v40 }
 0x210   : > { %v2223_v51 = vadd.f32 %v2212_v42, %v2203_v41  ;;  %v2224_v52 = vadd.f32 %v2216_v43, %v2204_v44  ;;  %v2225_v53 = vadd.f32 %v2212_v42, %v2205_v45  ;;  %v2226_v54 = vadd.f32 %v2216_v43, %v2206_v46 }
 0x211   : > { %vm2227_vm0 = vcmp.ge.f32.partialorder %v2219_v47, 0.0  ;;  %vm2228_vm1 = vcmp.ge.f32.partialorder %v2220_v48, 0.0  ;;  %v2235_v55 = vmul.f32 0.2, %v2219_v47  ;;  %v2236_v56 = vmul.f32 0.2, %v2220_v48 }
 0x212   : > { %vm2229_vm2 = vcmp.ge.f32.partialorder %v2221_v49, 0.0  ;;  %vm2230_vm3 = vcmp.ge.f32.partialorder %v2222_v50, 0.0  ;;  %v2237_v57 = vmul.f32 0.2, %v2221_v49  ;;  %v2238_v58 = vmul.f32 0.2, %v2222_v50 }
 0x213   : > { %v2243_v59 = vsel %vm2227_vm0, %v2219_v47, %v2235_v55  ;;  %v2244_v60 = vsel %vm2228_vm1, %v2220_v48, %v2236_v56  ;;  %vm2231_vm4 = vcmp.ge.f32.partialorder %v2223_v51, 0.0  ;;  %vm2232_vm5 = vcmp.ge.f32.partialorder %v2224_v52, 0.0 }
 0x214   : > { %v2642_v61 = vpack.c.bf16 %v2244_v60, %v2243_v59  ;;  %v2245_v62 = vsel %vm2229_vm2, %v2221_v49, %v2237_v57  ;;  %v2246_v63 = vsel %vm2230_vm3, %v2222_v50, %v2238_v58  ;;  %v2239_v0 = vmul.f32 0.2, %v2223_v51 }
 0x215   : > { %v2643_v1 = vpack.c.bf16 %v2246_v63, %v2245_v62  ;;  %v2240_v2 = vmul.f32 0.2, %v2224_v52  ;;  %vm2233_vm6 = vcmp.ge.f32.partialorder %v2225_v53, 0.0  ;;  %vm2234_vm7 = vcmp.ge.f32.partialorder %v2226_v54, 0.0 }
 0x216   : > { %2275 = vst [vmem:[%s3575_s1] sm:$0xff] %v2642_v61  ;;  %v2247_v3 = vsel %vm2231_vm4, %v2223_v51, %v2239_v0  ;;  %v2241_v4 = vmul.f32 0.2, %v2225_v53  ;;  %v2242_v5 = vmul.f32 0.2, %v2226_v54 }
 0x217   : > { %2276 = vst [vmem:[%s3575_s1 + $0x8] sm:$0xff] %v2643_v1  ;;  %v2248_v6 = vsel %vm2232_vm5, %v2224_v52, %v2240_v2 }
 0x218   : > { %v2644_v7 = vpack.c.bf16 %v2248_v6, %v2247_v3  ;;  %v2249_v8 = vsel %vm2233_vm6, %v2225_v53, %v2241_v4  ;;  %v2250_v9 = vsel %vm2234_vm7, %v2226_v54, %v2242_v5 }
 0x219   : > { %v2645_v10 = vpack.c.bf16 %v2250_v9, %v2249_v8 }
 0x21a   : > { %2277 = vst [vmem:[%s3575_s1 + $0x10] sm:$0xff] %v2644_v7 }
 0x21b   : > { %2278 = vst [vmem:[%s3575_s1 + $0x18] sm:$0xff] %v2645_v10 }
 0x21c PF: > { %2285 = sbr.rel (!%p3203_p12) target bundleno = 548 (0x224), region = 108  ;;  %s2646_s16 = sshll.u32 (%p3203_p12), %s3073_s19, 3 }
 0x21d   : > { %v2326_v11 = vld [vmem:[%s3575_s1] sm:$0xff] (%p3203_p12)  ;;  %s2291_s5 = scalar_lea.vmem (%p3203_p12), %s3796_s3, %s2646_s16 }
 0x21e   : > { %v2328_v12 = vld [vmem:[%s3575_s1 + $0x8] sm:$0xff] (%p3203_p12)  ;;  %2327 = vst [vmem:[%s2291_s5] sm:$0xff] (%p3203_p12), %v2326_v11 }
 0x21f   : > { %2329 = vst [vmem:[%s2291_s5 + $0x10] sm:$0xff] (%p3203_p12), %v2328_v12 }
 0x221   : > { %v2330_v13 = vld [vmem:[%s3575_s1 + $0x10] sm:$0xff] }
 0x222   : > { %v2332_v14 = vld [vmem:[%s3575_s1 + $0x18] sm:$0xff]  ;;  %2331 = vst [vmem:[%s2291_s5 + $0x20] sm:$0xff] %v2330_v13 }
 0x223   : > { %2333 = vst [vmem:[%s2291_s5 + $0x30] sm:$0xff] %v2332_v14 }
 0x224 PF: > { %s13_s22 = sadd.s32 1, %s3085_s22   ;;  %s3806_s10 = sld [smem:[#allocation6_spill]] }
 0x225   : > { %p10_p6 = scmp.ge.s32.totalorder %s13_s22, 6   ;;  %s3807_s12 = smov %s3049_s13 }
 0x226   : > { %s3808_s13 = smov %s3201_s9  ;;  %s3809_s14 = smov %s3057_s15 }
 0x227   : > { %s3810_s15 = smov %s3198_s8  ;;  %s3811_s16 = smov %s3065_s17 }
 0x228   : > { %s3812_s17 = smov %s3184_s30  ;;  %s3813_s18 = smov %s3077_s20 }
 0x229   : > { %s3814_s19 = smov %s3081_s21  ;;  %s3815_s20 = smov %s3818_s24 }
 0x22a   : > { %s3816_s21 = smov %s3806_s10  ;;  %12 = sbr.rel (!%p10_p6) target bundleno = 9 (0x9), region = 194 }

// kernel: discriminator_forward.9
= control target key start
LH: loop header
LB: loop body
LE: loop exit
PB: predicated region body
PF: predicated region fallthrough
CT: control target
= control target key end

     0   :  { %s1713_s12 = smov 0   ;;  %s1715_s13 = smov 0   ;;  %s1874_s0 = inlined_call_operand.vmem [shape: bf16[16,4608], index: 0, kind: input, shape index: {}]   ;;  %s1875_s1 = inlined_call_operand.vmem [shape: bf16[4608,128], index: 1, kind: input, shape index: {}]   ;;  %s1876_s2 = inlined_call_operand.vmem [shape: f32[1,128], index: 2, kind: input, shape index: {}]   ;;  %s1877_s3 = inlined_call_operand.vmem [shape: f32[16,128], index: 3, kind: output, shape index: {}]  }
   0x1   :  { %s1717_s14 = smov 0   ;;  %s1719_s15 = smov 0  }
   0x2   :  { %s1721_s16 = smov 0  }
   0x3 LB: > { %s25_s17 = sadd.s32 1, %s1684_s15  ;;  %p48_p1 = scmp.ne.s32.totalorder %s1676_s13, %s1672_s12  ;;  %s1688_s16 = sphi %s1721_s16, %s13_s16   ;;  %s1684_s15 = sphi %s1719_s15, %s1881_s15   ;;  %s1680_s14 = sphi %s1717_s14, %s1880_s14   ;;  %s1676_s13 = sphi %s1715_s13, %s1879_s13   ;;  %s1672_s12 = sphi %s1713_s12, %s1878_s12  }
   0x4   : > { %p26_p0 = scmp.ge.s32.totalorder %s25_s17, 4  ;;  %p49_p2 = scmp.eq.s32.totalorder %s1688_s16, 0 }
   0x5   : > { %s41_s19 = sadd.s32 1, %s1676_s13  ;;  %p1298_p5 = scmp.ge.s32.totalorder %s1688_s16, 4 }
   0x6   : > { %s1883_s17 = smov (%p26_p0, %s25_s17), 0  ;;  %p50_p3 = por %p49_p2, %p48_p1 }
   0x7   : > { %s37_s18 = ssub.s32 %s1684_s15, %s1883_s17  ;;  %162 = sbr.rel (%p1298_p5) target bundleno = 22 (0x16), region = 20 }
   0x8   : > { %p39_p4 = scmp.eq.s32.totalorder %s37_s18, 0 }
   0xa   : > { %s1748_s20 = scalar_select %p39_p4, %s1676_s13, %s41_s19  }
   0xc   : > { %165 = sbr.rel (!%p50_p3) target bundleno = 22 (0x16), region = 24  ;;  %s167_s21 = sand.u32 (%p50_p3), 1, %s1676_s13  }
   0xd   : > { %s1394_s22 = smul.u32 (%p50_p3), 36, %s1684_s15 }
   0xe   : > { %s1512_s23 = smul.u32 (%p50_p3), 72, %s167_s21 }
   0xf   : > { %s175_s26 = scalar_lea.vmem (%p50_p3), %s1874_s0, %s1394_s22 }
  0x10   : > { %v190_v0 = vld [vmem:[%s175_s26] sm:$0xff] (%p50_p3)  ;;  %v192_v1 = vld [vmem:[%s175_s26 + $0x8] sm:$0xff] (%p50_p3)  ;;  %v194_v2 = vld [vmem:[%s175_s26 + $0x10] sm:$0xff] (%p50_p3)  ;;  %s169_s27 = scalar_lea.vmem (%p50_p3), [#allocation3], %s1512_s23 }
  0x11   : > { %191 = vst [vmem:[%s169_s27] sm:$0xff] %v190_v0  ;;  %193 = vst [vmem:[%s169_s27 + $0x8] sm:$0xff] %v192_v1  ;;  %v196_v3 = vld [vmem:[%s175_s26 + $0x18] sm:$0xff]  ;;  %v198_v4 = vld [vmem:[%s175_s26 + $0x90] sm:$0xff] }
  0x12   : > { %195 = vst [vmem:[%s169_s27 + $0x10] sm:$0xff] %v194_v2  ;;  %v200_v5 = vld [vmem:[%s175_s26 + $0x98] sm:$0xff]  ;;  %197 = vst [vmem:[%s169_s27 + $0x18] sm:$0xff] %v196_v3  ;;  %v202_v6 = vld [vmem:[%s175_s26 + $0xa0] sm:$0xff] }
  0x13   : > { %199 = vst [vmem:[%s169_s27 + $0x24] sm:$0xff] %v198_v4  ;;  %201 = vst [vmem:[%s169_s27 + $0x2c] sm:$0xff] %v200_v5  ;;  %v204_v7 = vld [vmem:[%s175_s26 + $0xa8] sm:$0xff]  ;;  %v1300_v8 = vld [vmem:[%s175_s26 + $0x20] sm:$0xf] }
  0x14   : > { %203 = vst [vmem:[%s169_s27 + $0x34] sm:$0xff] %v202_v6  ;;  %205 = vst [vmem:[%s169_s27 + $0x3c] sm:$0xff] %v204_v7  ;;  %v1302_v9 = vld [vmem:[%s175_s26 + $0xb0] sm:$0xf] }
  0x15   : > { %1301 = vst [vmem:[%s169_s27 + $0x20] sm:$0xf] %v1300_v8  ;;  %1303 = vst [vmem:[%s169_s27 + $0x44] sm:$0xf] %v1302_v9 }
  0x16 PF: > { %p1304_p6 = scmp.ge.s32.totalorder %s1688_s16, 1  ;;  %p234_p7 = scmp.lt.s32.totalorder %s1688_s16, 5 }
  0x18   : > { %p235_p8 = pnand %p1304_p6, %p234_p7 }
  0x19   : > { %s241_s28 = sand.u32 (!%p235_p8), 1, %s1672_s12   ;;  %s280_s29 = smul.u32 (!%p235_p8), 144, %s1680_s14 }
  0x1a   : > { %238 = sbr.rel (%p235_p8) target bundleno = 382 (0x17e), region = 54  ;;  %p1306_p10 = scmp.ne.s32.totalorder (!%p235_p8), %s1680_s14, 0 }
  0x1b   : > { %s1513_s30 = smul.u32 (!%p235_p8), 72, %s241_s28  ;;  %p281_p9 = scmp.lt.s32.totalorder (!%p235_p8), %s280_s29, 575 }
  0x1d   : > { %s1765_s8 = scalar_lea.vmem (!%p235_p8), [#allocation3], %s1513_s30 }
  0x1f   : > { %s1885_s29 = smov (!%p281_p9, %s280_s29), 575  ;;  %305 = sbr.rel (%p1306_p10) target bundleno = 38 (0x26), region = 62 }
  0x20   : > { %s1305_s4 = sshll.u32 %s1885_s29, 2 }
  0x21   : > { %s1763_s7 = scalar_lea.vmem %s1875_s1, %s1305_s4 }
  0x24   : > { %v1690_v10 = vmov 0.0  }
  0x25   : > { %306 = vst [vmem:[#allocation2] sm:$0xff] %v1690_v10  ;;  %307 = vst [vmem:[#allocation2 + $0x8] sm:$0xff] %v1690_v10 }
  0x26 PF: > { %v1557_v11 = vld [vmem:[%s1763_s7 + $0x78] sm:$0xff]   ;;  %v1561_v15 = vld [vmem:[%s1763_s7 + $0x70] sm:$0xff]   ;;  %v1565_v19 = vld [vmem:[%s1763_s7 + $0x68] sm:$0xff]   ;;  %vm1692_vm0 = vmmov 0   ;;  %p1388_p11 = scmp.ne.s32.totalorder %s1680_s14, 3 }
  0x27   : > { %v1558_v12 = vld [vmem:[%s1763_s7 + $0xf8] sm:$0xff]   ;;  %1395 = vmatprep.subr.bf16.mxu0 %v1557_v11  ;;  %v1562_v16 = vld [vmem:[%s1763_s7 + $0xf0] sm:$0xff]   ;;  %v1566_v20 = vld [vmem:[%s1763_s7 + $0xe8] sm:$0xff]  }
  0x28   : > { %v1559_v13 = vld [vmem:[%s1763_s7 + $0x38] sm:$0xff]   ;;  %1417 = vmatprep.subr.bf16.mxu1 %v1558_v12  ;;  %v1563_v17 = vld [vmem:[%s1763_s7 + $0x30] sm:$0xff]   ;;  %v1567_v21 = vld [vmem:[%s1763_s7 + $0x28] sm:$0xff]  }
  0x29   : > { %v1560_v14 = vld [vmem:[%s1763_s7 + $0xb8] sm:$0xff]   ;;  %1396 = vmatpush3.bf16.msra.mxu0 %v1559_v13  ;;  %v1564_v18 = vld [vmem:[%s1763_s7 + $0xb0] sm:$0xff]   ;;  %v1568_v22 = vld [vmem:[%s1763_s7 + $0xa8] sm:$0xff]  }
  0x2a   : > { %1418 = vmatpush3.bf16.msra.mxu1 %v1560_v14  ;;  %1397 = vmatprep.subr.bf16.mxu0 %v1561_v15  ;;  %v1569_v23 = vld [vmem:[%s1763_s7 + $0x60] sm:$0xff]   ;;  %v1573_v27 = vld [vmem:[%s1763_s7 + $0x58] sm:$0xff]   ;;  %v1577_v31 = vld [vmem:[%s1763_s7 + $0x50] sm:$0xff]  }
  0x2b   : > { %1419 = vmatprep.subr.bf16.mxu1 %v1562_v16  ;;  %v1570_v24 = vld [vmem:[%s1763_s7 + $0xe0] sm:$0xff]   ;;  %v1574_v28 = vld [vmem:[%s1763_s7 + $0xd8] sm:$0xff]   ;;  %v1578_v32 = vld [vmem:[%s1763_s7 + $0xd0] sm:$0xff]  }
  0x2c   : > { %v1571_v25 = vld [vmem:[%s1763_s7 + $0x20] sm:$0xff]   ;;  %v1575_v29 = vld [vmem:[%s1763_s7 + $0x18] sm:$0xff]   ;;  %v1579_v33 = vld [vmem:[%s1763_s7 + $0x10] sm:$0xff]  }
  0x2d   : > { %1398 = vmatpush3.bf16.msra.mxu0 %v1563_v17  ;;  %v1572_v26 = vld [vmem:[%s1763_s7 + $0xa0] sm:$0xff]   ;;  %v1576_v30 = vld [vmem:[%s1763_s7 + $0x98] sm:$0xff]   ;;  %v1580_v34 = vld [vmem:[%s1763_s7 + $0x90] sm:$0xff]   ;;  %v1691_v17 = vmov 0.0  }
  0x2e   : > { %1420 = vmatpush3.bf16.msra.mxu1 %v1564_v18  ;;  %1399 = vmatprep.subr.bf16.mxu0 %v1565_v19  ;;  %v1581_v35 = vld [vmem:[%s1763_s7 + $0x48] sm:$0xff]   ;;  %v1585_v39 = vld [vmem:[%s1763_s7 + $0x40] sm:$0xff]   ;;  %v1589_v43 = vld [vmem:[%s1765_s8] ss:$36 sps:$4 sm:$0xff]  }
  0x2f   : > { %1421 = vmatprep.subr.bf16.mxu1 %v1566_v20  ;;  %v1582_v36 = vld [vmem:[%s1763_s7 + $0xc8] sm:$0xff]   ;;  %v1586_v40 = vld [vmem:[%s1763_s7 + $0xc0] sm:$0xff]   ;;  %v1595_v47 = vld [vmem:[%s1763_s7 + $0x178] sm:$0xff]  }
  0x30   : > { %v1583_v37 = vld [vmem:[%s1763_s7 + $0x8] sm:$0xff]   ;;  %v1587_v41 = vld [vmem:[%s1763_s7] sm:$0xff]   ;;  %v1596_v48 = vld [vmem:[%s1763_s7 + $0x138] sm:$0xff]  }
  0x31   : > { %1400 = vmatpush3.bf16.msra.mxu0 %v1567_v21  ;;  %v1584_v38 = vld [vmem:[%s1763_s7 + $0x88] sm:$0xff]   ;;  %v1588_v42 = vld [vmem:[%s1763_s7 + $0x80] sm:$0xff]   ;;  %v1597_v49 = vld [vmem:[%s1763_s7 + $0x1f8] sm:$0xff]  }
  0x32   : > { %1422 = vmatpush3.bf16.msra.mxu1 %v1568_v22  ;;  %1401 = vmatprep.subr.bf16.mxu0 %v1569_v23  ;;  %v1591_v44 = vld [vmem:[%s1765_s8 + $0x4] ss:$36 sps:$4 sm:$0xff]   ;;  %v1594_v46 = vld [vmem:[%s1765_s8 + $0xc] ss:$36 sps:$4 sm:$0xff]   ;;  %v1628_v15 = vld [vmem:[%s1765_s8 + $0x14] ss:$36 sps:$4 sm:$0xff]  }
  0x33   : > { %1423 = vmatprep.subr.bf16.mxu1 %v1570_v24  ;;  %v1592_v45 = vld [vmem:[%s1765_s8 + $0x8] ss:$36 sps:$4 sm:$0xff]   ;;  %974 = vmatprep.mubr.bf16.mxu0 %v1591_v44  ;;  %v1599_v51 = vld [vmem:[%s1763_s7 + $0x170] sm:$0xff]   ;;  %v1603_v55 = vld [vmem:[%s1763_s7 + $0x168] sm:$0xff]  }
  0x34   : > { %1015 = vmatprep.mubr.bf16.mxu1 %v1594_v46  ;;  %v1598_v50 = vld [vmem:[%s1763_s7 + $0x1b8] sm:$0xff]   ;;  %v1600_v52 = vld [vmem:[%s1763_s7 + $0x130] sm:$0xff]   ;;  %v1604_v56 = vld [vmem:[%s1763_s7 + $0x128] sm:$0xff]  }
  0x35   : > { %1402 = vmatpush3.bf16.msra.mxu0 %v1571_v25  ;;  %v1601_v53 = vld [vmem:[%s1763_s7 + $0x1f0] sm:$0xff]   ;;  %v1605_v57 = vld [vmem:[%s1763_s7 + $0x1e8] sm:$0xff]   ;;  %v1607_v59 = vld [vmem:[%s1763_s7 + $0x160] sm:$0xff]  }
  0x36   : > { %1424 = vmatpush3.bf16.msra.mxu1 %v1572_v26  ;;  %1403 = vmatprep.subr.bf16.mxu0 %v1573_v27  ;;  %v1602_v54 = vld [vmem:[%s1763_s7 + $0x1b0] sm:$0xff]   ;;  %v1606_v58 = vld [vmem:[%s1763_s7 + $0x1a8] sm:$0xff]   ;;  %v1608_v60 = vld [vmem:[%s1763_s7 + $0x120] sm:$0xff]  }
  0x37   : > { %1425 = vmatprep.subr.bf16.mxu1 %v1574_v28  ;;  %v1609_v61 = vld [vmem:[%s1763_s7 + $0x1e0] sm:$0xff]   ;;  %v1611_v63 = vld [vmem:[%s1763_s7 + $0x158] sm:$0xff]   ;;  %v1615_v3 = vld [vmem:[%s1763_s7 + $0x150] sm:$0xff]  }
  0x38   : > { %v1610_v62 = vld [vmem:[%s1763_s7 + $0x1a0] sm:$0xff]   ;;  %v1612_v0 = vld [vmem:[%s1763_s7 + $0x118] sm:$0xff]   ;;  %v1616_v4 = vld [vmem:[%s1763_s7 + $0x110] sm:$0xff]  }
  0x39   : > { %1404 = vmatpush3.bf16.msra.mxu0 %v1575_v29  ;;  %v1613_v1 = vld [vmem:[%s1763_s7 + $0x1d8] sm:$0xff]   ;;  %v1617_v5 = vld [vmem:[%s1763_s7 + $0x1d0] sm:$0xff]   ;;  %v1619_v7 = vld [vmem:[%s1763_s7 + $0x148] sm:$0xff]  }
  0x3a   : > { %1426 = vmatpush3.bf16.msra.mxu1 %v1576_v30  ;;  %1405 = vmatprep.subr.bf16.mxu0 %v1577_v31  ;;  %v1614_v2 = vld [vmem:[%s1763_s7 + $0x198] sm:$0xff]   ;;  %v1618_v6 = vld [vmem:[%s1763_s7 + $0x190] sm:$0xff]   ;;  %v1620_v8 = vld [vmem:[%s1763_s7 + $0x108] sm:$0xff]  }
  0x3b   : > { %1427 = vmatprep.subr.bf16.mxu1 %v1578_v32  ;;  %v1621_v9 = vld [vmem:[%s1763_s7 + $0x1c8] sm:$0xff]   ;;  %v1623_v11 = vld [vmem:[%s1763_s7 + $0x140] sm:$0xff]   ;;  %v1633_v20 = vld [vmem:[%s1763_s7 + $0x238] sm:$0xff]  }
  0x3c   : > { %v1622_v10 = vld [vmem:[%s1763_s7 + $0x188] sm:$0xff]   ;;  %v1624_v12 = vld [vmem:[%s1763_s7 + $0x100] sm:$0xff]   ;;  %v1634_v21 = vld [vmem:[%s1763_s7 + $0x230] sm:$0xff]  }
  0x3d   : > { %1406 = vmatpush3.bf16.msra.mxu0 %v1579_v33  ;;  %v1625_v13 = vld [vmem:[%s1763_s7 + $0x1c0] sm:$0xff]   ;;  %v1630_v18 = vld [vmem:[%s1765_s8 + $0x18] ss:$36 sps:$4 sm:$0xff]   ;;  %v1637_v24 = vld [vmem:[%s1763_s7 + $0x218] sm:$0xff]  }
  0x3e   : > { %1428 = vmatpush3.bf16.msra.mxu1 %v1580_v34  ;;  %1407 = vmatprep.subr.bf16.mxu0 %v1581_v35  ;;  %v1626_v14 = vld [vmem:[%s1765_s8 + $0x10] ss:$36 sps:$4 sm:$0xff]   ;;  %v1632_v19 = vld [vmem:[%s1765_s8 + $0x1c] ss:$36 sps:$4 sm:$0xff]  }
  0x3f   : > { %1429 = vmatprep.subr.bf16.mxu1 %v1582_v36  ;;  %v1629_v16 = vld [vmem:[%s1763_s7 + $0x180] sm:$0xff]   ;;  %v1635_v22 = vld [vmem:[%s1763_s7 + $0x228] sm:$0xff]   ;;  %v1638_v25 = vld [vmem:[%s1763_s7 + $0x210] sm:$0xff]  }
  0x40   : > { %v1636_v23 = vld [vmem:[%s1763_s7 + $0x220] sm:$0xff]   ;;  %v1639_v26 = vld [vmem:[%s1763_s7 + $0x208] sm:$0xff]   ;;  %v1641_v28 = vld [vmem:[%s1765_s8 + $0x20] ss:$36 sps:$4 sm:$0xff]  }
  0x41   : > { %1408 = vmatpush3.bf16.msra.mxu0 %v1583_v37  ;;  %v1640_v27 = vld [vmem:[%s1763_s7 + $0x200] sm:$0xff]  }
  0x42   : > { %1430 = vmatpush3.bf16.msra.mxu1 %v1584_v38  ;;  %1409 = vmatprep.subr.bf16.mxu0 %v1585_v39 }
  0x43   : > { %1431 = vmatprep.subr.bf16.mxu1 %v1586_v40 }
  0x45   : > { %1410 = vmatpush3.bf16.msra.mxu0 %v1587_v41 }
  0x46   : > { %1432 = vmatpush3.bf16.msra.mxu1 %v1588_v42  ;;  %1439 = vmatprep.subr.bf16.mxu0 %v1595_v47 }
  0x47   : > { %1461 = vmatprep.subr.bf16.mxu1 %v1597_v49 }
  0x48   : > { %975 = vmatmul.mubr.bf16.vlgmr.msra.gmra.mxu0 %v1589_v43 }
  0x49   : > { %1016 = vmatmul.mubr.bf16.vlgmr.msra.gmra.mxu1 %v1592_v45  ;;  %1440 = vmatpush3.bf16.msra.mxu0 %v1596_v48 }
  0x4a   : > { %1462 = vmatpush3.bf16.msra.mxu1 %v1598_v50  ;;  %1441 = vmatprep.subr.bf16.mxu0 %v1599_v51 }
  0x4b   : > { %1463 = vmatprep.subr.bf16.mxu1 %v1601_v53  ;;  %1056 = vmatprep.mubr.bf16.mxu0 %v1628_v15 }
  0x4c   : > { %1097 = vmatprep.mubr.bf16.mxu1 %v1632_v19 }
  0x4d   : > { %1442 = vmatpush3.bf16.msra.mxu0 %v1600_v52 }
  0x4e   : > { %1464 = vmatpush3.bf16.msra.mxu1 %v1602_v54  ;;  %1443 = vmatprep.subr.bf16.mxu0 %v1603_v55 }
  0x4f   : > { %1465 = vmatprep.subr.bf16.mxu1 %v1605_v57 }
  0x51   : > { %1444 = vmatpush3.bf16.msra.mxu0 %v1604_v56 }
  0x52   : > { %1466 = vmatpush3.bf16.msra.mxu1 %v1606_v58  ;;  %1445 = vmatprep.subr.bf16.mxu0 %v1607_v59  ;;  %v308_v58 = vld [vmem:[#allocation2] sm:$0xff] }
  0x53   : > { %1467 = vmatprep.subr.bf16.mxu1 %v1609_v61 }
  0x55   : > { %1446 = vmatpush3.bf16.msra.mxu0 %v1608_v60 }
  0x56   : > { %1468 = vmatpush3.bf16.msra.mxu1 %v1610_v62  ;;  %1447 = vmatprep.subr.bf16.mxu0 %v1611_v63 }
  0x57   : > { %1469 = vmatprep.subr.bf16.mxu1 %v1613_v1 }
  0x59   : > { %1448 = vmatpush3.bf16.msra.mxu0 %v1612_v0  ;;  %v309_v0 = vld [vmem:[#allocation2 + $0x8] sm:$0xff] }
  0x5a   : > { %1470 = vmatpush3.bf16.msra.mxu1 %v1614_v2  ;;  %1449 = vmatprep.subr.bf16.mxu0 %v1615_v3 }
  0x5b   : > { %1471 = vmatprep.subr.bf16.mxu1 %v1617_v5 }
  0x5d   : > { %1450 = vmatpush3.bf16.msra.mxu0 %v1616_v4 }
  0x5e   : > { %1472 = vmatpush3.bf16.msra.mxu1 %v1618_v6  ;;  %1451 = vmatprep.subr.bf16.mxu0 %v1619_v7 }
  0x5f   : > { %1473 = vmatprep.subr.bf16.mxu1 %v1621_v9 }
  0x61   : > { %1452 = vmatpush3.bf16.msra.mxu0 %v1620_v8 }
  0x62   : > { %1474 = vmatpush3.bf16.msra.mxu1 %v1622_v10  ;;  %1453 = vmatprep.subr.bf16.mxu0 %v1623_v11 }
  0x63   : > { %1475 = vmatprep.subr.bf16.mxu1 %v1625_v13 }
  0x65   : > { %1454 = vmatpush3.bf16.msra.mxu0 %v1624_v12 }
  0x66   : > { %1492 = vmatprep.subr.bf16.mxu0 %v1691_v17  ;;  %1476 = vmatpush3.bf16.msra.mxu1 %v1629_v16 }
  0x68   : > { %1057 = vmatmul.mubr.bf16.vlgmr.msra.gmra.mxu0 %v1626_v14 }
  0x69   : > { %1508 = vmatprep.mubr.msk.bf16.mxu0 %vm1692_vm0, %v1691_v17  ;;  %1493 = vmatpush3.bf16.msra.mxu0 %v1633_v20 }
  0x6a   : > { %1098 = vmatmul.mubr.bf16.vlgmr.msra.gmra.mxu1 %v1630_v18  ;;  %1494 = vmatprep.subr.bf16.mxu0 %v1691_v17 }
  0x6d   : > { %1495 = vmatpush3.bf16.msra.mxu0 %v1634_v21 }
  0x6e   : > { %1496 = vmatprep.subr.bf16.mxu0 %v1691_v17 }
  0x71   : > { %1497 = vmatpush3.bf16.msra.mxu0 %v1635_v22 }
  0x72   : > { %1498 = vmatprep.subr.bf16.mxu0 %v1691_v17 }
  0x75   : > { %1499 = vmatpush3.bf16.msra.mxu0 %v1636_v23 }
  0x76   : > { %1500 = vmatprep.subr.bf16.mxu0 %v1691_v17 }
  0x79   : > { %1501 = vmatpush3.bf16.msra.mxu0 %v1637_v24 }
  0x7a   : > { %1502 = vmatprep.subr.bf16.mxu0 %v1691_v17 }
  0x7d   : > { %1503 = vmatpush3.bf16.msra.mxu0 %v1638_v25 }
  0x7e   : > { %1504 = vmatprep.subr.bf16.mxu0 %v1691_v17 }
  0x81   : > { %1505 = vmatpush3.bf16.msra.mxu0 %v1639_v26 }
  0x82   : > { %1506 = vmatprep.subr.bf16.mxu0 %v1691_v17 }
  0x85   : > { %1507 = vmatpush3.bf16.msra.mxu0 %v1640_v27 }
  0x88   : > { %1509 = vmatmul.mubr.bf16.vlgmr.msra.gmra.mxu0 %v1641_v28 }
 0x108   : > { %v1411_v29 = vpop.f32.mrf.mxu0 }
 0x109   : > { %v1433_v30 = vpop.f32.mrf.mxu1 }
 0x10a   : > { %v1412_v31 = vpop.f32.mrf.mxu0 }
 0x10b   : > { %v1434_v32 = vpop.f32.mrf.mxu1  ;;  %v1413_v42 = vadd.f32 %v1412_v31, %v1411_v29 }
 0x10c   : > { %v1414_v33 = vpop.f32.mrf.mxu0  ;;  %v1435_v43 = vadd.f32 %v1434_v32, %v1433_v30 }
 0x10d   : > { %v1436_v34 = vpop.f32.mrf.mxu1 }
 0x10e   : > { %v1415_v35 = vpop.f32.mrf.mxu0  ;;  %v1018_v47 = vadd.f32 %v1435_v43, %v1413_v42 }
 0x10f   : > { %v1437_v37 = vpop.f32.mrf.mxu1  ;;  %v1416_v48 = vadd.f32 %v1415_v35, %v1414_v33 }
 0x110   : > { %v1438_v49 = vadd.f32 %v1437_v37, %v1436_v34 }
 0x112   : > { %v1021_v54 = vadd.f32 %v1438_v49, %v1416_v48 }
 0x128   : > { %v1455_v36 = vpop.f32.mrf.mxu0 }
 0x12a   : > { %v1456_v38 = vpop.f32.mrf.mxu0  ;;  %v1477_v39 = vpop.f32.mrf.mxu1 }
 0x12b   : > { %v1457_v44 = vadd.f32 %v1456_v38, %v1455_v36 }
 0x12c   : > { %v1458_v40 = vpop.f32.mrf.mxu0  ;;  %v1478_v41 = vpop.f32.mrf.mxu1 }
 0x12d   : > { %v1059_v50 = vadd.f32 %v1457_v44, %v1018_v47  ;;  %v1479_v51 = vadd.f32 %v1478_v41, %v1477_v39 }
 0x12e   : > { %v1459_v45 = vpop.f32.mrf.mxu0  ;;  %v1480_v46 = vpop.f32.mrf.mxu1 }
 0x12f   : > { %v1460_v52 = vadd.f32 %v1459_v45, %v1458_v40  ;;  %v1100_v57 = vadd.f32 %v1479_v51, %v1059_v50 }
 0x130   : > { %v1481_v53 = vpop.f32.mrf.mxu1 }
 0x131   : > { %v1062_v55 = vadd.f32 %v1460_v52, %v1021_v54  ;;  %v1482_v56 = vadd.f32 %v1481_v53, %v1480_v46 }
 0x133   : > { %v1103_v63 = vadd.f32 %v1482_v56, %v1062_v55 }
 0x148   : > { %v1140_v59 = vpop.f32.mrf.mxu0 }
 0x149   : > { %v1141_v60 = vadd.f32 %v1140_v59, %v1100_v57 }
 0x14a   : > { %v1510_v61 = vpop.f32.mrf.mxu0 }
 0x14b   : > { %v1147_v62 = vadd.f32 %v1141_v60, %v308_v58 }
 0x14c   : > { %v1143_v1 = vpop.f32.mrf.mxu0 }
 0x14d   : > { %1149 = vst [vmem:[#allocation2] sm:$0xff] %v1147_v62  ;;  %v1144_v2 = vadd.f32 %v1143_v1, %v1103_v63  ;;  %1154 = sbr.rel (%p1388_p11) target bundleno = 382 (0x17e), region = 66 }
 0x14e   : > { %v1511_v3 = vpop.f32.mrf.mxu0 }
 0x14f   : > { %v1148_v4 = vadd.f32 %v1144_v2, %v309_v0 }
 0x151   : > { %1150 = vst [vmem:[#allocation2 + $0x8] sm:$0xff] %v1148_v4 }
 0x152   : > { %v1389_v6 = vld [vmem:[%s1876_s2] ss:$0 sm:$0xff] }
 0x154   : > { %v1155_v5 = vld [vmem:[#allocation2] sm:$0xff] }
 0x155   : > { %v1164_v8 = vadd.f32 %v1389_v6, %v1155_v5 }
 0x157   : > { %v1166_v10 = vsub.f32 0.0, %v1164_v8 }
 0x158   : > { %v1156_v7 = vld [vmem:[#allocation2 + $0x8] sm:$0xff] }
 0x159   : > { %v1165_v9 = vadd.f32 %v1389_v6, %v1156_v7  ;;  %v1168_v12 = vmul.f32 1.442695, %v1166_v10 }
 0x15b   : > { %v1167_v11 = vsub.f32 0.0, %v1165_v9  ;;  %1642 = vpow2.f32 %v1168_v12 }
 0x15d   : > { %v1170_v13 = vmul.f32 1.442695, %v1167_v11 }
 0x15f   : > { %1644 = vpow2.f32 %v1170_v13 }
 0x168   : > { %v1643_v14 = vpop.eup %1642 }
 0x169   : > { %v1172_v16 = vadd.f32 1.0, %v1643_v14 }
 0x16b   : > { %1646 = vrcp.f32 %v1172_v16 }
 0x16c   : > { %v1645_v15 = vpop.eup %1644 }
 0x16d   : > { %v1173_v17 = vadd.f32 1.0, %v1645_v15 }
 0x16f   : > { %1648 = vrcp.f32 %v1173_v17 }
 0x178   : > { %v1647_v18 = vpop.eup %1646 }
 0x179   : > { %1178 = vst [vmem:[%s1877_s3] sm:$0xff] %v1647_v18 }
 0x17c   : > { %v1649_v19 = vpop.eup %1648 }
 0x17d   : > { %1179 = vst [vmem:[%s1877_s3 + $0x8] sm:$0xff] %v1649_v19 }
 0x17e PF: > { %s13_s16 = sadd.s32 1, %s1688_s16   ;;  %s1878_s12 = smov %s1676_s13 }
 0x17f   : > { %p10_p12 = scmp.ge.s32.totalorder %s13_s16, 6   ;;  %s1879_s13 = smov %s1748_s20 }
 0x180   : > { %s1880_s14 = smov %s1684_s15  ;;  %s1881_s15 = smov %s1883_s17 }
 0x181   :  { %12 = sbr.rel (!%p10_p12) target bundleno = 3 (0x3), region = 113 }

</bundles_post_ra>
